<compile_context>
chip_gen: v7x
topology: tpu7x:2x2x1
jax: 0.10.0
libtpu: 0.0.40
codegen_flags: <defaults>
</compile_context>

<pallas_src>
import functools
import math

import jax
import jax.numpy as jnp
from jax.experimental import pallas as pl
from jax.experimental.pallas import tpu as pltpu


# ---------------------------------------------------------------------------
# Kernel
# ---------------------------------------------------------------------------
def _sdpa_kernel(q_ref, k_ref, v_ref, out_ref, *maybe_attn_ref, inv_temperature):
    """One grid step: Hb heads x TQ query rows against the full Lk keys.

    q_ref: (Hb, TQ, D)   k_ref: (Hb, Lk, D)   v_ref: (Hb, Lk, Dv)
    out_ref: (Hb, TQ, Dv)   [attn_ref: (Hb, TQ, Lk)]
    """
    attn_ref = maybe_attn_ref[0] if maybe_attn_ref else None

    # Scale q in its native dtype before the matmul — matches torch
    # (`q / temperature` precedes matmul) and is cheaper than scaling scores.
    q = q_ref[...] * inv_temperature       # native dtype (bf16 stays bf16)
    k = k_ref[...]
    v = v_ref[...]

    # scores = (q/T) @ k^T  ->  f32 accumulator on the MXU
    s = jnp.einsum("hqd,hkd->hqk", q, k, preferred_element_type=jnp.float32)

    # numerically-stable softmax along the last axis (f32 on VPU/EUP)
    m = jnp.max(s, axis=-1, keepdims=True)
    e = jnp.exp(s - m)
    denom = jnp.sum(e, axis=-1, keepdims=True)
    inv_denom = pl.reciprocal(denom, approx=True)       # EUP vrcp slot

    if attn_ref is not None:
        # Caller wants the attention matrix: normalize first (torch order),
        # then do attn @ v with attn cast to v's dtype.
        p = e * inv_denom
        out = jnp.einsum("hqk,hkd->hqd", p.astype(v.dtype), v,
                         preferred_element_type=jnp.float32)
        attn_ref[...] = p.astype(attn_ref.dtype)
    else:
        # Out-only path: fold the normalization AFTER the PV matmul
        # (fewer multiplies: TQ*Dv vs TQ*Lk; normalization stays in f32).
        out = jnp.einsum("hqk,hkd->hqd", e.astype(v.dtype), v,
                         preferred_element_type=jnp.float32) * inv_denom

    out_ref[...] = out.astype(out_ref.dtype)


# ---------------------------------------------------------------------------
# Tile-size heuristic (explicit VMEM budget; sized for v7x's 64 MiB VMEM)
# ---------------------------------------------------------------------------
_VMEM_TILE_BUDGET = 36 * 2**20     # tiles + f32 temporaries, double-buffered
_VMEM_LIMIT_BYTES = 48 * 2**20     # requested scoped-VMEM limit (headroom on v7x)
_DMA_TARGET_BYTES = 512 * 1024     # aim for >= ~512 KiB q tiles (HBM efficiency)


def _auto_tiles(BH, Lq, Lk, D, Dv, itemsize, with_attn):
    def step_bytes(hb, tq):
        ins = hb * (tq * D + Lk * (D + Dv)) * itemsize
        outs = hb * tq * (Dv + (Lk if with_attn else 0)) * itemsize
        f32_tmp = hb * tq * Lk * 4 * 2          # scores + exp in f32
        return 2 * (ins + outs) + f32_tmp       # x2: double buffering

    # Lq tile: full rows if small, else the largest multiple-of-8 divisor <= 256.
    tq = Lq
    if Lq > 256 and Lq % 8 == 0:
        tq = next((t for t in range(256, 7, -8) if Lq % t == 0), Lq)

    # Heads per step: enough that the q-tile DMA is ~>= 512 KiB, capped by the
    # VMEM budget; must divide BH so the grid is exact.
    want = max(1, -(-_DMA_TARGET_BYTES // max(1, tq * D * itemsize)))
    hb = 1
    for cand in range(min(BH, want), 0, -1):
        if BH % cand == 0 and step_bytes(cand, tq) <= _VMEM_TILE_BUDGET:
            hb = cand
            break

    # If even one head blows the budget, shrink the Lq tile (multiples of 8 only).
    while step_bytes(hb, tq) > _VMEM_TILE_BUDGET and Lq % 8 == 0 and tq > 8:
        nt = next((t for t in range(tq - 8, 7, -8) if Lq % t == 0), None)
        if nt is None:
            break
        tq = nt

    return hb, tq


# ---------------------------------------------------------------------------
# Wrapper
# ---------------------------------------------------------------------------
def scaled_dot_product_attention(q, k, v, temperature, *, return_attn=True):
    """q: [..., Lq, D], k: [..., Lk, D], v: [..., Lk, Dv]  (matching torch.matmul
    over the last two axes; all leading axes are flattened into one head axis).

    Returns (output, attn) like the PyTorch module, or just output when
    return_attn=False (skips the O(Lq*Lk) HBM writeback entirely).
    """
    batch_dims = q.shape[:-2]
    Lq, D = q.shape[-2:]
    Lk = k.shape[-2]
    Dv = v.shape[-1]
    BH = math.prod(batch_dims) if batch_dims else 1
    itemsize = q.dtype.itemsize

    qf = q.reshape(BH, Lq, D)
    kf = k.reshape(BH, Lk, D)
    vf = v.reshape(BH, Lk, Dv)

    Hb, TQ = _auto_tiles(BH, Lq, Lk, D, Dv, itemsize, return_attn)
    grid = (BH // Hb, Lq // TQ)

    in_specs = [
        pl.BlockSpec((Hb, TQ, D), lambda g, qi: (g, qi, 0)),
        pl.BlockSpec((Hb, Lk, D), lambda g, qi: (g, 0, 0)),   # K resident over qi
        pl.BlockSpec((Hb, Lk, Dv), lambda g, qi: (g, 0, 0)),  # V resident over qi
    ]
    out_shape = [jax.ShapeDtypeStruct((BH, Lq, Dv), q.dtype)]
    out_specs = [pl.BlockSpec((Hb, TQ, Dv), lambda g, qi: (g, qi, 0))]
    if return_attn:
        out_shape.append(jax.ShapeDtypeStruct((BH, Lq, Lk), q.dtype))
        out_specs.append(pl.BlockSpec((Hb, TQ, Lk), lambda g, qi: (g, qi, 0)))

    bytes_accessed = (qf.size + kf.size + vf.size + BH * Lq * Dv) * itemsize
    if return_attn:
        bytes_accessed += BH * Lq * Lk * itemsize
    cost = pl.CostEstimate(
        flops=2 * BH * Lq * Lk * (D + Dv),
        transcendentals=BH * Lq * Lk,
        bytes_accessed=bytes_accessed,
    )

    kernel = functools.partial(_sdpa_kernel,
                               inv_temperature=1.0 / float(temperature))

    results = pl.pallas_call(
        kernel,
        out_shape=out_shape,
        grid_spec=pltpu.PrefetchScalarGridSpec(
            num_scalar_prefetch=0,
            grid=grid,
            in_specs=in_specs,
            out_specs=out_specs,
        ),
        compiler_params=pltpu.CompilerParams(
            dimension_semantics=("parallel", "arbitrary"),
            vmem_limit_bytes=_VMEM_LIMIT_BYTES,
        ),
        cost_estimate=cost,
    )(qf, kf, vf)

    out_f = results[0].reshape(batch_dims + (Lq, Dv))
    if return_attn:
        attn_f = results[1].reshape(batch_dims + (Lq, Lk))
        return out_f, attn_f
    return out_f


# ---------------------------------------------------------------------------
# Reference & test
# ---------------------------------------------------------------------------
def _reference(q, k, v, temperature):
    scores = jnp.matmul(q / temperature, jnp.swapaxes(k, -2, -1))
    attn = jax.nn.softmax(scores, axis=-1)
    out = jnp.matmul(attn, v)
    return out, attn


if __name__ == "__main__":
    key = jax.random.PRNGKey(0)
    kq, kk, kv = jax.random.split(key, 3)

    # Shapes implied by EquivForceEncoder / EquivMultiHeadAttention:
    # q, k, v fed to ScaledDotProductAttention are [b, n_head, c, seq_len, d_k]
    # with n_head=1, c=N=8, seq_len=64, d_k=d_model=32.
    B, n_head, c, L, Dk = 2, 1, 8, 64, 32
    temperature = Dk ** 0.5

    q = jax.random.normal(kq, (B, n_head, c, L, Dk), dtype=jnp.float32)
    k = jax.random.normal(kk, (B, n_head, c, L, Dk), dtype=jnp.float32)
    v = jax.random.normal(kv, (B, n_head, c, L, Dk), dtype=jnp.float32)

    out_ref, attn_ref = _reference(q, k, v, temperature)

    # f32 path, both outputs (matches the PyTorch module's forward).
    out, attn = scaled_dot_product_attention(q, k, v, temperature, return_attn=True)
    out = jax.block_until_ready(out)
    attn = jax.block_until_ready(attn)
    assert out.shape == out_ref.shape and attn.shape == attn_ref.shape
    assert jnp.allclose(out, out_ref, atol=2e-3, rtol=2e-3), "output mismatch (f32)"
    assert jnp.allclose(attn, attn_ref, atol=2e-3, rtol=2e-3), "attn mismatch (f32)"

    # out-only path: skips the O(Lq*Lk) attention writeback, normalizes post-PV.
    out_only = scaled_dot_product_attention(q, k, v, temperature, return_attn=False)
    out_only = jax.block_until_ready(out_only)
    assert jnp.allclose(out_only, out_ref, atol=2e-3, rtol=2e-3), "output mismatch (no-attn)"

    # bf16 path: native-dtype MXU feeds with f32 softmax internally (smoke check).
    qb, kb, vb = (t.astype(jnp.bfloat16) for t in (q, k, v))
    out_bf16 = scaled_dot_product_attention(qb, kb, vb, temperature, return_attn=False)
    out_bf16 = jax.block_until_ready(out_bf16)
    assert jnp.allclose(out_bf16.astype(jnp.float32), out_ref, atol=1e-1, rtol=1e-1), \
        "output mismatch (bf16)"

    print("KERNEL_OK")
</pallas_src>

<mosaic_0001>
module attributes {stable_mosaic.version = 11 : i64} {
  func.func @_sdpa_kernel(%arg0: i32, %arg1: i32, %arg2: memref<16x64x32xf32, #tpu.memory_space<vmem>>, %arg3: memref<16x64x32xf32, #tpu.memory_space<vmem>>, %arg4: memref<16x64x32xf32, #tpu.memory_space<vmem>>, %arg5: memref<16x64x32xf32, #tpu.memory_space<vmem>>, %arg6: memref<16x64x64xf32, #tpu.memory_space<vmem>>) attributes {dimension_semantics = [#tpu.dimension_semantics<parallel>, #tpu.dimension_semantics<arbitrary>], iteration_bounds = array<i64: 1, 1>, scalar_prefetch = 0 : i64, scratch_operands = 0 : i64, tpu.core_type = #tpu.core_type<tc>, window_params = [{transform_indices = @transform_0, window_bounds = array<i64: 16, 64, 32>}, {transform_indices = @transform_1, window_bounds = array<i64: 16, 64, 32>}, {transform_indices = @transform_2, window_bounds = array<i64: 16, 64, 32>}, {transform_indices = @transform_3, window_bounds = array<i64: 16, 64, 32>}, {transform_indices = @transform_4, window_bounds = array<i64: 16, 64, 64>}]} {
    %c0 = arith.constant 0 : index
    %c0_0 = arith.constant 0 : index
    %c0_1 = arith.constant 0 : index
    %0 = vector.load %arg2[%c0, %c0_0, %c0_1] : memref<16x64x32xf32, #tpu.memory_space<vmem>>, vector<16x64x32xf32>
    %cst = arith.constant 0.176776692 : f32
    %1 = vector.broadcast %cst : f32 to vector<16x64x32xf32>
    %2 = arith.mulf %0, %1 : vector<16x64x32xf32>
    %c0_2 = arith.constant 0 : index
    %c0_3 = arith.constant 0 : index
    %c0_4 = arith.constant 0 : index
    %3 = vector.load %arg3[%c0_2, %c0_3, %c0_4] : memref<16x64x32xf32, #tpu.memory_space<vmem>>, vector<16x64x32xf32>
    %c0_5 = arith.constant 0 : index
    %c0_6 = arith.constant 0 : index
    %c0_7 = arith.constant 0 : index
    %4 = vector.load %arg4[%c0_5, %c0_6, %c0_7] : memref<16x64x32xf32, #tpu.memory_space<vmem>>, vector<16x64x32xf32>
    "tpu.trace_start"() <{level = 10 : i32, message = "hqd,hkd->hqk"}> : () -> ()
    %cst_8 = arith.constant dense<0.000000e+00> : vector<16x64x64xf32>
    %5 = tpu.matmul %2, %3, %cst_8 {dimension_numbers = #tpu.dot_dimension_numbers<[2], [2], [1], [1], [0, 0, 0, 1, 1, 1], [0], [0]>} : vector<16x64x32xf32>, vector<16x64x32xf32>, vector<16x64x64xf32> -> vector<16x64x64xf32>
    "tpu.trace_stop"() : () -> ()
    %cst_9 = arith.constant dense<0xFF800000> : vector<16x64xf32>
    %6 = vector.multi_reduction <maximumf>, %5, %cst_9 [2] : vector<16x64x64xf32> to vector<16x64xf32>
    %7 = vector.shape_cast %6 : vector<16x64xf32> to vector<16x64x1xf32>
    %8 = vector.broadcast %7 : vector<16x64x1xf32> to vector<16x64x64xf32>
    %9 = arith.subf %5, %8 : vector<16x64x64xf32>
    %10 = math.exp %9 : vector<16x64x64xf32>
    %cst_10 = arith.constant dense<0.000000e+00> : vector<16x64xf32>
    %11 = vector.multi_reduction <add>, %10, %cst_10 [2] : vector<16x64x64xf32> to vector<16x64xf32>
    %12 = vector.shape_cast %11 : vector<16x64xf32> to vector<16x64x1xf32>
    %13 = tpu.reciprocal %12 {approx = true} : vector<16x64x1xf32> -> vector<16x64x1xf32>
    %14 = vector.broadcast %13 : vector<16x64x1xf32> to vector<16x64x64xf32>
    %15 = arith.mulf %10, %14 : vector<16x64x64xf32>
    "tpu.trace_start"() <{level = 10 : i32, message = "hqk,hkd->hqd"}> : () -> ()
    %cst_11 = arith.constant dense<0.000000e+00> : vector<16x64x32xf32>
    %16 = tpu.matmul %15, %4, %cst_11 {dimension_numbers = #tpu.dot_dimension_numbers<[2], [1], [1], [2], [0, 0, 0, 1, 1, 2], [0], [0]>} : vector<16x64x64xf32>, vector<16x64x32xf32>, vector<16x64x32xf32> -> vector<16x64x32xf32>
    "tpu.trace_stop"() : () -> ()
    %c0_12 = arith.constant 0 : index
    %c0_13 = arith.constant 0 : index
    %c0_14 = arith.constant 0 : index
    %17 = vector.load %arg6[%c0_12, %c0_13, %c0_14] : memref<16x64x64xf32, #tpu.memory_space<vmem>>, vector<16x64x64xf32>
    tpu.vector_store %arg6[%c0_12, %c0_13, %c0_14], %15 {strides = array<i32>} : memref<16x64x64xf32, #tpu.memory_space<vmem>>, vector<16x64x64xf32>,
    %c0_15 = arith.constant 0 : index
    %c0_16 = arith.constant 0 : index
    %c0_17 = arith.constant 0 : index
    %18 = vector.load %arg5[%c0_15, %c0_16, %c0_17] : memref<16x64x32xf32, #tpu.memory_space<vmem>>, vector<16x64x32xf32>
    tpu.vector_store %arg5[%c0_15, %c0_16, %c0_17], %16 {strides = array<i32>} : memref<16x64x32xf32, #tpu.memory_space<vmem>>, vector<16x64x32xf32>,
    return
  }
  func.func @transform_0(%arg0: i32, %arg1: i32) -> (i32, i32, i32) {
    %c0_i32 = arith.constant 0 : i32
    %c0_i32_0 = arith.constant 0 : i32
    return %arg0, %arg1, %c0_i32 : i32, i32, i32
  }
  func.func @transform_1(%arg0: i32, %arg1: i32) -> (i32, i32, i32) {
    %c0_i32 = arith.constant 0 : i32
    %c0_i32_0 = arith.constant 0 : i32
    %c0_i32_1 = arith.constant 0 : i32
    return %arg0, %c0_i32, %c0_i32_0 : i32, i32, i32
  }
  func.func @transform_2(%arg0: i32, %arg1: i32) -> (i32, i32, i32) {
    %c0_i32 = arith.constant 0 : i32
    %c0_i32_0 = arith.constant 0 : i32
    %c0_i32_1 = arith.constant 0 : i32
    return %arg0, %c0_i32, %c0_i32_0 : i32, i32, i32
  }
  func.func @transform_3(%arg0: i32, %arg1: i32) -> (i32, i32, i32) {
    %c0_i32 = arith.constant 0 : i32
    %c0_i32_0 = arith.constant 0 : i32
    return %arg0, %arg1, %c0_i32 : i32, i32, i32
  }
  func.func @transform_4(%arg0: i32, %arg1: i32) -> (i32, i32, i32) {
    %c0_i32 = arith.constant 0 : i32
    %c0_i32_0 = arith.constant 0 : i32
    return %arg0, %arg1, %c0_i32 : i32, i32, i32
  }
}

</mosaic_0001>

<bundles_post_ra>
// kernel: tpu_custom_call.1
= control target key start
LH: loop header
LB: loop body
LE: loop exit
PB: predicated region body
PF: predicated region fallthrough
CT: control target
= control target key end

     0   :  { %vm529_vm0 = vcmask 261120   ;;  %s13903_s0 = inlined_call_operand.vmem [shape: f32[16,64,32], index: 0, kind: input, shape index: {}]   ;;  %s13904_s1 = inlined_call_operand.vmem [shape: f32[16,64,32], index: 1, kind: input, shape index: {}]   ;;  %s13905_s2 = inlined_call_operand.vmem [shape: f32[16,64,32], index: 2, kind: input, shape index: {}]   ;;  %s13906_s3 = inlined_call_operand.vmem [shape: f32[16,64,32], index: 3, kind: output, shape index: {0}]   ;;  %s13907_s4 = inlined_call_operand.hbm [shape: f32[16,64,64], index: 4, kind: output, shape index: {1}]  }
   0x1   :  { %v273_v0 = vld [vmem:[%s13904_s1] sm:$0xff]  ;;  %v274_v1 = vld [vmem:[%s13904_s1 + $0x8] sm:$0xff]  ;;  %vm9737_vm1 = vmpackc.low %vm529_vm0, %vm529_vm0 }
   0x2   :  { %v281_v2 = vld [vmem:[%s13904_s1 + $0x40] sm:$0xff]  ;;  %v8519_v3 = vpack.c.bf16 %v274_v1, %v273_v0  ;;  %v282_v5 = vld [vmem:[%s13904_s1 + $0x48] sm:$0xff]  ;;  %v275_v6 = vld [vmem:[%s13904_s1 + $0x10] sm:$0xff] }
   0x3   :  { %v8543_v7 = vpack.c.bf16 %v282_v5, %v281_v2  ;;  %v276_v8 = vld [vmem:[%s13904_s1 + $0x18] sm:$0xff]  ;;  %v283_v9 = vld [vmem:[%s13904_s1 + $0x50] sm:$0xff]  ;;  %v17_v13 = vld [vmem:[%s13903_s0] sm:$0xff] }
   0x4   :  { %v284_v10 = vld [vmem:[%s13904_s1 + $0x58] sm:$0xff]  ;;  %8521 = vmatprep.subr.msk.bf16.mxu0 %vm9737_vm1, %v8519_v3  ;;  %v8525_v11 = vpack.c.bf16 %v276_v8, %v275_v6  ;;  %v277_v14 = vld [vmem:[%s13904_s1 + $0x20] sm:$0xff]  ;;  %v278_v15 = vld [vmem:[%s13904_s1 + $0x28] sm:$0xff]  ;;  %v145_v16 = vmul.f32 0.17677669, %v17_v13 }
   0x5   :  { %v8549_v12 = vpack.c.bf16 %v284_v10, %v283_v9  ;;  %8545 = vmatprep.subr.msk.bf16.mxu1 %vm9737_vm1, %v8543_v7  ;;  %8524 = vmatpush3.bf16.xpose.msk.msra.mxu0 %vm9737_vm1, %v8519_v3  ;;  %v25_v17 = vld [vmem:[%s13903_s0 + $0x40] sm:$0xff]  ;;  %v286_v19 = vld [vmem:[%s13904_s1 + $0x68] sm:$0xff]  ;;  %v8531_v21 = vpack.c.bf16 %v278_v15, %v277_v14  ;;  %v279_v23 = vld [vmem:[%s13904_s1 + $0x30] sm:$0xff] }
   0x6   :  { %8548 = vmatpush3.bf16.xpose.msk.msra.mxu1 %vm9737_vm1, %v8543_v7  ;;  %8527 = vmatprep.subr.msk.bf16.mxu0 %vm9737_vm1, %v8525_v11  ;;  %v285_v18 = vld [vmem:[%s13904_s1 + $0x60] sm:$0xff]  ;;  %v153_v20 = vmul.f32 0.17677669, %v25_v17  ;;  %v280_v24 = vld [vmem:[%s13904_s1 + $0x38] sm:$0xff]  ;;  %v287_v25 = vld [vmem:[%s13904_s1 + $0x70] sm:$0xff] }
   0x7   :  { %8551 = vmatprep.subr.msk.bf16.mxu1 %vm9737_vm1, %v8549_v12  ;;  %7639 = vmatprep.mubr.msk.f32.mxu0 %vm529_vm0, %v145_v16  ;;  %v8555_v22 = vpack.c.bf16 %v286_v19, %v285_v18  ;;  %v288_v26 = vld [vmem:[%s13904_s1 + $0x78] sm:$0xff]  ;;  %v8537_v27 = vpack.c.bf16 %v280_v24, %v279_v23  ;;  %v289_v29 = vld [vmem:[%s13904_s1 + $0x80] sm:$0xff]  ;;  %v290_v30 = vld [vmem:[%s13904_s1 + $0x88] sm:$0xff] }
   0x8   :  { %7667 = vmatprep.mubr.msk.f32.mxu1 %vm529_vm0, %v153_v20  ;;  %v8561_v28 = vpack.c.bf16 %v288_v26, %v287_v25  ;;  %v297_v31 = vld [vmem:[%s13904_s1 + $0xc0] sm:$0xff]  ;;  %v298_v32 = vld [vmem:[%s13904_s1 + $0xc8] sm:$0xff]  ;;  %v8567_v33 = vpack.c.bf16 %v290_v30, %v289_v29  ;;  %v27_v37 = vld [vmem:[%s13903_s0 + $0x50] sm:$0xff] }
   0x9   :  { %v8591_v34 = vpack.c.bf16 %v298_v32, %v297_v31  ;;  %v18_v35 = vld [vmem:[%s13903_s0 + $0x8] sm:$0xff]  ;;  %v19_v39 = vld [vmem:[%s13903_s0 + $0x10] sm:$0xff]  ;;  %v300_v41 = vld [vmem:[%s13904_s1 + $0xd8] sm:$0xff]  ;;  %v155_v46 = vmul.f32 0.17677669, %v27_v37 }
   0xa   :  { %v26_v36 = vld [vmem:[%s13903_s0 + $0x48] sm:$0xff]  ;;  %v146_v38 = vmul.f32 0.17677669, %v18_v35  ;;  %v299_v40 = vld [vmem:[%s13904_s1 + $0xd0] sm:$0xff]  ;;  %v20_v43 = vld [vmem:[%s13903_s0 + $0x18] sm:$0xff] }
   0xb   :  { %v154_v42 = vmul.f32 0.17677669, %v26_v36  ;;  %v291_v44 = vld [vmem:[%s13904_s1 + $0x90] sm:$0xff]  ;;  %v292_v45 = vld [vmem:[%s13904_s1 + $0x98] sm:$0xff]  ;;  %v21_v48 = vld [vmem:[%s13903_s0 + $0x20] sm:$0xff]  ;;  %v8597_v50 = vpack.c.bf16 %v300_v41, %v299_v40 }
   0xc   :  { %v28_v47 = vld [vmem:[%s13903_s0 + $0x58] sm:$0xff]  ;;  %v147_v49 = vmul.f32 0.17677669, %v19_v39  ;;  %v29_v51 = vld [vmem:[%s13903_s0 + $0x60] sm:$0xff]  ;;  %v148_v52 = vmul.f32 0.17677669, %v20_v43  ;;  %v8573_v53 = vpack.c.bf16 %v292_v45, %v291_v44 }
   0xd   :  { %8530 = vmatpush3.bf16.xpose.msk.msra.mxu0 %vm9737_vm1, %v8525_v11  ;;  %v156_v54 = vmul.f32 0.17677669, %v28_v47  ;;  %v149_v55 = vmul.f32 0.17677669, %v21_v48  ;;  %v22_v56 = vld [vmem:[%s13903_s0 + $0x28] sm:$0xff]  ;;  %v293_v59 = vld [vmem:[%s13904_s1 + $0xa0] sm:$0xff] }
   0xe   :  { %8554 = vmatpush3.bf16.xpose.msk.msra.mxu1 %vm9737_vm1, %v8549_v12  ;;  %8533 = vmatprep.subr.msk.bf16.mxu0 %vm9737_vm1, %v8531_v21  ;;  %v157_v57 = vmul.f32 0.17677669, %v29_v51  ;;  %v30_v58 = vld [vmem:[%s13903_s0 + $0x68] sm:$0xff]  ;;  %v301_v61 = vld [vmem:[%s13904_s1 + $0xe0] sm:$0xff]  ;;  %v150_v63 = vmul.f32 0.17677669, %v22_v56 }
   0xf   :  { %8557 = vmatprep.subr.msk.bf16.mxu1 %vm9737_vm1, %v8555_v22  ;;  %v294_v60 = vld [vmem:[%s13904_s1 + $0xa8] sm:$0xff]  ;;  %v31_v0 = vld [vmem:[%s13903_s0 + $0x70] sm:$0xff]  ;;  %v158_v1 = vmul.f32 0.17677669, %v30_v58  ;;  %v32_v5 = vld [vmem:[%s13903_s0 + $0x78] sm:$0xff] }
  0x10   :  { %v302_v62 = vld [vmem:[%s13904_s1 + $0xe8] sm:$0xff]  ;;  %v23_v2 = vld [vmem:[%s13903_s0 + $0x30] sm:$0xff]  ;;  %v8579_v3 = vpack.c.bf16 %v294_v60, %v293_v59  ;;  %v24_v6 = vld [vmem:[%s13903_s0 + $0x38] sm:$0xff]  ;;  %v159_v8 = vmul.f32 0.17677669, %v31_v0 }
  0x11   :  { %v8603_v7 = vpack.c.bf16 %v302_v62, %v301_v61  ;;  %v41_v9 = vld [vmem:[%s13903_s0 + $0xc0] sm:$0xff]  ;;  %v151_v11 = vmul.f32 0.17677669, %v23_v2  ;;  %v160_v12 = vmul.f32 0.17677669, %v32_v5  ;;  %v295_v16 = vld [vmem:[%s13904_s1 + $0xb0] sm:$0xff] }
  0x12   :  { %v33_v10 = vld [vmem:[%s13903_s0 + $0x80] sm:$0xff]  ;;  %v152_v13 = vmul.f32 0.17677669, %v24_v6  ;;  %v169_v14 = vmul.f32 0.17677669, %v41_v9  ;;  %v296_v17 = vld [vmem:[%s13904_s1 + $0xb8] sm:$0xff] }
  0x13   :  { %v161_v15 = vmul.f32 0.17677669, %v33_v10  ;;  %v303_v18 = vld [vmem:[%s13904_s1 + $0xf0] sm:$0xff]  ;;  %v304_v19 = vld [vmem:[%s13904_s1 + $0xf8] sm:$0xff]  ;;  %v8585_v20 = vpack.c.bf16 %v296_v17, %v295_v16  ;;  %v306_v23 = vld [vmem:[%s13904_s1 + $0x108] sm:$0xff] }
  0x14   :  { %v313_v24 = vld [vmem:[%s13904_s1 + $0x140] sm:$0xff]  ;;  %v314_v25 = vld [vmem:[%s13904_s1 + $0x148] sm:$0xff]  ;;  %v43_v30 = vld [vmem:[%s13903_s0 + $0xd0] sm:$0xff] }
  0x15   :  { %8536 = vmatpush3.bf16.xpose.msk.msra.mxu0 %vm9737_vm1, %v8531_v21  ;;  %v8609_v21 = vpack.c.bf16 %v304_v19, %v303_v18  ;;  %v42_v29 = vld [vmem:[%s13903_s0 + $0xc8] sm:$0xff]  ;;  %v35_v32 = vld [vmem:[%s13903_s0 + $0x90] sm:$0xff]  ;;  %v36_v36 = vld [vmem:[%s13903_s0 + $0x98] sm:$0xff]  ;;  %v171_v39 = vmul.f32 0.17677669, %v43_v30 }
  0x16   :  { %8560 = vmatpush3.bf16.xpose.msk.msra.mxu1 %vm9737_vm1, %v8555_v22  ;;  %8539 = vmatprep.subr.msk.bf16.mxu0 %vm9737_vm1, %v8537_v27  ;;  %v305_v22 = vld [vmem:[%s13904_s1 + $0x100] sm:$0xff]  ;;  %v170_v35 = vmul.f32 0.17677669, %v42_v29  ;;  %v307_v37 = vld [vmem:[%s13904_s1 + $0x110] sm:$0xff]  ;;  %v44_v40 = vld [vmem:[%s13903_s0 + $0xd8] sm:$0xff] }
  0x17   :  { %8563 = vmatprep.subr.msk.bf16.mxu1 %vm9737_vm1, %v8561_v28  ;;  %v8615_v26 = vpack.c.bf16 %v306_v23, %v305_v22  ;;  %v37_v41 = vld [vmem:[%s13903_s0 + $0xa0] sm:$0xff]  ;;  %v164_v45 = vmul.f32 0.17677669, %v36_v36  ;;  %v172_v47 = vmul.f32 0.17677669, %v44_v40  ;;  %v46_v51 = vld [vmem:[%s13903_s0 + $0xe8] sm:$0xff] }
  0x18   :  { %v45_v44 = vld [vmem:[%s13903_s0 + $0xe0] sm:$0xff]  ;;  %v165_v48 = vmul.f32 0.17677669, %v37_v41  ;;  %v174_v58 = vmul.f32 0.17677669, %v46_v51  ;;  %v39_v59 = vld [vmem:[%s13903_s0 + $0xb0] sm:$0xff] }
  0x1d   :  { %8542 = vmatpush3.bf16.xpose.msk.msra.mxu0 %vm9737_vm1, %v8537_v27  ;;  %v8639_v27 = vpack.c.bf16 %v314_v25, %v313_v24 }
  0x1e   :  { %8566 = vmatpush3.bf16.xpose.msk.msra.mxu1 %vm9737_vm1, %v8561_v28  ;;  %8569 = vmatprep.subr.msk.bf16.mxu0 %vm9737_vm1, %v8567_v33  ;;  %v34_v28 = vld [vmem:[%s13903_s0 + $0x88] sm:$0xff] }
  0x1f   :  { %8593 = vmatprep.subr.msk.bf16.mxu1 %vm9737_vm1, %v8591_v34  ;;  %v162_v31 = vmul.f32 0.17677669, %v34_v28 }
  0x24   :  { %7640 = vmatmul.mubr.msk.f32.vlgmr.msra.gmra.mrb[0].mxu0 %vm529_vm0, %v146_v38  ;;  %v308_v38 = vld [vmem:[%s13904_s1 + $0x118] sm:$0xff] }
  0x25   :  { %7668 = vmatmul.mubr.msk.f32.vlgmr.msra.gmra.mrb[0].mxu1 %vm529_vm0, %v154_v42  ;;  %8572 = vmatpush3.bf16.xpose.msk.msra.mxu0 %vm9737_vm1, %v8567_v33  ;;  %v315_v33 = vld [vmem:[%s13904_s1 + $0x150] sm:$0xff]  ;;  %v163_v42 = vmul.f32 0.17677669, %v35_v32 }
  0x26   :  { %8596 = vmatpush3.bf16.xpose.msk.msra.mxu1 %vm9737_vm1, %v8591_v34  ;;  %7670 = vmatprep.mubr.msk.f32.mxu1 %vm529_vm0, %v155_v46  ;;  %v316_v34 = vld [vmem:[%s13904_s1 + $0x158] sm:$0xff]  ;;  %v8621_v46 = vpack.c.bf16 %v308_v38, %v307_v37 }
  0x27   :  { %7642 = vmatprep.mubr.msk.f32.mxu0 %vm529_vm0, %v147_v49  ;;  %8599 = vmatprep.subr.msk.bf16.mxu1 %vm9737_vm1, %v8597_v50  ;;  %v8645_v43 = vpack.c.bf16 %v316_v34, %v315_v33  ;;  %v38_v49 = vld [vmem:[%s13903_s0 + $0xa8] sm:$0xff] }
  0x28   :  { %7643 = vmatmul.mubr.msk.f32.gmra.mrb[2].mxu0 %vm529_vm0, %v148_v52  ;;  %8575 = vmatprep.subr.msk.bf16.mxu0 %vm9737_vm1, %v8573_v53  ;;  %v309_v52 = vld [vmem:[%s13904_s1 + $0x120] sm:$0xff]  ;;  %v166_v56 = vmul.f32 0.17677669, %v38_v49 }
  0x29   :  { %7671 = vmatmul.mubr.msk.f32.gmra.mrb[2].mxu1 %vm529_vm0, %v156_v54  ;;  %7645 = vmatprep.mubr.msk.f32.mxu0 %vm529_vm0, %v149_v55  ;;  %v317_v54 = vld [vmem:[%s13904_s1 + $0x160] sm:$0xff]  ;;  %v318_v55 = vld [vmem:[%s13904_s1 + $0x168] sm:$0xff] }
  0x2a   :  { %7673 = vmatprep.mubr.msk.f32.mxu1 %vm529_vm0, %v157_v57  ;;  %v47_v57 = vld [vmem:[%s13903_s0 + $0xf0] sm:$0xff] }
  0x2c   :  { %7646 = vmatmul.mubr.msk.f32.gmra.mrb[4].mxu0 %vm529_vm0, %v150_v63 }
  0x2d   :  { %8578 = vmatpush3.bf16.xpose.msk.msra.mxu0 %vm9737_vm1, %v8573_v53  ;;  %7674 = vmatmul.mubr.msk.f32.gmra.mrb[4].mxu1 %vm529_vm0, %v158_v1  ;;  %v310_v53 = vld [vmem:[%s13904_s1 + $0x128] sm:$0xff] }
  0x2e   :  { %8602 = vmatpush3.bf16.xpose.msk.msra.mxu1 %vm9737_vm1, %v8597_v50  ;;  %8581 = vmatprep.subr.msk.bf16.mxu0 %vm9737_vm1, %v8579_v3  ;;  %v173_v50 = vmul.f32 0.17677669, %v45_v44 }
  0x2f   :  { %8605 = vmatprep.subr.msk.bf16.mxu1 %vm9737_vm1, %v8603_v7  ;;  %7676 = vmatprep.mubr.msk.f32.mxu1 %vm529_vm0, %v159_v8 }
  0x30   :  { %7648 = vmatprep.mubr.msk.f32.mxu0 %vm529_vm0, %v151_v11 }
  0x31   :  { %7677 = vmatmul.mubr.msk.f32.gmra.mrb[6].mxu1 %vm529_vm0, %v160_v12  ;;  %7649 = vmatmul.mubr.msk.f32.gmra.mrb[6].mxu0 %vm529_vm0, %v152_v13 }
  0x32   :  { %7723 = vmatprep.mubr.msk.f32.mxu1 %vm529_vm0, %v169_v14  ;;  %7695 = vmatprep.mubr.msk.f32.mxu0 %vm529_vm0, %v161_v15 }
  0x35   :  { %8584 = vmatpush3.bf16.xpose.msk.msra.mxu0 %vm9737_vm1, %v8579_v3 }
  0x36   :  { %8608 = vmatpush3.bf16.xpose.msk.msra.mxu1 %vm9737_vm1, %v8603_v7  ;;  %8587 = vmatprep.subr.msk.bf16.mxu0 %vm9737_vm1, %v8585_v20 }
  0x37   :  { %8611 = vmatprep.subr.msk.bf16.mxu1 %vm9737_vm1, %v8609_v21 }
  0x3d   :  { %8590 = vmatpush3.bf16.xpose.msk.msra.mxu0 %vm9737_vm1, %v8585_v20 }
  0x3e   :  { %8614 = vmatpush3.bf16.xpose.msk.msra.mxu1 %vm9737_vm1, %v8609_v21  ;;  %8617 = vmatprep.subr.msk.bf16.mxu0 %vm9737_vm1, %v8615_v26 }
  0x3f   :  { %8641 = vmatprep.subr.msk.bf16.mxu1 %vm9737_vm1, %v8639_v27 }
  0x44   :  { %7696 = vmatmul.mubr.msk.f32.vlgmr.msra.gmra.mrb[8].mxu0 %vm529_vm0, %v162_v31 }
  0x45   :  { %7724 = vmatmul.mubr.msk.f32.vlgmr.msra.gmra.mrb[8].mxu1 %vm529_vm0, %v170_v35  ;;  %8620 = vmatpush3.bf16.xpose.msk.msra.mxu0 %vm9737_vm1, %v8615_v26 }
  0x46   :  { %8644 = vmatpush3.bf16.xpose.msk.msra.mxu1 %vm9737_vm1, %v8639_v27  ;;  %7726 = vmatprep.mubr.msk.f32.mxu1 %vm529_vm0, %v171_v39 }
  0x47   :  { %7698 = vmatprep.mubr.msk.f32.mxu0 %vm529_vm0, %v163_v42  ;;  %8647 = vmatprep.subr.msk.bf16.mxu1 %vm9737_vm1, %v8645_v43 }
  0x48   :  { %7699 = vmatmul.mubr.msk.f32.gmra.mrb[10].mxu0 %vm529_vm0, %v164_v45  ;;  %8623 = vmatprep.subr.msk.bf16.mxu0 %vm9737_vm1, %v8621_v46 }
  0x49   :  { %7727 = vmatmul.mubr.msk.f32.gmra.mrb[10].mxu1 %vm529_vm0, %v172_v47  ;;  %7701 = vmatprep.mubr.msk.f32.mxu0 %vm529_vm0, %v165_v48 }
  0x4a   :  { %10 = vsyncpa [#allocation3], 0  ;;  %7729 = vmatprep.mubr.msk.f32.mxu1 %vm529_vm0, %v173_v50  ;;  %v8627_v60 = vpack.c.bf16 %v310_v53, %v309_v52  ;;  %v48_v61 = vld [vmem:[%s13903_s0 + $0xf8] sm:$0xff]  ;;  %v8651_v63 = vpack.c.bf16 %v318_v55, %v317_v54  ;;  %v175_v0 = vmul.f32 0.17677669, %v47_v57  ;;  %v57_v1 = vld [vmem:[%s13903_s0 + $0x140] sm:$0xff] }
  0x4b   :  { %v40_v62 = vld [vmem:[%s13903_s0 + $0xb8] sm:$0xff]  ;;  %v49_v2 = vld [vmem:[%s13903_s0 + $0x100] sm:$0xff]  ;;  %v167_v3 = vmul.f32 0.17677669, %v39_v59  ;;  %v176_v5 = vmul.f32 0.17677669, %v48_v61 }
  0x4c   :  { %7702 = vmatmul.mubr.msk.f32.gmra.mrb[12].mxu0 %vm529_vm0, %v166_v56  ;;  %v168_v6 = vmul.f32 0.17677669, %v40_v62  ;;  %v185_v7 = vmul.f32 0.17677669, %v57_v1  ;;  %v177_v8 = vmul.f32 0.17677669, %v49_v2 }
  0x4d   :  { %8626 = vmatpush3.bf16.xpose.msk.msra.mxu0 %vm9737_vm1, %v8621_v46  ;;  %7730 = vmatmul.mubr.msk.f32.gmra.mrb[12].mxu1 %vm529_vm0, %v174_v58  ;;  %v311_v9 = vld [vmem:[%s13904_s1 + $0x130] sm:$0xff]  ;;  %v312_v10 = vld [vmem:[%s13904_s1 + $0x138] sm:$0xff]  ;;  %v321_v15 = vld [vmem:[%s13904_s1 + $0x180] sm:$0xff]  ;;  %vm2978_vm2 = vcmask 523264   ;;  %s9698_s21 = smov [#allocation2]  }
  0x4e   :  { %8650 = vmatpush3.bf16.xpose.msk.msra.mxu1 %vm9737_vm1, %v8645_v43  ;;  %8629 = vmatprep.subr.msk.bf16.mxu0 %vm9737_vm1, %v8627_v60  ;;  %v319_v11 = vld [vmem:[%s13904_s1 + $0x170] sm:$0xff]  ;;  %v320_v12 = vld [vmem:[%s13904_s1 + $0x178] sm:$0xff]  ;;  %v8633_v13 = vpack.c.bf16 %v312_v10, %v311_v9  ;;  %v322_v16 = vld [vmem:[%s13904_s1 + $0x188] sm:$0xff]  ;;  %s6714_s22 = sshll.u32 %s9698_s21, 4  ;;  %s6715_s22 = int_to_ptr.vmem [resolvable:$true] %s6714_s22 }
  0x4f   :  { %8653 = vmatprep.subr.msk.bf16.mxu1 %vm9737_vm1, %v8651_v63  ;;  %7732 = vmatprep.mubr.msk.f32.mxu1 %vm529_vm0, %v175_v0  ;;  %v8657_v14 = vpack.c.bf16 %v320_v12, %v319_v11  ;;  %v329_v17 = vld [vmem:[%s13904_s1 + $0x1c0] sm:$0xff]  ;;  %v330_v18 = vld [vmem:[%s13904_s1 + $0x1c8] sm:$0xff]  ;;  %v8663_v19 = vpack.c.bf16 %v322_v16, %v321_v15  ;;  %v59_v23 = vld [vmem:[%s13903_s0 + $0x150] sm:$0xff]  ;;  %s9674_s23 = scalar_lea.vmem %s6715_s22, 16384  ;;  %p9679_p1 = scmp.lt.s32.totalorder %s6715_s22, %s6715_s22 }
  0x50   :  { %7704 = vmatprep.mubr.msk.f32.mxu0 %vm529_vm0, %v167_v3  ;;  %v8687_v20 = vpack.c.bf16 %v330_v18, %v329_v17  ;;  %v50_v21 = vld [vmem:[%s13903_s0 + $0x108] sm:$0xff]  ;;  %v51_v25 = vld [vmem:[%s13903_s0 + $0x110] sm:$0xff]  ;;  %v332_v27 = vld [vmem:[%s13904_s1 + $0x1d8] sm:$0xff]  ;;  %v187_v32 = vmul.f32 0.17677669, %v59_v23  ;;  %p9675_p0 = scmp.ne.s32.totalorder %s6715_s22, %s9674_s23  ;;  %p9680_p2 = scmp.lt.s32.totalorder %s9674_s23, %s9674_s23 }
  0x51   :  { %7733 = vmatmul.mubr.msk.f32.gmra.mrb[14].mxu1 %vm529_vm0, %v176_v5  ;;  %7705 = vmatmul.mubr.msk.f32.gmra.mrb[14].mxu0 %vm529_vm0, %v168_v6  ;;  %v58_v22 = vld [vmem:[%s13903_s0 + $0x148] sm:$0xff]  ;;  %v178_v24 = vmul.f32 0.17677669, %v50_v21  ;;  %v331_v26 = vld [vmem:[%s13904_s1 + $0x1d0] sm:$0xff]  ;;  %v52_v29 = vld [vmem:[%s13903_s0 + $0x118] sm:$0xff] }
  0x52   :  { %7779 = vmatprep.mubr.msk.f32.mxu1 %vm529_vm0, %v185_v7  ;;  %7751 = vmatprep.mubr.msk.f32.mxu0 %vm529_vm0, %v177_v8  ;;  %v186_v28 = vmul.f32 0.17677669, %v58_v22  ;;  %v323_v30 = vld [vmem:[%s13904_s1 + $0x190] sm:$0xff]  ;;  %v324_v31 = vld [vmem:[%s13904_s1 + $0x198] sm:$0xff]  ;;  %v53_v34 = vld [vmem:[%s13903_s0 + $0x120] sm:$0xff]  ;;  %v8693_v36 = vpack.c.bf16 %v332_v27, %v331_v26  ;;  %p9681_p3 = por %p9680_p2, %p9679_p1 }
  0x53   :  { %v60_v33 = vld [vmem:[%s13903_s0 + $0x158] sm:$0xff]  ;;  %v179_v35 = vmul.f32 0.17677669, %v51_v25  ;;  %v61_v37 = vld [vmem:[%s13903_s0 + $0x160] sm:$0xff]  ;;  %v180_v38 = vmul.f32 0.17677669, %v52_v29  ;;  %v8669_v39 = vpack.c.bf16 %v324_v31, %v323_v30 }
  0x54   :  { %v188_v40 = vmul.f32 0.17677669, %v60_v33  ;;  %v181_v41 = vmul.f32 0.17677669, %v53_v34  ;;  %v54_v42 = vld [vmem:[%s13903_s0 + $0x128] sm:$0xff]  ;;  %v325_v45 = vld [vmem:[%s13904_s1 + $0x1a0] sm:$0xff]  ;;  %p9682_p4 = pnand %p9681_p3, %p9675_p0 }
  0x55   :  { %8632 = vmatpush3.bf16.xpose.msk.msra.mxu0 %vm9737_vm1, %v8627_v60  ;;  %v189_v43 = vmul.f32 0.17677669, %v61_v37  ;;  %v62_v44 = vld [vmem:[%s13903_s0 + $0x168] sm:$0xff]  ;;  %v333_v47 = vld [vmem:[%s13904_s1 + $0x1e0] sm:$0xff]  ;;  %v182_v49 = vmul.f32 0.17677669, %v54_v42 }
  0x56   :  { %8656 = vmatpush3.bf16.xpose.msk.msra.mxu1 %vm9737_vm1, %v8651_v63  ;;  %8635 = vmatprep.subr.msk.bf16.mxu0 %vm9737_vm1, %v8633_v13  ;;  %v326_v46 = vld [vmem:[%s13904_s1 + $0x1a8] sm:$0xff]  ;;  %v63_v50 = vld [vmem:[%s13903_s0 + $0x170] sm:$0xff]  ;;  %v190_v51 = vmul.f32 0.17677669, %v62_v44  ;;  %v64_v54 = vld [vmem:[%s13903_s0 + $0x178] sm:$0xff] }
  0x57   :  { %8659 = vmatprep.subr.msk.bf16.mxu1 %vm9737_vm1, %v8657_v14  ;;  %v334_v48 = vld [vmem:[%s13904_s1 + $0x1e8] sm:$0xff]  ;;  %v55_v52 = vld [vmem:[%s13903_s0 + $0x130] sm:$0xff]  ;;  %v8675_v53 = vpack.c.bf16 %v326_v46, %v325_v45  ;;  %v56_v55 = vld [vmem:[%s13903_s0 + $0x138] sm:$0xff]  ;;  %v191_v57 = vmul.f32 0.17677669, %v63_v50 }
  0x58   :  { %v8699_v56 = vpack.c.bf16 %v334_v48, %v333_v47  ;;  %v73_v58 = vld [vmem:[%s13903_s0 + $0x1c0] sm:$0xff]  ;;  %v183_v60 = vmul.f32 0.17677669, %v55_v52  ;;  %v192_v61 = vmul.f32 0.17677669, %v64_v54  ;;  %v327_v1 = vld [vmem:[%s13904_s1 + $0x1b0] sm:$0xff] }
  0x59   :  { %v65_v59 = vld [vmem:[%s13903_s0 + $0x180] sm:$0xff]  ;;  %v184_v62 = vmul.f32 0.17677669, %v56_v55  ;;  %v201_v63 = vmul.f32 0.17677669, %v73_v58  ;;  %v328_v2 = vld [vmem:[%s13904_s1 + $0x1b8] sm:$0xff] }
  0x5a   :  { %v193_v0 = vmul.f32 0.17677669, %v65_v59  ;;  %v335_v3 = vld [vmem:[%s13904_s1 + $0x1f0] sm:$0xff]  ;;  %v336_v5 = vld [vmem:[%s13904_s1 + $0x1f8] sm:$0xff]  ;;  %v8681_v6 = vpack.c.bf16 %v328_v2, %v327_v1  ;;  %v337_v8 = vld [vmem:[%s13904_s1 + $0x200] sm:$0xff] }
  0x5b   :  { %v8705_v7 = vpack.c.bf16 %v336_v5, %v335_v3  ;;  %v338_v9 = vld [vmem:[%s13904_s1 + $0x208] sm:$0xff]  ;;  %v345_v10 = vld [vmem:[%s13904_s1 + $0x240] sm:$0xff]  ;;  %v75_v16 = vld [vmem:[%s13903_s0 + $0x1d0] sm:$0xff] }
  0x5c   :  { %v346_v11 = vld [vmem:[%s13904_s1 + $0x248] sm:$0xff]  ;;  %v8711_v12 = vpack.c.bf16 %v338_v9, %v337_v8  ;;  %v67_v18 = vld [vmem:[%s13903_s0 + $0x190] sm:$0xff]  ;;  %v68_v22 = vld [vmem:[%s13903_s0 + $0x198] sm:$0xff]  ;;  %v203_v25 = vmul.f32 0.17677669, %v75_v16 }
  0x5d   :  { %8638 = vmatpush3.bf16.xpose.msk.msra.mxu0 %vm9737_vm1, %v8633_v13  ;;  %v8735_v13 = vpack.c.bf16 %v346_v11, %v345_v10  ;;  %v74_v15 = vld [vmem:[%s13903_s0 + $0x1c8] sm:$0xff]  ;;  %v339_v23 = vld [vmem:[%s13904_s1 + $0x210] sm:$0xff]  ;;  %v76_v26 = vld [vmem:[%s13903_s0 + $0x1d8] sm:$0xff]  ;;  %v196_v31 = vmul.f32 0.17677669, %v68_v22 }
  0x5e   :  { %8662 = vmatpush3.bf16.xpose.msk.msra.mxu1 %vm9737_vm1, %v8657_v14  ;;  %8665 = vmatprep.subr.msk.bf16.mxu0 %vm9737_vm1, %v8663_v19  ;;  %v66_v14 = vld [vmem:[%s13903_s0 + $0x188] sm:$0xff]  ;;  %v202_v21 = vmul.f32 0.17677669, %v74_v15  ;;  %v69_v27 = vld [vmem:[%s13903_s0 + $0x1a0] sm:$0xff]  ;;  %v204_v33 = vmul.f32 0.17677669, %v76_v26 }
  0x5f   :  { %8689 = vmatprep.subr.msk.bf16.mxu1 %vm9737_vm1, %v8687_v20  ;;  %v194_v17 = vmul.f32 0.17677669, %v66_v14  ;;  %v77_v30 = vld [vmem:[%s13903_s0 + $0x1e0] sm:$0xff]  ;;  %v197_v34 = vmul.f32 0.17677669, %v69_v27  ;;  %v78_v37 = vld [vmem:[%s13903_s0 + $0x1e8] sm:$0xff] }
  0x60   :  { %v206_v44 = vmul.f32 0.17677669, %v78_v37  ;;  %v71_v45 = vld [vmem:[%s13903_s0 + $0x1b0] sm:$0xff]  ;;  %v80_v47 = vld [vmem:[%s13903_s0 + $0x1f8] sm:$0xff]  ;;  %v81_v52 = vld [vmem:[%s13903_s0 + $0x200] sm:$0xff] }
  0x61   :  { %v72_v48 = vld [vmem:[%s13903_s0 + $0x1b8] sm:$0xff]  ;;  %v208_v54 = vmul.f32 0.17677669, %v80_v47  ;;  %v343_v58 = vld [vmem:[%s13904_s1 + $0x230] sm:$0xff]  ;;  %v354_v1 = vld [vmem:[%s13904_s1 + $0x288] sm:$0xff] }
  0x62   :  { %v200_v55 = vmul.f32 0.17677669, %v72_v48  ;;  %v344_v59 = vld [vmem:[%s13904_s1 + $0x238] sm:$0xff]  ;;  %v361_v2 = vld [vmem:[%s13904_s1 + $0x2c0] sm:$0xff]  ;;  %v362_v3 = vld [vmem:[%s13904_s1 + $0x2c8] sm:$0xff] }
  0x63   :  { %v82_v8 = vld [vmem:[%s13903_s0 + $0x208] sm:$0xff]  ;;  %v83_v9 = vld [vmem:[%s13903_s0 + $0x210] sm:$0xff]  ;;  %v356_v14 = vld [vmem:[%s13904_s1 + $0x298] sm:$0xff] }
  0x64   :  { %7752 = vmatmul.mubr.msk.f32.vlgmr.msra.gmra.mrb[16].mxu0 %vm529_vm0, %v178_v24  ;;  %v340_v24 = vld [vmem:[%s13904_s1 + $0x218] sm:$0xff]  ;;  %v91_v10 = vld [vmem:[%s13903_s0 + $0x250] sm:$0xff]  ;;  %v211_v15 = vmul.f32 0.17677669, %v83_v9  ;;  %v93_v22 = vld [vmem:[%s13903_s0 + $0x260] sm:$0xff] }
  0x65   :  { %7780 = vmatmul.mubr.msk.f32.vlgmr.msra.gmra.mrb[16].mxu1 %vm529_vm0, %v186_v28  ;;  %8668 = vmatpush3.bf16.xpose.msk.msra.mxu0 %vm9737_vm1, %v8663_v19  ;;  %v347_v19 = vld [vmem:[%s13904_s1 + $0x250] sm:$0xff]  ;;  %v195_v28 = vmul.f32 0.17677669, %v67_v18  ;;  %v84_v16 = vld [vmem:[%s13903_s0 + $0x218] sm:$0xff] }
  0x66   :  { %8692 = vmatpush3.bf16.xpose.msk.msra.mxu1 %vm9737_vm1, %v8687_v20  ;;  %7782 = vmatprep.mubr.msk.f32.mxu1 %vm529_vm0, %v187_v32  ;;  %v348_v20 = vld [vmem:[%s13904_s1 + $0x258] sm:$0xff]  ;;  %v8717_v32 = vpack.c.bf16 %v340_v24, %v339_v23  ;;  %v212_v24 = vmul.f32 0.17677669, %v84_v16 }
  0x67   :  { %7754 = vmatprep.mubr.msk.f32.mxu0 %vm529_vm0, %v179_v35  ;;  %8695 = vmatprep.subr.msk.bf16.mxu1 %vm9737_vm1, %v8693_v36  ;;  %v8741_v29 = vpack.c.bf16 %v348_v20, %v347_v19  ;;  %v70_v35 = vld [vmem:[%s13903_s0 + $0x1a8] sm:$0xff]  ;;  %v364_v18 = vld [vmem:[%s13904_s1 + $0x2d8] sm:$0xff]  ;;  %v219_v19 = vmul.f32 0.17677669, %v91_v10  ;;  %v379_v10 = vld [vmem:[%s13904_s1 + $0x350] sm:$0xff] }
  0x68   :  { %7755 = vmatmul.mubr.msk.f32.gmra.mrb[18].mxu0 %vm529_vm0, %v180_v38  ;;  %8671 = vmatprep.subr.msk.bf16.mxu0 %vm9737_vm1, %v8669_v39  ;;  %v341_v38 = vld [vmem:[%s13904_s1 + $0x220] sm:$0xff]  ;;  %v198_v42 = vmul.f32 0.17677669, %v70_v35  ;;  %v92_v20 = vld [vmem:[%s13903_s0 + $0x258] sm:$0xff] }
  0x69   :  { %7783 = vmatmul.mubr.msk.f32.gmra.mrb[18].mxu1 %vm529_vm0, %v188_v40  ;;  %7757 = vmatprep.mubr.msk.f32.mxu0 %vm529_vm0, %v181_v41  ;;  %v349_v40 = vld [vmem:[%s13904_s1 + $0x260] sm:$0xff]  ;;  %v350_v41 = vld [vmem:[%s13904_s1 + $0x268] sm:$0xff]  ;;  %v220_v26 = vmul.f32 0.17677669, %v92_v20  ;;  %v100_v9 = vld [vmem:[%s13903_s0 + $0x298] sm:$0xff] }
  0x6a   :  { %7785 = vmatprep.mubr.msk.f32.mxu1 %vm529_vm0, %v189_v43  ;;  %v79_v43 = vld [vmem:[%s13903_s0 + $0x1f0] sm:$0xff]  ;;  %v357_v35 = vld [vmem:[%s13904_s1 + $0x2a0] sm:$0xff]  ;;  %v132_v4 = vld [vmem:[%s13903_s0 + $0x398] sm:$0xff] }
  0x6b   :  { %v207_v50 = vmul.f32 0.17677669, %v79_v43  ;;  %v97_v43 = vld [vmem:[%s13903_s0 + $0x280] sm:$0xff] }
  0x6c   :  { %7758 = vmatmul.mubr.msk.f32.gmra.mrb[20].mxu0 %vm529_vm0, %v182_v49  ;;  %v8747_v49 = vpack.c.bf16 %v350_v41, %v349_v40  ;;  %v366_v40 = vld [vmem:[%s13904_s1 + $0x2e8] sm:$0xff] }
  0x6d   :  { %8674 = vmatpush3.bf16.xpose.msk.msra.mxu0 %vm9737_vm1, %v8669_v39  ;;  %7786 = vmatmul.mubr.msk.f32.gmra.mrb[20].mxu1 %vm529_vm0, %v190_v51  ;;  %v342_v39 = vld [vmem:[%s13904_s1 + $0x228] sm:$0xff]  ;;  %v89_v51 = vld [vmem:[%s13903_s0 + $0x240] sm:$0xff] }
  0x6e   :  { %8698 = vmatpush3.bf16.xpose.msk.msra.mxu1 %vm9737_vm1, %v8693_v36  ;;  %8677 = vmatprep.subr.msk.bf16.mxu0 %vm9737_vm1, %v8675_v53  ;;  %v205_v36 = vmul.f32 0.17677669, %v77_v30  ;;  %v8723_v46 = vpack.c.bf16 %v342_v39, %v341_v38  ;;  %v221_v30 = vmul.f32 0.17677669, %v93_v22  ;;  %v88_v38 = vld [vmem:[%s13903_s0 + $0x238] sm:$0xff]  ;;  %v365_v39 = vld [vmem:[%s13904_s1 + $0x2e0] sm:$0xff] }
  0x6f   :  { %8701 = vmatprep.subr.msk.bf16.mxu1 %vm9737_vm1, %v8699_v56  ;;  %7788 = vmatprep.mubr.msk.f32.mxu1 %vm529_vm0, %v191_v57  ;;  %v209_v57 = vmul.f32 0.17677669, %v81_v52  ;;  %v8795_v47 = vpack.c.bf16 %v366_v40, %v365_v39  ;;  %v360_v52 = vld [vmem:[%s13904_s1 + $0x2b8] sm:$0xff]  ;;  %v110_v22 = vld [vmem:[%s13903_s0 + $0x2e8] sm:$0xff] }
  0x70   :  { %7760 = vmatprep.mubr.msk.f32.mxu0 %vm529_vm0, %v183_v60  ;;  %v351_v60 = vld [vmem:[%s13904_s1 + $0x270] sm:$0xff] }
  0x71   :  { %7789 = vmatmul.mubr.msk.f32.gmra.mrb[22].mxu1 %vm529_vm0, %v192_v61  ;;  %7761 = vmatmul.mubr.msk.f32.gmra.mrb[22].mxu0 %vm529_vm0, %v184_v62  ;;  %v352_v61 = vld [vmem:[%s13904_s1 + $0x278] sm:$0xff]  ;;  %v8729_v62 = vpack.c.bf16 %v344_v59, %v343_v58  ;;  %v370_v58 = vld [vmem:[%s13904_s1 + $0x308] sm:$0xff]  ;;  %v377_v59 = vld [vmem:[%s13904_s1 + $0x340] sm:$0xff] }
  0x72   :  { %7835 = vmatprep.mubr.msk.f32.mxu1 %vm529_vm0, %v201_v63  ;;  %7807 = vmatprep.mubr.msk.f32.mxu0 %vm529_vm0, %v193_v0  ;;  %v8753_v63 = vpack.c.bf16 %v352_v61, %v351_v60  ;;  %v353_v0 = vld [vmem:[%s13904_s1 + $0x280] sm:$0xff]  ;;  %v378_v60 = vld [vmem:[%s13904_s1 + $0x348] sm:$0xff] }
  0x73   :  { %v8759_v5 = vpack.c.bf16 %v354_v1, %v353_v0  ;;  %v106_v0 = vld [vmem:[%s13903_s0 + $0x2c8] sm:$0xff]  ;;  %v99_v1 = vld [vmem:[%s13903_s0 + $0x290] sm:$0xff] }
  0x75   :  { %8680 = vmatpush3.bf16.xpose.msk.msra.mxu0 %vm9737_vm1, %v8675_v53  ;;  %v199_v53 = vmul.f32 0.17677669, %v71_v45  ;;  %v105_v45 = vld [vmem:[%s13903_s0 + $0x2c0] sm:$0xff] }
  0x76   :  { %8704 = vmatpush3.bf16.xpose.msk.msra.mxu1 %vm9737_vm1, %v8699_v56  ;;  %8683 = vmatprep.subr.msk.bf16.mxu0 %vm9737_vm1, %v8681_v6  ;;  %v217_v56 = vmul.f32 0.17677669, %v89_v51  ;;  %v359_v51 = vld [vmem:[%s13904_s1 + $0x2b0] sm:$0xff] }
  0x77   :  { %8707 = vmatprep.subr.msk.bf16.mxu1 %vm9737_vm1, %v8705_v7 }
  0x7d   :  { %8686 = vmatpush3.bf16.xpose.msk.msra.mxu0 %vm9737_vm1, %v8681_v6  ;;  %v8783_v6 = vpack.c.bf16 %v362_v3, %v361_v2  ;;  %v107_v2 = vld [vmem:[%s13903_s0 + $0x2d0] sm:$0xff] }
  0x7e   :  { %8710 = vmatpush3.bf16.xpose.msk.msra.mxu1 %vm9737_vm1, %v8705_v7  ;;  %8713 = vmatprep.subr.msk.bf16.mxu0 %vm9737_vm1, %v8711_v12  ;;  %v90_v7 = vld [vmem:[%s13903_s0 + $0x248] sm:$0xff] }
  0x7f   :  { %8737 = vmatprep.subr.msk.bf16.mxu1 %vm9737_vm1, %v8735_v13  ;;  %v218_v11 = vmul.f32 0.17677669, %v90_v7  ;;  %v372_v7 = vld [vmem:[%s13904_s1 + $0x318] sm:$0xff] }
  0x84   :  { %7808 = vmatmul.mubr.msk.f32.vlgmr.msra.gmra.mrb[24].mxu0 %vm529_vm0, %v194_v17  ;;  %v363_v17 = vld [vmem:[%s13904_s1 + $0x2d0] sm:$0xff] }
  0x85   :  { %7836 = vmatmul.mubr.msk.f32.vlgmr.msra.gmra.mrb[24].mxu1 %vm529_vm0, %v202_v21  ;;  %8716 = vmatpush3.bf16.xpose.msk.msra.mxu0 %vm9737_vm1, %v8711_v12  ;;  %v210_v12 = vmul.f32 0.17677669, %v82_v8  ;;  %v85_v21 = vld [vmem:[%s13903_s0 + $0x220] sm:$0xff]  ;;  %v227_v8 = vmul.f32 0.17677669, %v99_v1  ;;  %v116_v1 = vld [vmem:[%s13903_s0 + $0x318] sm:$0xff] }
  0x86   :  { %8740 = vmatpush3.bf16.xpose.msk.msra.mxu1 %vm9737_vm1, %v8735_v13  ;;  %7838 = vmatprep.mubr.msk.f32.mxu1 %vm529_vm0, %v203_v25  ;;  %v355_v13 = vld [vmem:[%s13904_s1 + $0x290] sm:$0xff]  ;;  %v8789_v25 = vpack.c.bf16 %v364_v18, %v363_v17  ;;  %v213_v27 = vmul.f32 0.17677669, %v85_v21  ;;  %v228_v17 = vmul.f32 0.17677669, %v100_v9  ;;  %v102_v21 = vld [vmem:[%s13903_s0 + $0x2a8] sm:$0xff] }
  0x87   :  { %7810 = vmatprep.mubr.msk.f32.mxu0 %vm529_vm0, %v195_v28  ;;  %8743 = vmatprep.subr.msk.bf16.mxu1 %vm9737_vm1, %v8741_v29  ;;  %v8765_v23 = vpack.c.bf16 %v356_v14, %v355_v13  ;;  %v94_v28 = vld [vmem:[%s13903_s0 + $0x268] sm:$0xff]  ;;  %v108_v13 = vld [vmem:[%s13903_s0 + $0x2d8] sm:$0xff]  ;;  %v101_v14 = vld [vmem:[%s13903_s0 + $0x2a0] sm:$0xff] }
  0x88   :  { %7811 = vmatmul.mubr.msk.f32.gmra.mrb[26].mxu0 %vm529_vm0, %v196_v31  ;;  %8719 = vmatprep.subr.msk.bf16.mxu0 %vm9737_vm1, %v8717_v32  ;;  %v87_v31 = vld [vmem:[%s13903_s0 + $0x230] sm:$0xff]  ;;  %v229_v20 = vmul.f32 0.17677669, %v101_v14  ;;  %v118_v14 = vld [vmem:[%s13903_s0 + $0x328] sm:$0xff] }
  0x89   :  { %7839 = vmatmul.mubr.msk.f32.gmra.mrb[26].mxu1 %vm529_vm0, %v204_v33  ;;  %7813 = vmatprep.mubr.msk.f32.mxu0 %vm529_vm0, %v197_v34  ;;  %v222_v33 = vmul.f32 0.17677669, %v94_v28  ;;  %v215_v37 = vmul.f32 0.17677669, %v87_v31  ;;  %v373_v28 = vld [vmem:[%s13904_s1 + $0x320] sm:$0xff]  ;;  %v104_v31 = vld [vmem:[%s13903_s0 + $0x2b8] sm:$0xff] }
  0x8a   :  { %7841 = vmatprep.mubr.msk.f32.mxu1 %vm529_vm0, %v205_v36  ;;  %v358_v36 = vld [vmem:[%s13904_s1 + $0x2a8] sm:$0xff]  ;;  %v232_v39 = vmul.f32 0.17677669, %v104_v31  ;;  %v137_v31 = vld [vmem:[%s13903_s0 + $0x3c0] sm:$0xff] }
  0x8c   :  { %7814 = vmatmul.mubr.msk.f32.gmra.mrb[28].mxu0 %vm529_vm0, %v198_v42  ;;  %v96_v42 = vld [vmem:[%s13903_s0 + $0x278] sm:$0xff] }
  0x8d   :  { %8722 = vmatpush3.bf16.xpose.msk.msra.mxu0 %vm9737_vm1, %v8717_v32  ;;  %7842 = vmatmul.mubr.msk.f32.gmra.mrb[28].mxu1 %vm529_vm0, %v206_v44  ;;  %v95_v32 = vld [vmem:[%s13903_s0 + $0x270] sm:$0xff]  ;;  %v8771_v44 = vpack.c.bf16 %v358_v36, %v357_v35  ;;  %v224_v48 = vmul.f32 0.17677669, %v96_v42  ;;  %v112_v35 = vld [vmem:[%s13903_s0 + $0x2f8] sm:$0xff]  ;;  %v113_v36 = vld [vmem:[%s13903_s0 + $0x300] sm:$0xff] }
  0x8e   :  { %8746 = vmatpush3.bf16.xpose.msk.msra.mxu1 %vm9737_vm1, %v8741_v29  ;;  %8725 = vmatprep.subr.msk.bf16.mxu0 %vm9737_vm1, %v8723_v46  ;;  %v86_v29 = vld [vmem:[%s13903_s0 + $0x228] sm:$0xff]  ;;  %v223_v41 = vmul.f32 0.17677669, %v95_v32  ;;  %v381_v32 = vld [vmem:[%s13904_s1 + $0x360] sm:$0xff]  ;;  %v241_v42 = vmul.f32 0.17677669, %v113_v36 }
  0x8f   :  { %8749 = vmatprep.subr.msk.bf16.mxu1 %vm9737_vm1, %v8747_v49  ;;  %7844 = vmatprep.mubr.msk.f32.mxu1 %vm529_vm0, %v207_v50  ;;  %v214_v34 = vmul.f32 0.17677669, %v86_v29  ;;  %v233_v50 = vmul.f32 0.17677669, %v105_v45  ;;  %v374_v29 = vld [vmem:[%s13904_s1 + $0x328] sm:$0xff]  ;;  %v376_v45 = vld [vmem:[%s13904_s1 + $0x338] sm:$0xff] }
  0x90   :  { %7816 = vmatprep.mubr.msk.f32.mxu0 %vm529_vm0, %v199_v53  ;;  %v367_v53 = vld [vmem:[%s13904_s1 + $0x2f0] sm:$0xff]  ;;  %v265_v36 = vmul.f32 0.17677669, %v137_v31 }
  0x91   :  { %7845 = vmatmul.mubr.msk.f32.gmra.mrb[30].mxu1 %vm529_vm0, %v208_v54  ;;  %7817 = vmatmul.mubr.msk.f32.gmra.mrb[30].mxu0 %vm529_vm0, %v200_v55  ;;  %v368_v54 = vld [vmem:[%s13904_s1 + $0x2f8] sm:$0xff]  ;;  %v8777_v55 = vpack.c.bf16 %v360_v52, %v359_v51  ;;  %v386_v51 = vld [vmem:[%s13904_s1 + $0x388] sm:$0xff]  ;;  %v393_v52 = vld [vmem:[%s13904_s1 + $0x3c0] sm:$0xff] }
  0x92   :  { %7891 = vmatprep.mubr.msk.f32.mxu1 %vm529_vm0, %v217_v56  ;;  %7863 = vmatprep.mubr.msk.f32.mxu0 %vm529_vm0, %v209_v57  ;;  %v8801_v56 = vpack.c.bf16 %v368_v54, %v367_v53  ;;  %v369_v57 = vld [vmem:[%s13904_s1 + $0x300] sm:$0xff]  ;;  %v394_v53 = vld [vmem:[%s13904_s1 + $0x3c8] sm:$0xff] }
  0x93   :  { %v8807_v61 = vpack.c.bf16 %v370_v58, %v369_v57  ;;  %v122_v57 = vld [vmem:[%s13903_s0 + $0x348] sm:$0xff]  ;;  %v115_v58 = vld [vmem:[%s13903_s0 + $0x310] sm:$0xff] }
  0x95   :  { %8728 = vmatpush3.bf16.xpose.msk.msra.mxu0 %vm9737_vm1, %v8723_v46  ;;  %v216_v46 = vmul.f32 0.17677669, %v88_v38  ;;  %v121_v38 = vld [vmem:[%s13903_s0 + $0x340] sm:$0xff] }
  0x96   :  { %8752 = vmatpush3.bf16.xpose.msk.msra.mxu1 %vm9737_vm1, %v8747_v49  ;;  %8731 = vmatprep.subr.msk.bf16.mxu0 %vm9737_vm1, %v8729_v62  ;;  %v225_v49 = vmul.f32 0.17677669, %v97_v43  ;;  %v249_v43 = vmul.f32 0.17677669, %v121_v38  ;;  %v392_v38 = vld [vmem:[%s13904_s1 + $0x3b8] sm:$0xff] }
  0x97   :  { %8755 = vmatprep.subr.msk.bf16.mxu1 %vm9737_vm1, %v8753_v63 }
  0x9d   :  { %8734 = vmatpush3.bf16.xpose.msk.msra.mxu0 %vm9737_vm1, %v8729_v62  ;;  %v8831_v62 = vpack.c.bf16 %v378_v60, %v377_v59  ;;  %v123_v59 = vld [vmem:[%s13903_s0 + $0x350] sm:$0xff] }
  0x9e   :  { %8758 = vmatpush3.bf16.xpose.msk.msra.mxu1 %vm9737_vm1, %v8753_v63  ;;  %8761 = vmatprep.subr.msk.bf16.mxu0 %vm9737_vm1, %v8759_v5  ;;  %v98_v63 = vld [vmem:[%s13903_s0 + $0x288] sm:$0xff] }
  0x9f   :  { %8785 = vmatprep.subr.msk.bf16.mxu1 %vm9737_vm1, %v8783_v6  ;;  %v226_v3 = vmul.f32 0.17677669, %v98_v63  ;;  %v388_v63 = vld [vmem:[%s13904_s1 + $0x398] sm:$0xff] }
  0xa4   :  { %7864 = vmatmul.mubr.msk.f32.vlgmr.msra.gmra.mrb[32].mxu0 %vm529_vm0, %v210_v12  ;;  %v235_v12 = vmul.f32 0.17677669, %v107_v2  ;;  %v395_v2 = vld [vmem:[%s13904_s1 + $0x3d0] sm:$0xff] }
  0xa5   :  { %7892 = vmatmul.mubr.msk.f32.vlgmr.msra.gmra.mrb[32].mxu1 %vm529_vm0, %v218_v11  ;;  %7866 = vmatprep.mubr.msk.f32.mxu0 %vm529_vm0, %v211_v15  ;;  %v380_v11 = vld [vmem:[%s13904_s1 + $0x358] sm:$0xff]  ;;  %v109_v15 = vld [vmem:[%s13903_s0 + $0x2e0] sm:$0xff] }
  0xa6   :  { %7894 = vmatprep.mubr.msk.f32.mxu1 %vm529_vm0, %v219_v19  ;;  %8764 = vmatpush3.bf16.xpose.msk.msra.mxu0 %vm9737_vm1, %v8759_v5  ;;  %v234_v5 = vmul.f32 0.17677669, %v106_v0  ;;  %v8837_v18 = vpack.c.bf16 %v380_v11, %v379_v10  ;;  %v236_v19 = vmul.f32 0.17677669, %v108_v13  ;;  %v243_v0 = vmul.f32 0.17677669, %v115_v58 }
  0xa7   :  { %8788 = vmatpush3.bf16.xpose.msk.msra.mxu1 %vm9737_vm1, %v8783_v6  ;;  %8767 = vmatprep.subr.msk.bf16.mxu0 %vm9737_vm1, %v8765_v23  ;;  %v371_v6 = vld [vmem:[%s13904_s1 + $0x310] sm:$0xff]  ;;  %v244_v10 = vmul.f32 0.17677669, %v116_v1 }
  0xa8   :  { %7867 = vmatmul.mubr.msk.f32.gmra.mrb[34].mxu0 %vm529_vm0, %v212_v24  ;;  %8791 = vmatprep.subr.msk.bf16.mxu1 %vm9737_vm1, %v8789_v25  ;;  %v8813_v16 = vpack.c.bf16 %v372_v7, %v371_v6  ;;  %v103_v24 = vld [vmem:[%s13903_s0 + $0x2b0] sm:$0xff]  ;;  %v124_v6 = vld [vmem:[%s13903_s0 + $0x358] sm:$0xff]  ;;  %v117_v7 = vld [vmem:[%s13903_s0 + $0x320] sm:$0xff] }
  0xa9   :  { %7895 = vmatmul.mubr.msk.f32.gmra.mrb[34].mxu1 %vm529_vm0, %v220_v26  ;;  %7869 = vmatprep.mubr.msk.f32.mxu0 %vm529_vm0, %v213_v27  ;;  %v230_v26 = vmul.f32 0.17677669, %v102_v21  ;;  %v238_v27 = vmul.f32 0.17677669, %v110_v22  ;;  %v245_v13 = vmul.f32 0.17677669, %v117_v7 }
  0xaa   :  { %7897 = vmatprep.mubr.msk.f32.mxu1 %vm529_vm0, %v221_v30  ;;  %v231_v30 = vmul.f32 0.17677669, %v103_v24  ;;  %v389_v21 = vld [vmem:[%s13904_s1 + $0x3a0] sm:$0xff]  ;;  %v390_v22 = vld [vmem:[%s13904_s1 + $0x3a8] sm:$0xff]  ;;  %v120_v24 = vld [vmem:[%s13903_s0 + $0x338] sm:$0xff] }
  0xac   :  { %7870 = vmatmul.mubr.msk.f32.gmra.mrb[36].mxu0 %vm529_vm0, %v214_v34 }
  0xad   :  { %7898 = vmatmul.mubr.msk.f32.gmra.mrb[36].mxu1 %vm529_vm0, %v222_v33  ;;  %7872 = vmatprep.mubr.msk.f32.mxu0 %vm529_vm0, %v215_v37  ;;  %v382_v33 = vld [vmem:[%s13904_s1 + $0x368] sm:$0xff]  ;;  %v8819_v37 = vpack.c.bf16 %v374_v29, %v373_v28  ;;  %v128_v28 = vld [vmem:[%s13903_s0 + $0x378] sm:$0xff]  ;;  %v129_v29 = vld [vmem:[%s13903_s0 + $0x380] sm:$0xff] }
  0xae   :  { %8770 = vmatpush3.bf16.xpose.msk.msra.mxu0 %vm9737_vm1, %v8765_v23  ;;  %7900 = vmatprep.mubr.msk.f32.mxu1 %vm529_vm0, %v223_v41  ;;  %v237_v23 = vmul.f32 0.17677669, %v109_v15  ;;  %v8843_v40 = vpack.c.bf16 %v382_v33, %v381_v32  ;;  %v240_v41 = vmul.f32 0.17677669, %v112_v35  ;;  %v126_v15 = vld [vmem:[%s13903_s0 + $0x368] sm:$0xff] }
  0xaf   :  { %8794 = vmatpush3.bf16.xpose.msk.msra.mxu1 %vm9737_vm1, %v8789_v25  ;;  %8773 = vmatprep.subr.msk.bf16.mxu0 %vm9737_vm1, %v8771_v44  ;;  %v111_v25 = vld [vmem:[%s13903_s0 + $0x2f0] sm:$0xff]  ;;  %v248_v32 = vmul.f32 0.17677669, %v120_v24  ;;  %v257_v35 = vmul.f32 0.17677669, %v129_v29  ;;  %v136_v29 = vld [vmem:[%s13903_s0 + $0x3b8] sm:$0xff] }
  0xb0   :  { %7873 = vmatmul.mubr.msk.f32.gmra.mrb[38].mxu0 %vm529_vm0, %v216_v46  ;;  %8797 = vmatprep.subr.msk.bf16.mxu1 %vm9737_vm1, %v8795_v47  ;;  %v239_v34 = vmul.f32 0.17677669, %v111_v25  ;;  %v383_v46 = vld [vmem:[%s13904_s1 + $0x370] sm:$0xff]  ;;  %v397_v25 = vld [vmem:[%s13904_s1 + $0x3e0] sm:$0xff] }
  0xb1   :  { %7901 = vmatmul.mubr.msk.f32.gmra.mrb[38].mxu1 %vm529_vm0, %v224_v48  ;;  %7919 = vmatprep.mubr.msk.f32.mxu0 %vm529_vm0, %v225_v49  ;;  %v143_v24 = vld [vmem:[%s13903_s0 + $0x3f0] sm:$0xff] }
  0xb2   :  { %7947 = vmatprep.mubr.msk.f32.mxu1 %vm529_vm0, %v233_v50  ;;  %v385_v50 = vld [vmem:[%s13904_s1 + $0x380] sm:$0xff]  ;;  %v271_v31 = vmul.f32 0.17677669, %v143_v24 }
  0xb3   :  { %v8855_v54 = vpack.c.bf16 %v386_v51, %v385_v50 }
  0xb6   :  { %8776 = vmatpush3.bf16.xpose.msk.msra.mxu0 %vm9737_vm1, %v8771_v44  ;;  %v375_v44 = vld [vmem:[%s13904_s1 + $0x330] sm:$0xff] }
  0xb7   :  { %8800 = vmatpush3.bf16.xpose.msk.msra.mxu1 %vm9737_vm1, %v8795_v47  ;;  %8779 = vmatprep.subr.msk.bf16.mxu0 %vm9737_vm1, %v8777_v55  ;;  %v384_v47 = vld [vmem:[%s13904_s1 + $0x378] sm:$0xff]  ;;  %v8825_v48 = vpack.c.bf16 %v376_v45, %v375_v44 }
  0xb8   :  { %8803 = vmatprep.subr.msk.bf16.mxu1 %vm9737_vm1, %v8801_v56  ;;  %v8849_v49 = vpack.c.bf16 %v384_v47, %v383_v46 }
  0xbe   :  { %8782 = vmatpush3.bf16.xpose.msk.msra.mxu0 %vm9737_vm1, %v8777_v55  ;;  %v8879_v55 = vpack.c.bf16 %v394_v53, %v393_v52 }
  0xbf   :  { %8806 = vmatpush3.bf16.xpose.msk.msra.mxu1 %vm9737_vm1, %v8801_v56  ;;  %8809 = vmatprep.subr.msk.bf16.mxu0 %vm9737_vm1, %v8807_v61  ;;  %v114_v56 = vld [vmem:[%s13903_s0 + $0x308] sm:$0xff] }
  0xc0   :  { %8833 = vmatprep.subr.msk.bf16.mxu1 %vm9737_vm1, %v8831_v62  ;;  %v242_v60 = vmul.f32 0.17677669, %v114_v56 }
  0xc5   :  { %7920 = vmatmul.mubr.msk.f32.vlgmr.msra.gmra.mrb[40].mxu0 %vm529_vm0, %v226_v3  ;;  %v396_v3 = vld [vmem:[%s13904_s1 + $0x3d8] sm:$0xff] }
  0xc6   :  { %7948 = vmatmul.mubr.msk.f32.vlgmr.msra.gmra.mrb[40].mxu1 %vm529_vm0, %v234_v5  ;;  %7922 = vmatprep.mubr.msk.f32.mxu0 %vm529_vm0, %v227_v8  ;;  %v251_v5 = vmul.f32 0.17677669, %v123_v59  ;;  %v125_v8 = vld [vmem:[%s13903_s0 + $0x360] sm:$0xff]  ;;  %v8885_v11 = vpack.c.bf16 %v396_v3, %v395_v2 }
  0xc7   :  { %7950 = vmatprep.mubr.msk.f32.mxu1 %vm529_vm0, %v235_v12  ;;  %8812 = vmatpush3.bf16.xpose.msk.msra.mxu0 %vm9737_vm1, %v8807_v61  ;;  %v250_v61 = vmul.f32 0.17677669, %v122_v57  ;;  %v252_v12 = vmul.f32 0.17677669, %v124_v6 }
  0xc8   :  { %8836 = vmatpush3.bf16.xpose.msk.msra.mxu1 %vm9737_vm1, %v8831_v62  ;;  %8815 = vmatprep.subr.msk.bf16.mxu0 %vm9737_vm1, %v8813_v16  ;;  %v387_v62 = vld [vmem:[%s13904_s1 + $0x390] sm:$0xff] }
  0xc9   :  { %7923 = vmatmul.mubr.msk.f32.gmra.mrb[42].mxu0 %vm529_vm0, %v228_v17  ;;  %8839 = vmatprep.subr.msk.bf16.mxu1 %vm9737_vm1, %v8837_v18  ;;  %v8861_v9 = vpack.c.bf16 %v388_v63, %v387_v62  ;;  %v119_v17 = vld [vmem:[%s13903_s0 + $0x330] sm:$0xff] }
  0xca   :  { %7951 = vmatmul.mubr.msk.f32.gmra.mrb[42].mxu1 %vm529_vm0, %v236_v19  ;;  %7925 = vmatprep.mubr.msk.f32.mxu0 %vm529_vm0, %v229_v20  ;;  %v246_v19 = vmul.f32 0.17677669, %v118_v14  ;;  %v254_v20 = vmul.f32 0.17677669, %v126_v15  ;;  %v131_v62 = vld [vmem:[%s13903_s0 + $0x390] sm:$0xff]  ;;  %v141_v15 = vld [vmem:[%s13903_s0 + $0x3e0] sm:$0xff] }
  0xcb   :  { %7953 = vmatprep.mubr.msk.f32.mxu1 %vm529_vm0, %v237_v23  ;;  %v247_v23 = vmul.f32 0.17677669, %v119_v17  ;;  %v259_v3 = vmul.f32 0.17677669, %v131_v62  ;;  %v260_v17 = vmul.f32 0.17677669, %v132_v4 }
  0xcd   :  { %7926 = vmatmul.mubr.msk.f32.gmra.mrb[44].mxu0 %vm529_vm0, %v230_v26  ;;  %v398_v26 = vld [vmem:[%s13904_s1 + $0x3e8] sm:$0xff] }
  0xce   :  { %7954 = vmatmul.mubr.msk.f32.gmra.mrb[44].mxu1 %vm529_vm0, %v238_v27  ;;  %7928 = vmatprep.mubr.msk.f32.mxu0 %vm529_vm0, %v231_v30  ;;  %v8867_v30 = vpack.c.bf16 %v390_v22, %v389_v21  ;;  %v8891_v33 = vpack.c.bf16 %v398_v26, %v397_v25  ;;  %v269_v21 = vmul.f32 0.17677669, %v141_v15  ;;  %v142_v22 = vld [vmem:[%s13903_s0 + $0x3e8] sm:$0xff] }
  0xcf   :  { %8818 = vmatpush3.bf16.xpose.msk.msra.mxu0 %vm9737_vm1, %v8813_v16  ;;  %7956 = vmatprep.mubr.msk.f32.mxu1 %vm529_vm0, %v239_v34  ;;  %v253_v16 = vmul.f32 0.17677669, %v125_v8  ;;  %v256_v34 = vmul.f32 0.17677669, %v128_v28 }
  0xd0   :  { %8842 = vmatpush3.bf16.xpose.msk.msra.mxu1 %vm9737_vm1, %v8837_v18  ;;  %8821 = vmatprep.subr.msk.bf16.mxu0 %vm9737_vm1, %v8819_v37  ;;  %v127_v18 = vld [vmem:[%s13903_s0 + $0x370] sm:$0xff] }
  0xd1   :  { %7929 = vmatmul.mubr.msk.f32.gmra.mrb[46].mxu0 %vm529_vm0, %v232_v39  ;;  %8845 = vmatprep.subr.msk.bf16.mxu1 %vm9737_vm1, %v8843_v40  ;;  %v255_v27 = vmul.f32 0.17677669, %v127_v18  ;;  %v399_v39 = vld [vmem:[%s13904_s1 + $0x3f0] sm:$0xff] }
  0xd2   :  { %7957 = vmatmul.mubr.msk.f32.gmra.mrb[46].mxu1 %vm529_vm0, %v240_v41  ;;  %7975 = vmatprep.mubr.msk.f32.mxu0 %vm529_vm0, %v241_v42 }
  0xd3   :  { %8003 = vmatprep.mubr.msk.f32.mxu1 %vm529_vm0, %v249_v43 }
  0xd7   :  { %8824 = vmatpush3.bf16.xpose.msk.msra.mxu0 %vm9737_vm1, %v8819_v37  ;;  %v391_v37 = vld [vmem:[%s13904_s1 + $0x3b0] sm:$0xff] }
  0xd8   :  { %8848 = vmatpush3.bf16.xpose.msk.msra.mxu1 %vm9737_vm1, %v8843_v40  ;;  %8827 = vmatprep.subr.msk.bf16.mxu0 %vm9737_vm1, %v8825_v48  ;;  %v400_v40 = vld [vmem:[%s13904_s1 + $0x3f8] sm:$0xff]  ;;  %v8873_v41 = vpack.c.bf16 %v392_v38, %v391_v37 }
  0xd9   :  { %8851 = vmatprep.subr.msk.bf16.mxu1 %vm9737_vm1, %v8849_v49  ;;  %v8897_v43 = vpack.c.bf16 %v400_v40, %v399_v39 }
  0xdf   :  { %8830 = vmatpush3.bf16.xpose.msk.msra.mxu0 %vm9737_vm1, %v8825_v48 }
  0xe0   :  { %8854 = vmatpush3.bf16.xpose.msk.msra.mxu1 %vm9737_vm1, %v8849_v49  ;;  %8857 = vmatprep.subr.msk.bf16.mxu0 %vm9737_vm1, %v8855_v54 }
  0xe1   :  { %8881 = vmatprep.subr.msk.bf16.mxu1 %vm9737_vm1, %v8879_v55 }
  0xe6   :  { %7976 = vmatmul.mubr.msk.f32.vlgmr.msra.gmra.mrb[48].mxu0 %vm529_vm0, %v242_v60  ;;  %v130_v60 = vld [vmem:[%s13903_s0 + $0x388] sm:$0xff] }
  0xe7   :  { %8004 = vmatmul.mubr.msk.f32.vlgmr.msra.gmra.mrb[48].mxu1 %vm529_vm0, %v250_v61  ;;  %7978 = vmatprep.mubr.msk.f32.mxu0 %vm529_vm0, %v243_v0  ;;  %v138_v61 = vld [vmem:[%s13903_s0 + $0x3c8] sm:$0xff]  ;;  %v139_v0 = vld [vmem:[%s13903_s0 + $0x3d0] sm:$0xff]  ;;  %v258_v1 = vmul.f32 0.17677669, %v130_v60 }
  0xe8   :  { %8006 = vmatprep.mubr.msk.f32.mxu1 %vm529_vm0, %v251_v5  ;;  %8860 = vmatpush3.bf16.xpose.msk.msra.mxu0 %vm9737_vm1, %v8855_v54  ;;  %v266_v2 = vmul.f32 0.17677669, %v138_v61  ;;  %v267_v8 = vmul.f32 0.17677669, %v139_v0 }
  0xe9   :  { %8884 = vmatpush3.bf16.xpose.msk.msra.mxu1 %vm9737_vm1, %v8879_v55  ;;  %8863 = vmatprep.subr.msk.bf16.mxu0 %vm9737_vm1, %v8861_v9 }
  0xea   :  { %7979 = vmatmul.mubr.msk.f32.gmra.mrb[50].mxu0 %vm529_vm0, %v244_v10  ;;  %8887 = vmatprep.subr.msk.bf16.mxu1 %vm9737_vm1, %v8885_v11 }
  0xeb   :  { %8007 = vmatmul.mubr.msk.f32.gmra.mrb[50].mxu1 %vm529_vm0, %v252_v12  ;;  %7981 = vmatprep.mubr.msk.f32.mxu0 %vm529_vm0, %v245_v13  ;;  %v140_v12 = vld [vmem:[%s13903_s0 + $0x3d8] sm:$0xff]  ;;  %v133_v13 = vld [vmem:[%s13903_s0 + $0x3a0] sm:$0xff] }
  0xec   :  { %8009 = vmatprep.mubr.msk.f32.mxu1 %vm529_vm0, %v253_v16  ;;  %v268_v18 = vmul.f32 0.17677669, %v140_v12 }
  0xee   :  { %7982 = vmatmul.mubr.msk.f32.gmra.mrb[52].mxu0 %vm529_vm0, %v246_v19  ;;  %v261_v19 = vmul.f32 0.17677669, %v133_v13 }
  0xef   :  { %8010 = vmatmul.mubr.msk.f32.gmra.mrb[52].mxu1 %vm529_vm0, %v254_v20  ;;  %7984 = vmatprep.mubr.msk.f32.mxu0 %vm529_vm0, %v247_v23  ;;  %v134_v20 = vld [vmem:[%s13903_s0 + $0x3a8] sm:$0xff]  ;;  %v135_v23 = vld [vmem:[%s13903_s0 + $0x3b0] sm:$0xff] }
  0xf0   :  { %8866 = vmatpush3.bf16.xpose.msk.msra.mxu0 %vm9737_vm1, %v8861_v9  ;;  %8012 = vmatprep.mubr.msk.f32.mxu1 %vm529_vm0, %v255_v27  ;;  %v262_v25 = vmul.f32 0.17677669, %v134_v20  ;;  %v270_v27 = vmul.f32 0.17677669, %v142_v22  ;;  %v263_v28 = vmul.f32 0.17677669, %v135_v23 }
  0xf1   :  { %8890 = vmatpush3.bf16.xpose.msk.msra.mxu1 %vm9737_vm1, %v8885_v11  ;;  %8869 = vmatprep.subr.msk.bf16.mxu0 %vm9737_vm1, %v8867_v30 }
  0xf2   :  { %7985 = vmatmul.mubr.msk.f32.gmra.mrb[54].mxu0 %vm529_vm0, %v248_v32  ;;  %8893 = vmatprep.subr.msk.bf16.mxu1 %vm9737_vm1, %v8891_v33  ;;  %v144_v32 = vld [vmem:[%s13903_s0 + $0x3f8] sm:$0xff] }
  0xf3   :  { %8013 = vmatmul.mubr.msk.f32.gmra.mrb[54].mxu1 %vm529_vm0, %v256_v34  ;;  %8031 = vmatprep.mubr.msk.f32.mxu0 %vm529_vm0, %v257_v35  ;;  %v264_v35 = vmul.f32 0.17677669, %v136_v29 }
  0xf4   :  { %8059 = vmatprep.mubr.msk.f32.mxu1 %vm529_vm0, %v265_v36  ;;  %v272_v36 = vmul.f32 0.17677669, %v144_v32 }
  0xf7   :  { %v10816_v42 = vpop.f32.mrb[0].mxu0 }
  0xf8   :  { %v10818_v44 = vpop.f32.mrb[1].mxu0  ;;  %v10820_v45 = vpop.f32.mrb[0].mxu1  ;;  %v2982_v46 = vsel %vm2978_vm2, %v10816_v42, -inf  ;;  %8872 = vmatpush3.bf16.xpose.msk.msra.mxu0 %vm9737_vm1, %v8867_v30 }
  0xf9   :  { %2983 = vmax.xlane.f32.xlu1 %v2982_v46  ;;  %v10826_v47 = vpop.f32.mrb[1].mxu1  ;;  %v2979_v48 = vsel %vm2978_vm2, %v10818_v44, -inf  ;;  %8896 = vmatpush3.bf16.xpose.msk.msra.mxu1 %vm9737_vm1, %v8891_v33  ;;  %v3006_v49 = vsel %vm2978_vm2, %v10820_v45, -inf }
  0xfa   :  { %2980 = vmax.xlane.f32.xlu0 %v2979_v48  ;;  %8875 = vmatprep.subr.msk.bf16.mxu0 %vm9737_vm1, %v8873_v41  ;;  %v3003_v53 = vsel %vm2978_vm2, %v10826_v47, -inf }
  0xfb   :  { %v10836_v50 = vpop.f32.mrb[2].mxu0  ;;  %8899 = vmatprep.subr.msk.bf16.mxu1 %vm9737_vm1, %v8897_v43 }
  0xfc   :  { %v10840_v51 = vpop.f32.mrb[2].mxu1  ;;  %v10842_v52 = vpop.f32.mrb[3].mxu0  ;;  %v2988_v56 = vsel %vm2978_vm2, %v10836_v50, -inf }
  0xfd   :  { %3007 = vmax.xlane.f32.xlu1 %v3006_v49  ;;  %v10846_v54 = vpop.f32.mrb[3].mxu1  ;;  %v3012_v55 = vsel %vm2978_vm2, %v10840_v51, -inf  ;;  %v2985_v9 = vsel %vm2978_vm2, %v10842_v52, -inf }
  0xfe   :  { %3004 = vmax.xlane.f32.xlu0 %v3003_v53  ;;  %v3009_v5 = vsel %vm2978_vm2, %v10846_v54, -inf }
  0xff   :  { %v10852_v57 = vpop.f32.mrb[4].mxu0 }
 0x100   :  { %v10854_v58 = vpop.f32.mrb[4].mxu1  ;;  %v10856_v59 = vpop.f32.mrb[5].mxu0  ;;  %8878 = vmatpush3.bf16.xpose.msk.msra.mxu0 %vm9737_vm1, %v8873_v41  ;;  %v2994_v16 = vsel %vm2978_vm2, %v10852_v57, -inf }
 0x101   :  { %3013 = vmax.xlane.f32.xlu1 %v3012_v55  ;;  %v10869_v63 = vpop.f32.mrb[5].mxu1  ;;  %8902 = vmatpush3.bf16.xpose.msk.msra.mxu1 %vm9737_vm1, %v8897_v43  ;;  %v3018_v14 = vsel %vm2978_vm2, %v10854_v58, -inf  ;;  %v2991_v30 = vsel %vm2978_vm2, %v10856_v59, -inf }
 0x102   :  { %2989 = vmax.xlane.f32.xlu0 %v2988_v56  ;;  %v3015_v26 = vsel %vm2978_vm2, %v10869_v63, -inf }
 0x104   :  { %v10878_v6 = vpop.f32.mrb[6].mxu1  ;;  %v10880_v7 = vpop.f32.mrb[6].mxu0 }
 0x105   :  { %3010 = vmax.xlane.f32.xlu1 %v3009_v5  ;;  %v10887_v10 = vpop.f32.mrb[7].mxu1  ;;  %v10889_v11 = vpop.f32.mrb[7].mxu0  ;;  %v3024_v33 = vsel %vm2978_vm2, %v10878_v6, -inf  ;;  %v3000_v34 = vsel %vm2978_vm2, %v10880_v7, -inf }
 0x106   :  { %2986 = vmax.xlane.f32.xlu0 %v2985_v9  ;;  %v3021_v37 = vsel %vm2978_vm2, %v10887_v10, -inf  ;;  %v2997_v38 = vsel %vm2978_vm2, %v10889_v11, -inf }
 0x107   :  { %8032 = vmatmul.mubr.msk.f32.vlgmr.msra.gmra.mrb[56].mxu0 %vm529_vm0, %v258_v1 }
 0x108   :  { %8060 = vmatmul.mubr.msk.f32.vlgmr.msra.gmra.mrb[56].mxu1 %vm529_vm0, %v266_v2  ;;  %8034 = vmatprep.mubr.msk.f32.mxu0 %vm529_vm0, %v259_v3 }
 0x109   :  { %3019 = vmax.xlane.f32.xlu1 %v3018_v14  ;;  %8062 = vmatprep.mubr.msk.f32.mxu1 %vm529_vm0, %v267_v8 }
 0x10a   :  { %2995 = vmax.xlane.f32.xlu0 %v2994_v16 }
 0x10b   :  { %8035 = vmatmul.mubr.msk.f32.gmra.mrb[58].mxu0 %vm529_vm0, %v260_v17 }
 0x10c   :  { %8063 = vmatmul.mubr.msk.f32.gmra.mrb[58].mxu1 %vm529_vm0, %v268_v18  ;;  %8037 = vmatprep.mubr.msk.f32.mxu0 %vm529_vm0, %v261_v19 }
 0x10d   :  { %3016 = vmax.xlane.f32.xlu1 %v3015_v26  ;;  %8065 = vmatprep.mubr.msk.f32.mxu1 %vm529_vm0, %v269_v21 }
 0x10e   :  { %2992 = vmax.xlane.f32.xlu0 %v2991_v30 }
 0x10f   :  { %8038 = vmatmul.mubr.msk.f32.gmra.mrb[60].mxu0 %vm529_vm0, %v262_v25 }
 0x110   :  { %8066 = vmatmul.mubr.msk.f32.gmra.mrb[60].mxu1 %vm529_vm0, %v270_v27  ;;  %8040 = vmatprep.mubr.msk.f32.mxu0 %vm529_vm0, %v263_v28 }
 0x111   :  { %3025 = vmax.xlane.f32.xlu1 %v3024_v33  ;;  %8068 = vmatprep.mubr.msk.f32.mxu1 %vm529_vm0, %v271_v31 }
 0x112   :  { %3001 = vmax.xlane.f32.xlu0 %v3000_v34 }
 0x113   :  { %8041 = vmatmul.mubr.msk.f32.gmra.mrb[62].mxu0 %vm529_vm0, %v264_v35 }
 0x114   :  { %8069 = vmatmul.mubr.msk.f32.gmra.mrb[62].mxu1 %vm529_vm0, %v272_v36 }
 0x115   :  { %3022 = vmax.xlane.f32.xlu1 %v3021_v37 }
 0x116   :  { %2998 = vmax.xlane.f32.xlu0 %v2997_v38 }
 0x117   :  { %v10948_v39 = vpop.f32.mrb[8].mxu0 }
 0x118   :  { %v10950_v40 = vpop.f32.mrb[8].mxu1  ;;  %v10952_v41 = vpop.f32.mrb[9].mxu0  ;;  %v3030_v43 = vsel %vm2978_vm2, %v10948_v39, -inf }
 0x119   :  { %v10956_v46 = vpop.f32.mrb[9].mxu1  ;;  %v3054_v48 = vsel %vm2978_vm2, %v10950_v40, -inf  ;;  %v3027_v60 = vsel %vm2978_vm2, %v10952_v41, -inf }
 0x11a   :  { %3055 = vmax.xlane.f32.xlu1 %v3054_v48  ;;  %3031 = vmax.xlane.f32.xlu0 %v3030_v43  ;;  %v3051_v56 = vsel %vm2978_vm2, %v10956_v46, -inf }
 0x11b   :  { %v10960_v49 = vpop.f32.mrb[10].mxu0 }
 0x11c   :  { %v10962_v53 = vpop.f32.mrb[10].mxu1  ;;  %v10964_v55 = vpop.f32.mrb[11].mxu0  ;;  %v3036_v0 = vsel %vm2978_vm2, %v10960_v49, -inf }
 0x11d   :  { %v10970_v61 = vpop.f32.mrb[11].mxu1  ;;  %v3060_v62 = vsel %vm2978_vm2, %v10962_v53, -inf  ;;  %v3033_v12 = vsel %vm2978_vm2, %v10964_v55, -inf }
 0x11e   :  { %3052 = vmax.xlane.f32.xlu1 %v3051_v56  ;;  %3028 = vmax.xlane.f32.xlu0 %v3027_v60  ;;  %v3057_v9 = vsel %vm2978_vm2, %v10970_v61, -inf }
 0x11f   :  { %v10976_v1 = vpop.f32.mrb[12].mxu0 }
 0x120   :  { %v10978_v2 = vpop.f32.mrb[12].mxu1  ;;  %v10980_v3 = vpop.f32.mrb[13].mxu0  ;;  %v3042_v16 = vsel %vm2978_vm2, %v10976_v1, -inf }
 0x121   :  { %14161 = vst [vmem:[#allocation5_spill] sm:$0xff] %v10978_v2  ;;  %14162 = vst [vmem:[#allocation6_spill] sm:$0xff] %v10980_v3  ;;  %v10982_v5 = vpop.f32.mrb[13].mxu1  ;;  %v3066_v15 = vsel %vm2978_vm2, %v10978_v2, -inf  ;;  %v3039_v18 = vsel %vm2978_vm2, %v10980_v3, -inf  ;;  %v404_v2 = vld [vmem:[%s13905_s2 + $0x18] sm:$0xff] }
 0x122   :  { %14163 = vst [vmem:[#allocation7_spill] sm:$0xff] %v10982_v5  ;;  %3061 = vmax.xlane.f32.xlu1 %v3060_v62  ;;  %3037 = vmax.xlane.f32.xlu0 %v3036_v0  ;;  %v3063_v17 = vsel %vm2978_vm2, %v10982_v5, -inf }
 0x124   :  { %v10984_v8 = vpop.f32.mrb[14].mxu1  ;;  %v10986_v4 = vpop.f32.mrb[14].mxu0 }
 0x125   :  { %14164 = vst [vmem:[#allocation8_spill] sm:$0xff] %v10984_v8  ;;  %14165 = vst [vmem:[#allocation9_spill] sm:$0xff] %v10986_v4  ;;  %v10992_v13 = vpop.f32.mrb[15].mxu1  ;;  %v10994_v14 = vpop.f32.mrb[15].mxu0  ;;  %v3072_v19 = vsel %vm2978_vm2, %v10984_v8, -inf  ;;  %v3048_v20 = vsel %vm2978_vm2, %v10986_v4, -inf }
 0x126   :  { %14166 = vst [vmem:[#allocation10_spill] sm:$0xff] %v10992_v13  ;;  %14167 = vst [vmem:[#allocation11_spill] sm:$0xff] %v10994_v14  ;;  %3058 = vmax.xlane.f32.xlu1 %v3057_v9  ;;  %3034 = vmax.xlane.f32.xlu0 %v3033_v12  ;;  %v3069_v21 = vsel %vm2978_vm2, %v10992_v13, -inf  ;;  %v3045_v22 = vsel %vm2978_vm2, %v10994_v14, -inf }
 0x12a   :  { %3067 = vmax.xlane.f32.xlu1 %v3066_v15  ;;  %3043 = vmax.xlane.f32.xlu0 %v3042_v16 }
 0x12e   :  { %3064 = vmax.xlane.f32.xlu1 %v3063_v17  ;;  %3040 = vmax.xlane.f32.xlu0 %v3039_v18 }
 0x132   :  { %3073 = vmax.xlane.f32.xlu1 %v3072_v19  ;;  %3049 = vmax.xlane.f32.xlu0 %v3048_v20 }
 0x136   :  { %3070 = vmax.xlane.f32.xlu1 %v3069_v21  ;;  %3046 = vmax.xlane.f32.xlu0 %v3045_v22 }
 0x137   :  { %v11012_v23 = vpop.f32.mrb[16].mxu0 }
 0x138   :  { %v11014_v24 = vpop.f32.mrb[16].mxu1  ;;  %v11016_v25 = vpop.f32.mrb[17].mxu0  ;;  %v3078_v26 = vsel %vm2978_vm2, %v11012_v23, -inf }
 0x139   :  { %v11020_v27 = vpop.f32.mrb[17].mxu1  ;;  %v3102_v28 = vsel %vm2978_vm2, %v11014_v24, -inf  ;;  %v3075_v33 = vsel %vm2978_vm2, %v11016_v25, -inf }
 0x13a   :  { %3103 = vmax.xlane.f32.xlu1 %v3102_v28  ;;  %3079 = vmax.xlane.f32.xlu0 %v3078_v26  ;;  %v3099_v32 = vsel %vm2978_vm2, %v11020_v27, -inf }
 0x13b   :  { %v11024_v29 = vpop.f32.mrb[18].mxu0 }
 0x13c   :  { %v11026_v30 = vpop.f32.mrb[18].mxu1  ;;  %v11028_v31 = vpop.f32.mrb[19].mxu0  ;;  %v3084_v36 = vsel %vm2978_vm2, %v11024_v29, -inf }
 0x13d   :  { %v11034_v34 = vpop.f32.mrb[19].mxu1  ;;  %v3108_v35 = vsel %vm2978_vm2, %v11026_v30, -inf  ;;  %v3081_v0 = vsel %vm2978_vm2, %v11028_v31, -inf }
 0x13e   :  { %3100 = vmax.xlane.f32.xlu1 %v3099_v32  ;;  %3076 = vmax.xlane.f32.xlu0 %v3075_v33  ;;  %v3105_v62 = vsel %vm2978_vm2, %v11034_v34, -inf }
 0x13f   :  { %v11040_v37 = vpop.f32.mrb[20].mxu0 }
 0x140   :  { %v11042_v38 = vpop.f32.mrb[20].mxu1  ;;  %v11044_v43 = vpop.f32.mrb[21].mxu0  ;;  %v3090_v16 = vsel %vm2978_vm2, %v11040_v37, -inf }
 0x141   :  { %v11046_v48 = vpop.f32.mrb[21].mxu1  ;;  %v3114_v15 = vsel %vm2978_vm2, %v11042_v38, -inf  ;;  %v3087_v18 = vsel %vm2978_vm2, %v11044_v43, -inf }
 0x142   :  { %3109 = vmax.xlane.f32.xlu1 %v3108_v35  ;;  %3085 = vmax.xlane.f32.xlu0 %v3084_v36  ;;  %v3111_v17 = vsel %vm2978_vm2, %v11046_v48, -inf }
 0x144   :  { %v11048_v56 = vpop.f32.mrb[22].mxu1  ;;  %v11050_v60 = vpop.f32.mrb[22].mxu0 }
 0x145   :  { %v11056_v9 = vpop.f32.mrb[23].mxu1  ;;  %v11058_v12 = vpop.f32.mrb[23].mxu0  ;;  %v3120_v19 = vsel %vm2978_vm2, %v11048_v56, -inf  ;;  %v3096_v20 = vsel %vm2978_vm2, %v11050_v60, -inf }
 0x146   :  { %14168 = vst [vmem:[#allocation12_spill] sm:$0xff] %v11056_v9  ;;  %14169 = vst [vmem:[#allocation13_spill] sm:$0xff] %v11058_v12  ;;  %3106 = vmax.xlane.f32.xlu1 %v3105_v62  ;;  %3082 = vmax.xlane.f32.xlu0 %v3081_v0  ;;  %v3117_v21 = vsel %vm2978_vm2, %v11056_v9, -inf  ;;  %v3093_v22 = vsel %vm2978_vm2, %v11058_v12, -inf }
 0x14a   :  { %3115 = vmax.xlane.f32.xlu1 %v3114_v15  ;;  %3091 = vmax.xlane.f32.xlu0 %v3090_v16 }
 0x14e   :  { %3112 = vmax.xlane.f32.xlu1 %v3111_v17  ;;  %3088 = vmax.xlane.f32.xlu0 %v3087_v18 }
 0x152   :  { %3121 = vmax.xlane.f32.xlu1 %v3120_v19  ;;  %3097 = vmax.xlane.f32.xlu0 %v3096_v20 }
 0x156   :  { %3118 = vmax.xlane.f32.xlu1 %v3117_v21  ;;  %3094 = vmax.xlane.f32.xlu0 %v3093_v22 }
 0x157   :  { %v11076_v26 = vpop.f32.mrb[24].mxu0 }
 0x158   :  { %14170 = vst [vmem:[#allocation14_spill] sm:$0xff] %v11076_v26  ;;  %v11078_v28 = vpop.f32.mrb[24].mxu1  ;;  %v11080_v32 = vpop.f32.mrb[25].mxu0  ;;  %v3126_v33 = vsel %vm2978_vm2, %v11076_v26, -inf }
 0x159   :  { %14171 = vst [vmem:[#allocation15_spill] sm:$0xff] %v11078_v28  ;;  %14172 = vst [vmem:[#allocation16_spill] sm:$0xff] %v11080_v32  ;;  %v11084_v35 = vpop.f32.mrb[25].mxu1  ;;  %v3150_v36 = vsel %vm2978_vm2, %v11078_v28, -inf  ;;  %v3123_v17 = vsel %vm2978_vm2, %v11080_v32, -inf }
 0x15a   :  { %14173 = vst [vmem:[#allocation17_spill] sm:$0xff] %v11084_v35  ;;  %3151 = vmax.xlane.f32.xlu1 %v3150_v36  ;;  %3127 = vmax.xlane.f32.xlu0 %v3126_v33  ;;  %v3147_v16 = vsel %vm2978_vm2, %v11084_v35, -inf }
 0x15b   :  { %v11088_v62 = vpop.f32.mrb[26].mxu0 }
 0x15c   :  { %14174 = vst [vmem:[#allocation18_spill] sm:$0xff] %v11088_v62  ;;  %v11090_v0 = vpop.f32.mrb[26].mxu1  ;;  %v11092_v15 = vpop.f32.mrb[27].mxu0  ;;  %v3132_v20 = vsel %vm2978_vm2, %v11088_v62, -inf }
 0x15d   :  { %14175 = vst [vmem:[#allocation19_spill] sm:$0xff] %v11090_v0  ;;  %14176 = vst [vmem:[#allocation20_spill] sm:$0xff] %v11092_v15  ;;  %v11098_v18 = vpop.f32.mrb[27].mxu1  ;;  %v3156_v19 = vsel %vm2978_vm2, %v11090_v0, -inf  ;;  %v3129_v14 = vsel %vm2978_vm2, %v11092_v15, -inf }
 0x15e   :  { %14177 = vst [vmem:[#allocation21_spill] sm:$0xff] %v11098_v18  ;;  %3148 = vmax.xlane.f32.xlu1 %v3147_v16  ;;  %3124 = vmax.xlane.f32.xlu0 %v3123_v17  ;;  %v3153_v17 = vsel %vm2978_vm2, %v11098_v18, -inf }
 0x15f   :  { %v11104_v21 = vpop.f32.mrb[28].mxu0 }
 0x160   :  { %14178 = vst [vmem:[#allocation22_spill] sm:$0xff] %v11104_v21  ;;  %v11106_v22 = vpop.f32.mrb[28].mxu1  ;;  %v11108_v33 = vpop.f32.mrb[29].mxu0 }
 0x161   :  { %14179 = vst [vmem:[#allocation23_spill] sm:$0xff] %v11106_v22  ;;  %14180 = vst [vmem:[#allocation24_spill] sm:$0xff] %v11108_v33  ;;  %v11110_v36 = vpop.f32.mrb[29].mxu1  ;;  %v3135_v15 = vsel %vm2978_vm2, %v11108_v33, -inf }
 0x162   :  { %14181 = vst [vmem:[#allocation25_spill] sm:$0xff] %v11110_v36  ;;  %3157 = vmax.xlane.f32.xlu1 %v3156_v19  ;;  %3133 = vmax.xlane.f32.xlu0 %v3132_v20  ;;  %v3162_v19 = vsel %vm2978_vm2, %v11106_v22, -inf  ;;  %v3138_v20 = vsel %vm2978_vm2, %v11104_v21, -inf  ;;  %v3159_v18 = vsel %vm2978_vm2, %v11110_v36, -inf }
 0x164   :  { %v11112_v13 = vpop.f32.mrb[30].mxu1  ;;  %v11114_v16 = vpop.f32.mrb[30].mxu0 }
 0x165   :  { %14182 = vst [vmem:[#allocation26_spill] sm:$0xff] %v11112_v13  ;;  %14183 = vst [vmem:[#allocation27_spill] sm:$0xff] %v11114_v16  ;;  %v11120_v8 = vpop.f32.mrb[31].mxu1  ;;  %v11122_v4 = vpop.f32.mrb[31].mxu0 }
 0x166   :  { %14184 = vst [vmem:[#allocation28_spill] sm:$0xff] %v11120_v8  ;;  %14185 = vst [vmem:[#allocation29_spill] sm:$0xff] %v11122_v4  ;;  %3154 = vmax.xlane.f32.xlu1 %v3153_v17  ;;  %3130 = vmax.xlane.f32.xlu0 %v3129_v14  ;;  %v3168_v17 = vsel %vm2978_vm2, %v11112_v13, -inf  ;;  %v3144_v14 = vsel %vm2978_vm2, %v11114_v16, -inf }
 0x16a   :  { %3163 = vmax.xlane.f32.xlu1 %v3162_v19  ;;  %3139 = vmax.xlane.f32.xlu0 %v3138_v20  ;;  %v3165_v19 = vsel %vm2978_vm2, %v11120_v8, -inf  ;;  %v3141_v20 = vsel %vm2978_vm2, %v11122_v4, -inf }
 0x16e   :  { %3160 = vmax.xlane.f32.xlu1 %v3159_v18  ;;  %3136 = vmax.xlane.f32.xlu0 %v3135_v15 }
 0x172   :  { %3169 = vmax.xlane.f32.xlu1 %v3168_v17  ;;  %3145 = vmax.xlane.f32.xlu0 %v3144_v14 }
 0x176   :  { %3166 = vmax.xlane.f32.xlu1 %v3165_v19  ;;  %3142 = vmax.xlane.f32.xlu0 %v3141_v20 }
 0x177   :  { %v11140_v36 = vpop.f32.mrb[32].mxu0 }
 0x178   :  { %14186 = vst [vmem:[#allocation30_spill] sm:$0xff] %v11140_v36  ;;  %v11142_v18 = vpop.f32.mrb[32].mxu1  ;;  %v11144_v15 = vpop.f32.mrb[33].mxu0  ;;  %v3174_v13 = vsel %vm2978_vm2, %v11140_v36, -inf }
 0x179   :  { %14187 = vst [vmem:[#allocation31_spill] sm:$0xff] %v11142_v18  ;;  %14188 = vst [vmem:[#allocation32_spill] sm:$0xff] %v11144_v15  ;;  %v11148_v16 = vpop.f32.mrb[33].mxu1  ;;  %v3198_v17 = vsel %vm2978_vm2, %v11142_v18, -inf  ;;  %v3171_v8 = vsel %vm2978_vm2, %v11144_v15, -inf }
 0x17a   :  { %14189 = vst [vmem:[#allocation33_spill] sm:$0xff] %v11148_v16  ;;  %3199 = vmax.xlane.f32.xlu1 %v3198_v17  ;;  %3175 = vmax.xlane.f32.xlu0 %v3174_v13  ;;  %v3195_v4 = vsel %vm2978_vm2, %v11148_v16, -inf }
 0x17b   :  { %v11152_v14 = vpop.f32.mrb[34].mxu0 }
 0x17c   :  { %14190 = vst [vmem:[#allocation34_spill] sm:$0xff] %v11152_v14  ;;  %v11154_v19 = vpop.f32.mrb[34].mxu1  ;;  %v11156_v20 = vpop.f32.mrb[35].mxu0  ;;  %v3180_v13 = vsel %vm2978_vm2, %v11152_v14, -inf }
 0x17d   :  { %14191 = vst [vmem:[#allocation35_spill] sm:$0xff] %v11154_v19  ;;  %14192 = vst [vmem:[#allocation36_spill] sm:$0xff] %v11156_v20  ;;  %v11162_v36 = vpop.f32.mrb[35].mxu1  ;;  %v3204_v17 = vsel %vm2978_vm2, %v11154_v19, -inf  ;;  %v3177_v14 = vsel %vm2978_vm2, %v11156_v20, -inf }
 0x17e   :  { %14193 = vst [vmem:[#allocation37_spill] sm:$0xff] %v11162_v36  ;;  %3196 = vmax.xlane.f32.xlu1 %v3195_v4  ;;  %3172 = vmax.xlane.f32.xlu0 %v3171_v8  ;;  %v3201_v19 = vsel %vm2978_vm2, %v11162_v36, -inf }
 0x17f   :  { %v11168_v18 = vpop.f32.mrb[36].mxu0 }
 0x180   :  { %14194 = vst [vmem:[#allocation38_spill] sm:$0xff] %v11168_v18  ;;  %v11170_v33 = vpop.f32.mrb[36].mxu1  ;;  %v11172_v21 = vpop.f32.mrb[37].mxu0  ;;  %v3186_v32 = vsel %vm2978_vm2, %v11168_v18, -inf }
 0x181   :  { %14195 = vst [vmem:[#allocation39_spill] sm:$0xff] %v11170_v33  ;;  %14196 = vst [vmem:[#allocation40_spill] sm:$0xff] %v11172_v21  ;;  %v11174_v16 = vpop.f32.mrb[37].mxu1  ;;  %v3210_v0 = vsel %vm2978_vm2, %v11170_v33, -inf  ;;  %v3183_v18 = vsel %vm2978_vm2, %v11172_v21, -inf }
 0x182   :  { %14197 = vst [vmem:[#allocation41_spill] sm:$0xff] %v11174_v16  ;;  %3205 = vmax.xlane.f32.xlu1 %v3204_v17  ;;  %3181 = vmax.xlane.f32.xlu0 %v3180_v13  ;;  %v3207_v33 = vsel %vm2978_vm2, %v11174_v16, -inf }
 0x183   :  { %v11176_v15 = vpop.f32.mrb[38].mxu0 }
 0x184   :  { %14198 = vst [vmem:[#allocation42_spill] sm:$0xff] %v11176_v15  ;;  %v11178_v4 = vpop.f32.mrb[38].mxu1  ;;  %v11180_v8 = vpop.f32.mrb[39].mxu0 }
 0x185   :  { %14199 = vst [vmem:[#allocation43_spill] sm:$0xff] %v11178_v4  ;;  %14200 = vst [vmem:[#allocation44_spill] sm:$0xff] %v11180_v8  ;;  %v11186_v22 = vpop.f32.mrb[39].mxu1 }
 0x186   :  { %14201 = vst [vmem:[#allocation45_spill] sm:$0xff] %v11186_v22  ;;  %3202 = vmax.xlane.f32.xlu1 %v3201_v19  ;;  %v2984_v62 = vpop.xlane.xlu1 %2983  ;;  %3178 = vmax.xlane.f32.xlu0 %v3177_v14 }
 0x187   :  { %v3364_v17 = vsub.f32 %v10816_v42, %v2984_v62  ;;  %v2981_v13 = vpop.xlane.xlu0 %2980 }
 0x188   :  { %v3363_v35 = vsub.f32 %v10818_v44, %v2981_v13 }
 0x189   :  { %v3493_v36 = vmul.f32 1.442695, %v3364_v17 }
 0x18a   :  { %3211 = vmax.xlane.f32.xlu1 %v3210_v0  ;;  %v3008_v5 = vpop.xlane.xlu1 %3007  ;;  %3187 = vmax.xlane.f32.xlu0 %v3186_v32  ;;  %v3491_v14 = vmul.f32 1.442695, %v3363_v35 }
 0x18b   :  { %v3372_v20 = vsub.f32 %v10820_v45, %v3008_v5  ;;  %v3005_v19 = vpop.xlane.xlu0 %3004  ;;  %9162 = vpow2.f32 %v3493_v36  ;;  %v3216_v45 = vsel %vm2978_vm2, %v11178_v4, -inf  ;;  %v3192_v5 = vsel %vm2978_vm2, %v11176_v15, -inf }
 0x18c   :  { %v3371_v42 = vsub.f32 %v10826_v47, %v3005_v19  ;;  %v3213_v36 = vsel %vm2978_vm2, %v11186_v22, -inf }
 0x18d   :  { %v3509_v62 = vmul.f32 1.442695, %v3372_v20 }
 0x18e   :  { %v3507_v26 = vmul.f32 1.442695, %v3371_v42  ;;  %3208 = vmax.xlane.f32.xlu1 %v3207_v33  ;;  %v3014_v44 = vpop.xlane.xlu1 %3013  ;;  %3184 = vmax.xlane.f32.xlu0 %v3183_v18  ;;  %v3189_v18 = vsel %vm2978_vm2, %v11180_v8, -inf }
 0x18f   :  { %9164 = vpow2.f32 %v3509_v62  ;;  %v2990_v32 = vpop.xlane.xlu0 %2989  ;;  %v3374_v33 = vsub.f32 %v10840_v51, %v3014_v44 }
 0x190   :  { %9166 = vpow2.f32 %v3491_v14  ;;  %v3366_v0 = vsub.f32 %v10836_v50, %v2990_v32 }
 0x191   :  { %9168 = vpow2.f32 %v3507_v26  ;;  %v3513_v51 = vmul.f32 1.442695, %v3374_v33 }
 0x192   :  { %3217 = vmax.xlane.f32.xlu1 %v3216_v45  ;;  %v3011_v47 = vpop.xlane.xlu1 %3010  ;;  %3193 = vmax.xlane.f32.xlu0 %v3192_v5  ;;  %v3497_v13 = vmul.f32 1.442695, %v3366_v0 }
 0x193   :  { %v2987_v35 = vpop.xlane.xlu0 %2986  ;;  %v3373_v42 = vsub.f32 %v10846_v54, %v3011_v47 }
 0x194   :  { %v3365_v19 = vsub.f32 %v10842_v52, %v2987_v35  ;;  %9170 = vpow2.f32 %v3497_v13 }
 0x195   :  { %v11210_v20 = vpop.eup %9162  ;;  %9172 = vpow2.f32 %v3513_v51 }
 0x196   :  { %14202 = vst [vmem:[#allocation46_spill] sm:$0xff] %v11210_v20  ;;  %3214 = vmax.xlane.f32.xlu1 %v3213_v36  ;;  %v3020_v17 = vpop.xlane.xlu1 %3019  ;;  %3190 = vmax.xlane.f32.xlu0 %v3189_v18  ;;  %v3750_v62 = vsel %vm2978_vm2, %v11210_v20, 0.0  ;;  %v3495_v47 = vmul.f32 1.442695, %v3365_v19  ;;  %v3511_v36 = vmul.f32 1.442695, %v3373_v42 }
 0x197   :  { %v2996_v26 = vpop.xlane.xlu0 %2995 }
 0x198   :  { %v11213_v14 = vpop.f32.mrb[40].mxu0  ;;  %9174 = vpow2.f32 %v3495_v47  ;;  %v3368_v47 = vsub.f32 %v10852_v57, %v2996_v26 }
 0x199   :  { %14203 = vst [vmem:[#allocation47_spill] sm:$0xff] %v11213_v14  ;;  %v11215_v50 = vpop.eup %9164  ;;  %v11220_v44 = vpop.f32.mrb[40].mxu1  ;;  %v3222_v19 = vsel %vm2978_vm2, %v11213_v14, -inf  ;;  %9176 = vpow2.f32 %v3511_v36 }
 0x19a   :  { %14204 = vst [vmem:[#allocation48_spill] sm:$0xff] %v11215_v50  ;;  %14205 = vst [vmem:[#allocation49_spill] sm:$0xff] %v11220_v44  ;;  %v11222_v32 = vpop.f32.mrb[41].mxu0  ;;  %v11224_v45 = vpop.eup %9166  ;;  %3751 = vadd.xlane.f32.xlu0 %v3750_v62  ;;  %v3774_v52 = vsel %vm2978_vm2, %v11215_v50, 0.0  ;;  %v3246_v51 = vsel %vm2978_vm2, %v11220_v44, -inf  ;;  %v3376_v44 = vsub.f32 %v10854_v58, %v3020_v17 }
 0x19b   :  { %14206 = vst [vmem:[#allocation50_spill] sm:$0xff] %v11222_v32  ;;  %14207 = vst [vmem:[#allocation51_spill] sm:$0xff] %v11224_v45  ;;  %v11226_v5 = vpop.xlane.xlu1 %3016  ;;  %v11230_v35 = vpop.f32.mrb[41].mxu1  ;;  %3775 = vadd.xlane.f32.xlu1 %v3774_v52  ;;  %v3747_v18 = vsel %vm2978_vm2, %v11224_v45, 0.0  ;;  %v3219_v36 = vsel %vm2978_vm2, %v11222_v32, -inf }
 0x19c   :  { %14208 = vst [vmem:[#allocation52_spill] sm:$0xff] %v11230_v35  ;;  %v11232_v0 = vpop.eup %9168  ;;  %v2993_v54 = vpop.xlane.xlu0 %2992  ;;  %v3501_v17 = vmul.f32 1.442695, %v3368_v47  ;;  %v3517_v16 = vmul.f32 1.442695, %v3376_v44  ;;  %v3375_v28 = vsub.f32 %v10869_v63, %v11226_v5  ;;  %v409_v63 = vld [vmem:[%s13905_s2 + $0x40] sm:$0xff] }
 0x19d   :  { %14209 = vst [vmem:[#allocation53_spill] sm:$0xff] %v11232_v0  ;;  %v11234_v33 = vpop.f32.mrb[42].mxu0  ;;  %v11238_v20 = vpop.f32.mrb[42].mxu1  ;;  %v3771_v52 = vsel %vm2978_vm2, %v11232_v0, 0.0  ;;  %v3367_v32 = vsub.f32 %v10856_v59, %v2993_v54 }
 0x19e   :  { %14210 = vst [vmem:[#allocation54_spill] sm:$0xff] %v11234_v33  ;;  %14211 = vst [vmem:[#allocation55_spill] sm:$0xff] %v11238_v20  ;;  %v11240_v62 = vpop.f32.mrb[43].mxu0  ;;  %3748 = vadd.xlane.f32.xlu0 %v3747_v18  ;;  %v11246_v8 = vpop.f32.mrb[43].mxu1  ;;  %9178 = vpow2.f32 %v3501_v17 }
 0x19f   :  { %14212 = vst [vmem:[#allocation56_spill] sm:$0xff] %v11240_v62  ;;  %v11242_v50 = vpop.xlane.xlu1 %3025  ;;  %14213 = vst [vmem:[#allocation57_spill] sm:$0xff] %v11246_v8  ;;  %3772 = vadd.xlane.f32.xlu1 %v3771_v52  ;;  %v11276_v21 = vpop.eup %9170  ;;  %9180 = vpow2.f32 %v3517_v16 }
 0x1a0   :  { %v11248_v13 = vpop.xlane.xlu0 %3001  ;;  %v11254_v42 = vpop.f32.mrb[44].mxu0  ;;  %14221 = vst [vmem:[#allocation65_spill] sm:$0xff] %v11276_v21 }
 0x1a1   :  { %14214 = vst [vmem:[#allocation58_spill] sm:$0xff] %v11254_v42  ;;  %v11256_v45 = vpop.f32.mrb[44].mxu1  ;;  %v11258_v18 = vpop.f32.mrb[45].mxu0 }
 0x1a2   :  { %14215 = vst [vmem:[#allocation59_spill] sm:$0xff] %v11256_v45  ;;  %14216 = vst [vmem:[#allocation60_spill] sm:$0xff] %v11258_v18  ;;  %3223 = vmax.xlane.f32.xlu0 %v3222_v19  ;;  %v11262_v52 = vpop.f32.mrb[45].mxu1  ;;  %v3243_v19 = vsel %vm2978_vm2, %v11230_v35, -inf  ;;  %v11282_v57 = vpop.eup %9172  ;;  %v401_v35 = vld [vmem:[%s13905_s2] sm:$0xff] }
 0x1a3   :  { %v11260_v0 = vpop.xlane.xlu1 %3022  ;;  %14217 = vst [vmem:[#allocation61_spill] sm:$0xff] %v11262_v52  ;;  %3247 = vmax.xlane.f32.xlu1 %v3246_v51  ;;  %14223 = vst [vmem:[#allocation67_spill] sm:$0xff] %v11282_v57  ;;  %v11299_v3 = vpop.eup %9174  ;;  %v3780_v59 = vsel %vm2978_vm2, %v11282_v57, 0.0 }
 0x1a4   :  { %v11264_v22 = vpop.xlane.xlu0 %2998  ;;  %v11267_v14 = vpop.f32.mrb[46].mxu0  ;;  %14224 = vst [vmem:[#allocation68_spill] sm:$0xff] %v11299_v3 }
 0x1a5   :  { %14218 = vst [vmem:[#allocation62_spill] sm:$0xff] %v11267_v14  ;;  %v11272_v15 = vpop.f32.mrb[46].mxu1  ;;  %v11274_v4 = vpop.f32.mrb[47].mxu0 }
 0x1a6   :  { %14219 = vst [vmem:[#allocation63_spill] sm:$0xff] %v11272_v15  ;;  %14220 = vst [vmem:[#allocation64_spill] sm:$0xff] %v11274_v4  ;;  %3220 = vmax.xlane.f32.xlu0 %v3219_v36  ;;  %v11280_v51 = vpop.f32.mrb[47].mxu1  ;;  %v3756_v36 = vsel %vm2978_vm2, %v11276_v21, 0.0  ;;  %v11306_v5 = vpop.eup %9176  ;;  %v410_v21 = vld [vmem:[%s13905_s2 + $0x48] sm:$0xff] }
 0x1a7   :  { %14222 = vst [vmem:[#allocation66_spill] sm:$0xff] %v11280_v51  ;;  %v11284_v26 = vpop.xlane.xlu1 %3055  ;;  %3244 = vmax.xlane.f32.xlu1 %v3243_v19  ;;  %v402_v19 = vld [vmem:[%s13905_s2 + $0x8] sm:$0xff]  ;;  %14225 = vst [vmem:[#allocation69_spill] sm:$0xff] %v11306_v5  ;;  %v8919_v57 = vpack.c.bf16 %v410_v21, %v409_v63  ;;  %v412_v63 = vld [vmem:[%s13905_s2 + $0x58] sm:$0xff] }
 0x1a8   :  { %v11286_v58 = vpop.xlane.xlu0 %3031  ;;  %v8903_v44 = vpack.c.bf16 %v402_v19, %v401_v35  ;;  %v3515_v35 = vmul.f32 1.442695, %v3375_v28  ;;  %v3753_v19 = vsel %vm2978_vm2, %v11299_v3, 0.0  ;;  %v411_v28 = vld [vmem:[%s13905_s2 + $0x50] sm:$0xff] }
 0x1a9   :  { %8920 = vmatprep.subr.bf16.mxu1 %v8919_v57 }
 0x1aa   :  { %3757 = vadd.xlane.f32.xlu0 %v3756_v36  ;;  %v3499_v36 = vmul.f32 1.442695, %v3367_v32  ;;  %8904 = vmatprep.subr.bf16.mxu0 %v8903_v44  ;;  %v3777_v32 = vsel %vm2978_vm2, %v11306_v5, 0.0 }
 0x1ab   :  { %v11308_v54 = vpop.xlane.xlu1 %3052  ;;  %3781 = vadd.xlane.f32.xlu1 %v3780_v59  ;;  %8906 = vmatpush3.bf16.msra.mxu0 %v8903_v44  ;;  %v403_v59 = vld [vmem:[%s13905_s2 + $0x10] sm:$0xff]  ;;  %v3228_v44 = vsel %vm2978_vm2, %v11234_v33, -inf }
 0x1ac   :  { %v11310_v47 = vpop.xlane.xlu0 %3028  ;;  %v8907_v21 = vpack.c.bf16 %v404_v2, %v403_v59  ;;  %8922 = vmatpush3.bf16.msra.mxu1 %v8919_v57  ;;  %9182 = vpow2.f32 %v3499_v36  ;;  %v3252_v2 = vsel %vm2978_vm2, %v11238_v20, -inf  ;;  %v405_v59 = vld [vmem:[%s13905_s2 + $0x20] sm:$0xff]  ;;  %v406_v57 = vld [vmem:[%s13905_s2 + $0x28] sm:$0xff] }
 0x1ad   :  { %9184 = vpow2.f32 %v3515_v35  ;;  %v413_v36 = vld [vmem:[%s13905_s2 + $0x60] sm:$0xff] }
 0x1ae   :  { %3754 = vadd.xlane.f32.xlu0 %v3753_v19  ;;  %8908 = vmatprep.subr.bf16.mxu0 %v8907_v21  ;;  %v8923_v19 = vpack.c.bf16 %v412_v63, %v411_v28  ;;  %v3370_v28 = vsub.f32 %v10880_v7, %v11248_v13  ;;  %v3378_v63 = vsub.f32 %v10878_v6, %v11242_v50  ;;  %v3249_v7 = vsel %vm2978_vm2, %v11246_v8, -inf  ;;  %v415_v50 = vld [vmem:[%s13905_s2 + $0x70] sm:$0xff]  ;;  %v416_v13 = vld [vmem:[%s13905_s2 + $0x78] sm:$0xff] }
 0x1af   :  { %v11328_v16 = vpop.xlane.xlu1 %3061  ;;  %3778 = vadd.xlane.f32.xlu1 %v3777_v32  ;;  %8910 = vmatpush3.bf16.msra.mxu0 %v8907_v21  ;;  %v8911_v32 = vpack.c.bf16 %v406_v57, %v405_v59  ;;  %v414_v21 = vld [vmem:[%s13905_s2 + $0x68] sm:$0xff]  ;;  %v3225_v59 = vsel %vm2978_vm2, %v11240_v62, -inf  ;;  %v11367_v57 = vpop.eup %9178  ;;  %v3377_v8 = vsub.f32 %v10887_v10, %v11260_v0 }
 0x1b0   :  { %v11330_v17 = vpop.xlane.xlu0 %3037  ;;  %8924 = vmatprep.subr.bf16.mxu1 %v8923_v19  ;;  %14226 = vst [vmem:[#allocation70_spill] sm:$0xff] %v11367_v57  ;;  %v3505_v3 = vmul.f32 1.442695, %v3370_v28  ;;  %v3762_v62 = vsel %vm2978_vm2, %v11367_v57, 0.0 }
 0x1b1   :  { %8926 = vmatpush3.bf16.msra.mxu1 %v8923_v19  ;;  %8912 = vmatprep.subr.bf16.mxu0 %v8911_v32  ;;  %v408_v19 = vld [vmem:[%s13905_s2 + $0x38] sm:$0xff] }
 0x1b2   :  { %3229 = vmax.xlane.f32.xlu0 %v3228_v44  ;;  %v8927_v44 = vpack.c.bf16 %v414_v21, %v413_v36  ;;  %9186 = vpow2.f32 %v3505_v3 }
 0x1b3   :  { %v11348_v5 = vpop.xlane.xlu1 %3058  ;;  %3253 = vmax.xlane.f32.xlu1 %v3252_v2  ;;  %8914 = vmatpush3.bf16.msra.mxu0 %v8911_v32  ;;  %v407_v2 = vld [vmem:[%s13905_s2 + $0x30] sm:$0xff]  ;;  %v11377_v32 = vpop.eup %9180 }
 0x1b4   :  { %v11350_v35 = vpop.xlane.xlu0 %3034  ;;  %8928 = vmatprep.subr.bf16.mxu1 %v8927_v44  ;;  %v8915_v6 = vpack.c.bf16 %v408_v19, %v407_v2  ;;  %14227 = vst [vmem:[#allocation71_spill] sm:$0xff] %v11377_v32  ;;  %v3369_v2 = vsub.f32 %v10889_v11, %v11264_v22  ;;  %v3521_v19 = vmul.f32 1.442695, %v3378_v63  ;;  %v3786_v28 = vsel %vm2978_vm2, %v11377_v32, 0.0 }
 0x1b5   :  { %8930 = vmatpush3.bf16.msra.mxu1 %v8927_v44 }
 0x1b6   :  { %3226 = vmax.xlane.f32.xlu0 %v3225_v59  ;;  %v8931_v59 = vpack.c.bf16 %v416_v13, %v415_v50  ;;  %8916 = vmatprep.subr.bf16.mxu0 %v8915_v6  ;;  %v3503_v63 = vmul.f32 1.442695, %v3369_v2  ;;  %9188 = vpow2.f32 %v3521_v19  ;;  %v3258_v2 = vsel %vm2978_vm2, %v11256_v45, -inf }
 0x1b7   :  { %v11379_v36 = vpop.xlane.xlu1 %3067  ;;  %3250 = vmax.xlane.f32.xlu1 %v3249_v7  ;;  %8918 = vmatpush3.bf16.msra.mxu0 %v8915_v6  ;;  %v11391_v7 = vpop.eup %9182 }
 0x1b8   :  { %v11381_v21 = vpop.xlane.xlu0 %3043  ;;  %8932 = vmatprep.subr.bf16.mxu1 %v8931_v59  ;;  %14229 = vst [vmem:[#allocation73_spill] sm:$0xff] %v11391_v7  ;;  %v11399_v22 = vpop.eup %9184  ;;  %v3759_v50 = vsel %vm2978_vm2, %v11391_v7, 0.0  ;;  %9190 = vpow2.f32 %v3503_v63  ;;  %v3380_v63 = vsub.f32 %v10948_v39, %v11286_v58 }
 0x1b9   :  { %v11389_v20 = vpop.f32.mrb[48].mxu0  ;;  %14232 = vst [vmem:[#allocation76_spill] sm:$0xff] %v11399_v22  ;;  %8934 = vmatpush3.bf16.msra.mxu1 %v8931_v59  ;;  %v3783_v32 = vsel %vm2978_vm2, %v11399_v22, 0.0 }
 0x1ba   :  { %14228 = vst [vmem:[#allocation72_spill] sm:$0xff] %v11389_v20  ;;  %3763 = vadd.xlane.f32.xlu0 %v3762_v62  ;;  %v11395_v44 = vpop.f32.mrb[48].mxu1  ;;  %v11397_v11 = vpop.f32.mrb[49].mxu0  ;;  %v3519_v62 = vmul.f32 1.442695, %v3377_v8  ;;  %v3234_v8 = vsel %vm2978_vm2, %v11254_v42, -inf }
 0x1bb   :  { %14230 = vst [vmem:[#allocation74_spill] sm:$0xff] %v11395_v44  ;;  %14231 = vst [vmem:[#allocation75_spill] sm:$0xff] %v11397_v11  ;;  %v11401_v10 = vpop.xlane.xlu1 %3064  ;;  %3787 = vadd.xlane.f32.xlu1 %v3786_v28  ;;  %v11405_v6 = vpop.f32.mrb[49].mxu1 }
 0x1bc   :  { %v11403_v0 = vpop.xlane.xlu0 %3040  ;;  %14233 = vst [vmem:[#allocation77_spill] sm:$0xff] %v11405_v6  ;;  %9192 = vpow2.f32 %v3519_v62  ;;  %v3388_v62 = vsub.f32 %v10950_v40, %v11284_v26  ;;  %v3525_v26 = vmul.f32 1.442695, %v3380_v63 }
 0x1bd   :  { %v11409_v13 = vpop.f32.mrb[50].mxu0 }
 0x1be   :  { %14234 = vst [vmem:[#allocation78_spill] sm:$0xff] %v11409_v13  ;;  %3760 = vadd.xlane.f32.xlu0 %v3759_v50  ;;  %v11413_v57 = vpop.f32.mrb[50].mxu1  ;;  %v11415_v28 = vpop.f32.mrb[51].mxu0  ;;  %9194 = vpow2.f32 %v3525_v26 }
 0x1bf   :  { %14235 = vst [vmem:[#allocation79_spill] sm:$0xff] %v11413_v57  ;;  %14236 = vst [vmem:[#allocation80_spill] sm:$0xff] %v11415_v28  ;;  %v11417_v59 = vpop.xlane.xlu1 %3073  ;;  %3784 = vadd.xlane.f32.xlu1 %v3783_v32  ;;  %v11425_v19 = vpop.f32.mrb[51].mxu1 }
 0x1c0   :  { %v11419_v3 = vpop.xlane.xlu0 %3049  ;;  %14237 = vst [vmem:[#allocation81_spill] sm:$0xff] %v11425_v19 }
 0x1c1   :  { %v11427_v50 = vpop.f32.mrb[52].mxu0 }
 0x1c2   :  { %14238 = vst [vmem:[#allocation82_spill] sm:$0xff] %v11427_v50  ;;  %3235 = vmax.xlane.f32.xlu0 %v3234_v8  ;;  %v11429_v22 = vpop.f32.mrb[52].mxu1  ;;  %v11431_v7 = vpop.f32.mrb[53].mxu0  ;;  %v3231_v8 = vsel %vm2978_vm2, %v11258_v18, -inf  ;;  %v3379_v18 = vsub.f32 %v10952_v41, %v11310_v47 }
 0x1c3   :  { %14239 = vst [vmem:[#allocation83_spill] sm:$0xff] %v11429_v22  ;;  %14240 = vst [vmem:[#allocation84_spill] sm:$0xff] %v11431_v7  ;;  %v11433_v32 = vpop.xlane.xlu1 %3070  ;;  %3259 = vmax.xlane.f32.xlu1 %v3258_v2  ;;  %v11439_v42 = vpop.f32.mrb[53].mxu1  ;;  %v3255_v2 = vsel %vm2978_vm2, %v11262_v52, -inf }
 0x1c4   :  { %v11435_v33 = vpop.xlane.xlu0 %3046  ;;  %14241 = vst [vmem:[#allocation85_spill] sm:$0xff] %v11439_v42  ;;  %v11447_v22 = vpop.eup %9186 }
 0x1c5   :  { %v11445_v45 = vpop.f32.mrb[54].mxu0  ;;  %14243 = vst [vmem:[#allocation87_spill] sm:$0xff] %v11447_v22  ;;  %v11455_v39 = vpop.eup %9188 }
 0x1c6   :  { %14242 = vst [vmem:[#allocation86_spill] sm:$0xff] %v11445_v45  ;;  %3232 = vmax.xlane.f32.xlu0 %v3231_v8  ;;  %v11451_v7 = vpop.f32.mrb[54].mxu1  ;;  %v11453_v50 = vpop.f32.mrb[55].mxu0  ;;  %14246 = vst [vmem:[#allocation90_spill] sm:$0xff] %v11455_v39  ;;  %v3387_v45 = vsub.f32 %v10956_v46, %v11308_v54  ;;  %v3792_v41 = vsel %vm2978_vm2, %v11455_v39, 0.0  ;;  %v3382_v54 = vsub.f32 %v10960_v49, %v11330_v17 }
 0x1c7   :  { %14244 = vst [vmem:[#allocation88_spill] sm:$0xff] %v11451_v7  ;;  %14245 = vst [vmem:[#allocation89_spill] sm:$0xff] %v11453_v50  ;;  %v11457_v58 = vpop.xlane.xlu1 %3103  ;;  %3256 = vmax.xlane.f32.xlu1 %v3255_v2  ;;  %v11467_v7 = vpop.f32.mrb[55].mxu1  ;;  %v3541_v50 = vmul.f32 1.442695, %v3388_v62  ;;  %v3768_v2 = vsel %vm2978_vm2, %v11447_v22, 0.0 }
 0x1c8   :  { %v11459_v40 = vpop.xlane.xlu0 %3079  ;;  %14247 = vst [vmem:[#allocation91_spill] sm:$0xff] %v11467_v7  ;;  %v11473_v42 = vpop.eup %9190  ;;  %v3523_v62 = vmul.f32 1.442695, %v3379_v18  ;;  %v3240_v18 = vsel %vm2978_vm2, %v11267_v14, -inf }
 0x1c9   :  { %14248 = vst [vmem:[#allocation92_spill] sm:$0xff] %v11473_v42  ;;  %v11477_v47 = vpop.eup %9192  ;;  %9196 = vpow2.f32 %v3541_v50  ;;  %v3765_v52 = vsel %vm2978_vm2, %v11473_v42, 0.0  ;;  %v3389_v42 = vsub.f32 %v10970_v61, %v11348_v5 }
 0x1ca   :  { %3769 = vadd.xlane.f32.xlu0 %v3768_v2  ;;  %14249 = vst [vmem:[#allocation93_spill] sm:$0xff] %v11477_v47  ;;  %v3539_v2 = vmul.f32 1.442695, %v3387_v45  ;;  %v3789_v39 = vsel %vm2978_vm2, %v11477_v47, 0.0  ;;  %9198 = vpow2.f32 %v3523_v62  ;;  %v3390_v45 = vsub.f32 %v10962_v53, %v11328_v16 }
 0x1cb   :  { %v11479_v63 = vpop.xlane.xlu1 %3100  ;;  %3793 = vadd.xlane.f32.xlu1 %v3792_v41  ;;  %v3529_v62 = vmul.f32 1.442695, %v3382_v54  ;;  %v3381_v53 = vsub.f32 %v10964_v55, %v11350_v35 }
 0x1cc   :  { %v11481_v8 = vpop.xlane.xlu0 %3076  ;;  %9200 = vpow2.f32 %v3539_v2  ;;  %v3237_v2 = vsel %vm2978_vm2, %v11274_v4, -inf  ;;  %v3545_v50 = vmul.f32 1.442695, %v3390_v45 }
 0x1cd   :  { %9202 = vpow2.f32 %v3529_v62  ;;  %v3527_v61 = vmul.f32 1.442695, %v3381_v53 }
 0x1ce   :  { %3766 = vadd.xlane.f32.xlu0 %v3765_v52  ;;  %v3264_v52 = vsel %vm2978_vm2, %v11272_v15, -inf  ;;  %9204 = vpow2.f32 %v3545_v50  ;;  %v3270_v50 = vsel %vm2978_vm2, %v11389_v20, -inf }
 0x1cf   :  { %v11491_v41 = vpop.xlane.xlu1 %3109  ;;  %3790 = vadd.xlane.f32.xlu1 %v3789_v39  ;;  %9206 = vpow2.f32 %v3527_v61 }
 0x1d0   :  { %v11493_v26 = vpop.xlane.xlu0 %3085 }
 0x1d2   :  { %3241 = vmax.xlane.f32.xlu0 %v3240_v18  ;;  %v11517_v18 = vpop.eup %9194 }
 0x1d3   :  { %v11503_v46 = vpop.xlane.xlu1 %3106  ;;  %3265 = vmax.xlane.f32.xlu1 %v3264_v52  ;;  %14250 = vst [vmem:[#allocation94_spill] sm:$0xff] %v11517_v18  ;;  %v3261_v52 = vsel %vm2978_vm2, %v11280_v51, -inf  ;;  %v11521_v47 = vpop.eup %9196  ;;  %v3798_v22 = vsel %vm2978_vm2, %v11517_v18, 0.0  ;;  %v3543_v18 = vmul.f32 1.442695, %v3389_v42 }
 0x1d4   :  { %v11505_v39 = vpop.xlane.xlu0 %3082  ;;  %14251 = vst [vmem:[#allocation95_spill] sm:$0xff] %v11521_v47  ;;  %v3822_v54 = vsel %vm2978_vm2, %v11521_v47, 0.0 }
 0x1d5   :  { %9208 = vpow2.f32 %v3543_v18 }
 0x1d6   :  { %3238 = vmax.xlane.f32.xlu0 %v3237_v2 }
 0x1d7   :  { %v11523_v49 = vpop.xlane.xlu1 %3115  ;;  %3262 = vmax.xlane.f32.xlu1 %v3261_v52  ;;  %v11537_v52 = vpop.eup %9198 }
 0x1d8   :  { %v11525_v17 = vpop.xlane.xlu0 %3091  ;;  %14252 = vst [vmem:[#allocation96_spill] sm:$0xff] %v11537_v52  ;;  %v11543_v35 = vpop.eup %9200  ;;  %v3795_v51 = vsel %vm2978_vm2, %v11537_v52, 0.0 }
 0x1d9   :  { %14254 = vst [vmem:[#allocation98_spill] sm:$0xff] %v11543_v35  ;;  %v3819_v62 = vsel %vm2978_vm2, %v11543_v35, 0.0  ;;  %v3294_v35 = vsel %vm2978_vm2, %v11395_v44, -inf }
 0x1da   :  { %3799 = vadd.xlane.f32.xlu0 %v3798_v22  ;;  %v11541_v55 = vpop.f32.mrb[56].mxu0 }
 0x1db   :  { %14253 = vst [vmem:[#allocation97_spill] sm:$0xff] %v11541_v55  ;;  %v11545_v16 = vpop.xlane.xlu1 %3112  ;;  %3823 = vadd.xlane.f32.xlu1 %v3822_v54  ;;  %v11553_v2 = vpop.f32.mrb[56].mxu1 }
 0x1dc   :  { %v11547_v45 = vpop.xlane.xlu0 %3088  ;;  %14255 = vst [vmem:[#allocation99_spill] sm:$0xff] %v11553_v2  ;;  %v11555_v47 = vpop.f32.mrb[57].mxu0 }
 0x1dd   :  { %14256 = vst [vmem:[#allocation100_spill] sm:$0xff] %v11555_v47  ;;  %v11559_v54 = vpop.f32.mrb[57].mxu1 }
 0x1de   :  { %14257 = vst [vmem:[#allocation101_spill] sm:$0xff] %v11559_v54  ;;  %3796 = vadd.xlane.f32.xlu0 %v3795_v51  ;;  %v11563_v53 = vpop.f32.mrb[58].mxu0  ;;  %v3384_v51 = vsub.f32 %v10976_v1, %v11381_v21  ;;  %v3291_v1 = vsel %vm2978_vm2, %v11405_v6, -inf }
 0x1df   :  { %14258 = vst [vmem:[#allocation102_spill] sm:$0xff] %v11563_v53  ;;  %v11565_v5 = vpop.xlane.xlu1 %3121  ;;  %3820 = vadd.xlane.f32.xlu1 %v3819_v62  ;;  %v11577_v52 = vpop.f32.mrb[58].mxu1 }
 0x1e0   :  { %v11567_v22 = vpop.xlane.xlu0 %3097  ;;  %14259 = vst [vmem:[#allocation103_spill] sm:$0xff] %v11577_v52  ;;  %v11579_v4 = vpop.f32.mrb[59].mxu0 }
 0x1e1   :  { %14260 = vst [vmem:[#allocation104_spill] sm:$0xff] %v11579_v4  ;;  %v11581_v62 = vpop.f32.mrb[59].mxu1  ;;  %v11605_v4 = vpop.eup %9202 }
 0x1e2   :  { %14261 = vst [vmem:[#allocation105_spill] sm:$0xff] %v11581_v62  ;;  %3271 = vmax.xlane.f32.xlu0 %v3270_v50  ;;  %v11583_v15 = vpop.f32.mrb[60].mxu0  ;;  %v14267_v50 = vld [vmem:[#allocation5_spill] sm:$0xff]  ;;  %14269 = vst [vmem:[#allocation111_spill] sm:$0xff] %v11605_v4  ;;  %v11611_v20 = vpop.eup %9204 }
 0x1e3   :  { %14262 = vst [vmem:[#allocation106_spill] sm:$0xff] %v11583_v15  ;;  %v11585_v61 = vpop.xlane.xlu1 %3118  ;;  %3295 = vmax.xlane.f32.xlu1 %v3294_v35  ;;  %v11595_v18 = vpop.f32.mrb[60].mxu1  ;;  %v3392_v15 = vsub.f32 %v14267_v50, %v11379_v36  ;;  %v3267_v35 = vsel %vm2978_vm2, %v11397_v11, -inf  ;;  %14271 = vst [vmem:[#allocation113_spill] sm:$0xff] %v11611_v20  ;;  %v3533_v36 = vmul.f32 1.442695, %v3384_v51 }
 0x1e4   :  { %14263 = vst [vmem:[#allocation107_spill] sm:$0xff] %v11585_v61  ;;  %v11587_v42 = vpop.xlane.xlu0 %3094  ;;  %14265 = vst [vmem:[#allocation109_spill] sm:$0xff] %v11595_v18  ;;  %v11597_v14 = vpop.f32.mrb[61].mxu0  ;;  %v14273_v50 = vld [vmem:[#allocation6_spill] sm:$0xff]  ;;  %v14278_v61 = vld [vmem:[#allocation7_spill] sm:$0xff]  ;;  %v3804_v51 = vsel %vm2978_vm2, %v11605_v4, 0.0 }
 0x1e5   :  { %14264 = vst [vmem:[#allocation108_spill] sm:$0xff] %v11587_v42  ;;  %14266 = vst [vmem:[#allocation110_spill] sm:$0xff] %v11597_v14  ;;  %v11603_v62 = vpop.f32.mrb[61].mxu1  ;;  %v3383_v11 = vsub.f32 %v14273_v50, %v11403_v0  ;;  %v3549_v12 = vmul.f32 1.442695, %v3392_v15  ;;  %v417_v0 = vld [vmem:[%s13905_s2 + $0x80] sm:$0xff]  ;;  %v11639_v42 = vpop.eup %9206  ;;  %9210 = vpow2.f32 %v3533_v36 }
 0x1e6   :  { %14268 = vst [vmem:[#allocation5_spill] sm:$0xff] %v11603_v62  ;;  %3268 = vmax.xlane.f32.xlu0 %v3267_v35  ;;  %v11609_v21 = vpop.f32.mrb[62].mxu0  ;;  %v14274_v62 = vld [vmem:[#allocation15_spill] sm:$0xff]  ;;  %v418_v50 = vld [vmem:[%s13905_s2 + $0x88] sm:$0xff]  ;;  %14280 = vst [vmem:[#allocation115_spill] sm:$0xff] %v11639_v42  ;;  %v3828_v15 = vsel %vm2978_vm2, %v11611_v20, 0.0  ;;  %v11648_v18 = vpop.eup %9208 }
 0x1e7   :  { %14270 = vst [vmem:[#allocation112_spill] sm:$0xff] %v11609_v21  ;;  %v11613_v44 = vpop.xlane.xlu1 %3151  ;;  %3292 = vmax.xlane.f32.xlu1 %v3291_v1  ;;  %v11623_v6 = vpop.f32.mrb[62].mxu1  ;;  %v3391_v1 = vsub.f32 %v14278_v61, %v11401_v10  ;;  %v11643_v10 = vpack.c.bf16 %v418_v50, %v417_v0  ;;  %v425_v61 = vld [vmem:[%s13905_s2 + $0xc0] sm:$0xff]  ;;  %14281 = vst [vmem:[#allocation116_spill] sm:$0xff] %v11648_v18  ;;  %v14284_v20 = vld [vmem:[#allocation16_spill] sm:$0xff]  ;;  %9212 = vpow2.f32 %v3549_v12  ;;  %v3825_v36 = vsel %vm2978_vm2, %v11648_v18, 0.0 }
 0x1e8   :  { %v11615_v14 = vpop.xlane.xlu0 %3127  ;;  %14276 = vst [vmem:[#allocation6_spill] sm:$0xff] %v11623_v6  ;;  %v11625_v21 = vpop.f32.mrb[63].mxu0  ;;  %v14283_v0 = vld [vmem:[#allocation17_spill] sm:$0xff]  ;;  %v3276_v6 = vsel %vm2978_vm2, %v11409_v13, -inf  ;;  %v14287_v12 = vld [vmem:[#allocation19_spill] sm:$0xff] }
 0x1e9   :  { %14272 = vst [vmem:[#allocation114_spill] sm:$0xff] %v11615_v14  ;;  %14277 = vst [vmem:[#allocation15_spill] sm:$0xff] %v11625_v21  ;;  %v11631_v9 = vpop.f32.mrb[63].mxu1  ;;  %v3531_v21 = vmul.f32 1.442695, %v3383_v11  ;;  %8936 = vmatprep.subr.bf16.mxu0 %v11643_v10  ;;  %v14291_v13 = vld [vmem:[#allocation9_spill] sm:$0xff] }
 0x1ea   :  { %14279 = vst [vmem:[#allocation7_spill] sm:$0xff] %v11631_v9  ;;  %3805 = vadd.xlane.f32.xlu0 %v3804_v51  ;;  %v426_v51 = vld [vmem:[%s13905_s2 + $0xc8] sm:$0xff]  ;;  %v3547_v14 = vmul.f32 1.442695, %v3391_v1 }
 0x1eb   :  { %v11650_v4 = vpop.xlane.xlu1 %3148  ;;  %3829 = vadd.xlane.f32.xlu1 %v3828_v15  ;;  %v3801_v15 = vsel %vm2978_vm2, %v11639_v42, 0.0  ;;  %v11664_v35 = vpack.c.bf16 %v426_v51, %v425_v61  ;;  %9214 = vpow2.f32 %v3531_v21  ;;  %v14288_v61 = vld [vmem:[#allocation18_spill] sm:$0xff]  ;;  %v3386_v42 = vsub.f32 %v14291_v13, %v11419_v3  ;;  %v14294_v51 = vld [vmem:[#allocation8_spill] sm:$0xff] }
 0x1ec   :  { %v11652_v9 = vpop.xlane.xlu0 %3124  ;;  %9216 = vpow2.f32 %v3547_v14  ;;  %v3273_v14 = vsel %vm2978_vm2, %v11415_v28, -inf }
 0x1ed   :  { %14282 = vst [vmem:[#allocation117_spill] sm:$0xff] %v11652_v9  ;;  %8952 = vmatprep.subr.bf16.mxu1 %v11664_v35  ;;  %v14298_v9 = vld [vmem:[#allocation11_spill] sm:$0xff] }
 0x1ee   :  { %3802 = vadd.xlane.f32.xlu0 %v3801_v15  ;;  %v3300_v15 = vsel %vm2978_vm2, %v11413_v57, -inf }
 0x1ef   :  { %v11668_v11 = vpop.xlane.xlu1 %3157  ;;  %3826 = vadd.xlane.f32.xlu1 %v3825_v36 }
 0x1f0   :  { %14285 = vst [vmem:[#allocation17_spill] sm:$0xff] %v11668_v11  ;;  %v11670_v50 = vpop.xlane.xlu0 %3133  ;;  %v3537_v11 = vmul.f32 1.442695, %v3386_v42 }
 0x1f1   :  { %14286 = vst [vmem:[#allocation16_spill] sm:$0xff] %v11670_v50  ;;  %v3394_v50 = vsub.f32 %v14294_v51, %v11417_v59  ;;  %v3385_v59 = vsub.f32 %v14298_v9, %v11435_v33  ;;  %v14299_v51 = vld [vmem:[#allocation23_spill] sm:$0xff] }
 0x1f2   :  { %3277 = vmax.xlane.f32.xlu0 %v3276_v6  ;;  %v11695_v6 = vpop.eup %9210  ;;  %9218 = vpow2.f32 %v3537_v11 }
 0x1f3   :  { %v11681_v36 = vpop.xlane.xlu1 %3154  ;;  %3301 = vmax.xlane.f32.xlu1 %v3300_v15  ;;  %14295 = vst [vmem:[#allocation9_spill] sm:$0xff] %v11695_v6  ;;  %v3297_v15 = vsel %vm2978_vm2, %v11425_v19, -inf  ;;  %v11699_v57 = vpop.eup %9212  ;;  %v3553_v1 = vmul.f32 1.442695, %v3394_v50  ;;  %v14301_v19 = vld [vmem:[#allocation10_spill] sm:$0xff]  ;;  %v3810_v21 = vsel %vm2978_vm2, %v11695_v6, 0.0 }
 0x1f4   :  { %14289 = vst [vmem:[#allocation19_spill] sm:$0xff] %v11681_v36  ;;  %v11683_v18 = vpop.xlane.xlu0 %3130  ;;  %14296 = vst [vmem:[#allocation8_spill] sm:$0xff] %v11699_v57  ;;  %v3393_v36 = vsub.f32 %v14301_v19, %v11433_v32  ;;  %v3834_v42 = vsel %vm2978_vm2, %v11699_v57, 0.0  ;;  %v3535_v50 = vmul.f32 1.442695, %v3385_v59  ;;  %v14306_v19 = vld [vmem:[#allocation25_spill] sm:$0xff] }
 0x1f5   :  { %14290 = vst [vmem:[#allocation18_spill] sm:$0xff] %v11683_v18  ;;  %v14300_v18 = vld [vmem:[#allocation22_spill] sm:$0xff]  ;;  %9220 = vpow2.f32 %v3553_v1  ;;  %v14318_v1 = vld [vmem:[#allocation84_spill] sm:$0xff] }
 0x1f6   :  { %3274 = vmax.xlane.f32.xlu0 %v3273_v14  ;;  %v14310_v59 = vld [vmem:[#allocation82_spill] sm:$0xff]  ;;  %9222 = vpow2.f32 %v3535_v50 }
 0x1f7   :  { %v11701_v13 = vpop.xlane.xlu1 %3163  ;;  %3298 = vmax.xlane.f32.xlu1 %v3297_v15  ;;  %v11715_v15 = vpop.eup %9214  ;;  %v3282_v32 = vsel %vm2978_vm2, %v14310_v59, -inf  ;;  %v14311_v6 = vld [vmem:[#allocation26_spill] sm:$0xff]  ;;  %v14323_v59 = vsub.f32 %v11012_v23, %v11459_v40 }
 0x1f8   :  { %v11703_v3 = vpop.xlane.xlu0 %3139  ;;  %14302 = vst [vmem:[#allocation11_spill] sm:$0xff] %v11715_v15  ;;  %v11719_v9 = vpop.eup %9216  ;;  %v3807_v57 = vsel %vm2978_vm2, %v11715_v15, 0.0  ;;  %v14313_v15 = vld [vmem:[#allocation83_spill] sm:$0xff]  ;;  %v14325_v50 = vld [vmem:[#allocation30_spill] sm:$0xff] }
 0x1f9   :  { %14297 = vst [vmem:[#allocation118_spill] sm:$0xff] %v11703_v3  ;;  %14303 = vst [vmem:[#allocation23_spill] sm:$0xff] %v11719_v9  ;;  %v3831_v3 = vsel %vm2978_vm2, %v11719_v9, 0.0 }
 0x1fa   :  { %3811 = vadd.xlane.f32.xlu0 %v3810_v21  ;;  %v3551_v21 = vmul.f32 1.442695, %v3393_v36  ;;  %v14312_v36 = vld [vmem:[#allocation27_spill] sm:$0xff] }
 0x1fb   :  { %v11721_v33 = vpop.xlane.xlu1 %3160  ;;  %3835 = vadd.xlane.f32.xlu1 %v3834_v42 }
 0x1fc   :  { %14304 = vst [vmem:[#allocation22_spill] sm:$0xff] %v11721_v33  ;;  %v11723_v28 = vpop.xlane.xlu0 %3136  ;;  %9224 = vpow2.f32 %v3551_v21  ;;  %v3557_v33 = vmul.f32 1.442695, %v14323_v59 }
 0x1fd   :  { %14305 = vst [vmem:[#allocation10_spill] sm:$0xff] %v11723_v28  ;;  %v11755_v28 = vpop.eup %9218 }
 0x1fe   :  { %3808 = vadd.xlane.f32.xlu0 %v3807_v57  ;;  %v3306_v57 = vsel %vm2978_vm2, %v14313_v15, -inf  ;;  %14319 = vst [vmem:[#allocation120_spill] sm:$0xff] %v11755_v28  ;;  %v14320_v15 = vld [vmem:[#allocation85_spill] sm:$0xff]  ;;  %v3816_v14 = vsel %vm2978_vm2, %v11755_v28, 0.0  ;;  %9226 = vpow2.f32 %v3557_v33 }
 0x1ff   :  { %v11733_v42 = vpop.xlane.xlu1 %3169  ;;  %3832 = vadd.xlane.f32.xlu1 %v3831_v3  ;;  %v11759_v21 = vpop.eup %9220 }
 0x200   :  { %14308 = vst [vmem:[#allocation25_spill] sm:$0xff] %v11733_v42  ;;  %v11735_v11 = vpop.xlane.xlu0 %3145  ;;  %v3279_v42 = vsel %vm2978_vm2, %v14318_v1, -inf  ;;  %14321 = vst [vmem:[#allocation121_spill] sm:$0xff] %v11759_v21  ;;  %v3840_v23 = vsel %vm2978_vm2, %v11759_v21, 0.0  ;;  %v14333_v21 = vsub.f32 %v11020_v27, %v11479_v63  ;;  %v14337_v63 = vld [vmem:[#allocation34_spill] sm:$0xff]  ;;  %v14343_v27 = vld [vmem:[#allocation89_spill] sm:$0xff] }
 0x201   :  { %14309 = vst [vmem:[#allocation119_spill] sm:$0xff] %v11735_v11 }
 0x202   :  { %3283 = vmax.xlane.f32.xlu0 %v3282_v32  ;;  %v3303_v32 = vsel %vm2978_vm2, %v14320_v15, -inf  ;;  %v14326_v15 = vsub.f32 %v11014_v24, %v11457_v58  ;;  %v14330_v24 = vsub.f32 %v11016_v25, %v11481_v8 }
 0x203   :  { %v11745_v9 = vpop.xlane.xlu1 %3166  ;;  %3307 = vmax.xlane.f32.xlu1 %v3306_v57 }
 0x204   :  { %14314 = vst [vmem:[#allocation26_spill] sm:$0xff] %v11745_v9  ;;  %v11747_v3 = vpop.xlane.xlu0 %3142  ;;  %v3573_v9 = vmul.f32 1.442695, %v14326_v15  ;;  %v3555_v58 = vmul.f32 1.442695, %v14330_v24  ;;  %v14331_v15 = vld [vmem:[#allocation33_spill] sm:$0xff] }
 0x205   :  { %14315 = vst [vmem:[#allocation27_spill] sm:$0xff] %v11747_v3  ;;  %v14324_v3 = vld [vmem:[#allocation31_spill] sm:$0xff]  ;;  %v14335_v24 = vld [vmem:[#allocation86_spill] sm:$0xff] }
 0x206   :  { %3280 = vmax.xlane.f32.xlu0 %v3279_v42  ;;  %9228 = vpow2.f32 %v3573_v9  ;;  %v3288_v28 = vsel %vm2978_vm2, %v14335_v24, -inf  ;;  %v14336_v9 = vld [vmem:[#allocation35_spill] sm:$0xff]  ;;  %v14338_v42 = vld [vmem:[#allocation88_spill] sm:$0xff]  ;;  %v14347_v24 = vsub.f32 %v11024_v29, %v11493_v26 }
 0x207   :  { %v11761_v57 = vpop.xlane.xlu1 %3199  ;;  %3304 = vmax.xlane.f32.xlu1 %v3303_v32  ;;  %v11777_v32 = vpop.eup %9222  ;;  %9230 = vpow2.f32 %v3555_v58  ;;  %v14349_v58 = vld [vmem:[#allocation38_spill] sm:$0xff] }
 0x208   :  { %v11763_v11 = vpop.xlane.xlu0 %3175  ;;  %14327 = vst [vmem:[#allocation31_spill] sm:$0xff] %v11777_v32  ;;  %v11781_v40 = vpop.eup %9224 }
 0x209   :  { %14322 = vst [vmem:[#allocation122_spill] sm:$0xff] %v11763_v11  ;;  %14328 = vst [vmem:[#allocation30_spill] sm:$0xff] %v11781_v40  ;;  %v3571_v11 = vmul.f32 1.442695, %v14333_v21  ;;  %v3837_v33 = vsel %vm2978_vm2, %v11781_v40, 0.0  ;;  %v11823_v21 = vpop.eup %9226 }
 0x20a   :  { %3817 = vadd.xlane.f32.xlu0 %v3816_v14  ;;  %v14332_v14 = vld [vmem:[#allocation32_spill] sm:$0xff]  ;;  %14344 = vst [vmem:[#allocation34_spill] sm:$0xff] %v11823_v21 }
 0x20b   :  { %v11783_v59 = vpop.xlane.xlu1 %3196  ;;  %3841 = vadd.xlane.f32.xlu1 %v3840_v23  ;;  %v3813_v23 = vsel %vm2978_vm2, %v11777_v32, 0.0  ;;  %9232 = vpow2.f32 %v3571_v11  ;;  %v3846_v32 = vsel %vm2978_vm2, %v11823_v21, 0.0 }
 0x20c   :  { %v11785_v1 = vpop.xlane.xlu0 %3172 }
 0x20d   :  { %14329 = vst [vmem:[#allocation123_spill] sm:$0xff] %v11785_v1  ;;  %v3561_v1 = vmul.f32 1.442695, %v14347_v24 }
 0x20e   :  { %3814 = vadd.xlane.f32.xlu0 %v3813_v23  ;;  %v3312_v23 = vsel %vm2978_vm2, %v14338_v42, -inf }
 0x20f   :  { %v11801_v25 = vpop.xlane.xlu1 %3205  ;;  %3838 = vadd.xlane.f32.xlu1 %v3837_v33  ;;  %9234 = vpow2.f32 %v3561_v1 }
 0x210   :  { %14334 = vst [vmem:[#allocation33_spill] sm:$0xff] %v11801_v25  ;;  %v11803_v8 = vpop.xlane.xlu0 %3181  ;;  %v3285_v25 = vsel %vm2978_vm2, %v14343_v27, -inf  ;;  %v11827_v11 = vpop.eup %9228 }
 0x211   :  { %14345 = vst [vmem:[#allocation124_spill] sm:$0xff] %v11827_v11  ;;  %v3870_v29 = vsel %vm2978_vm2, %v11827_v11, 0.0  ;;  %v14356_v11 = vsub.f32 %v11034_v34, %v11503_v46  ;;  %v14358_v46 = vld [vmem:[#allocation42_spill] sm:$0xff] }
 0x212   :  { %3289 = vmax.xlane.f32.xlu0 %v3288_v28  ;;  %v3309_v28 = vsel %vm2978_vm2, %v11467_v7, -inf  ;;  %v14350_v7 = vsub.f32 %v11026_v30, %v11491_v41  ;;  %v14353_v30 = vsub.f32 %v11028_v31, %v11505_v39  ;;  %v14354_v41 = vld [vmem:[#allocation41_spill] sm:$0xff] }
 0x213   :  { %v11813_v40 = vpop.xlane.xlu1 %3202  ;;  %3313 = vmax.xlane.f32.xlu1 %v3312_v23 }
 0x214   :  { %14339 = vst [vmem:[#allocation32_spill] sm:$0xff] %v11813_v40  ;;  %v11815_v33 = vpop.xlane.xlu0 %3178  ;;  %v3577_v40 = vmul.f32 1.442695, %v14350_v7  ;;  %v3559_v7 = vmul.f32 1.442695, %v14353_v30  ;;  %v3318_v30 = vsel %vm2978_vm2, %v11541_v55, -inf }
 0x215   :  { %14340 = vst [vmem:[#allocation35_spill] sm:$0xff] %v11815_v33  ;;  %v14348_v33 = vld [vmem:[#allocation39_spill] sm:$0xff]  ;;  %v14360_v55 = vld [vmem:[#allocation45_spill] sm:$0xff] }
 0x216   :  { %3286 = vmax.xlane.f32.xlu0 %v3285_v25  ;;  %9236 = vpow2.f32 %v3577_v40  ;;  %v14357_v40 = vld [vmem:[#allocation43_spill] sm:$0xff]  ;;  %v14359_v25 = vsub.f32 %v11042_v38, %v11523_v49  ;;  %v3339_v38 = vsel %vm2978_vm2, %v11559_v54, -inf  ;;  %v14368_v54 = vsub.f32 %v11044_v43, %v11547_v45 }
 0x217   :  { %v11829_v23 = vpop.xlane.xlu1 %3211  ;;  %3310 = vmax.xlane.f32.xlu1 %v3309_v28  ;;  %v11845_v28 = vpop.eup %9230  ;;  %9238 = vpow2.f32 %v3559_v7  ;;  %v3348_v45 = vsel %vm2978_vm2, %v11577_v52, -inf  ;;  %v14383_v52 = vld [vmem:[#allocation105_spill] sm:$0xff] }
 0x218   :  { %v11831_v42 = vpop.xlane.xlu0 %3187  ;;  %14351 = vst [vmem:[#allocation39_spill] sm:$0xff] %v11845_v28  ;;  %v11849_v26 = vpop.eup %9232  ;;  %v3581_v7 = vmul.f32 1.442695, %v14359_v25 }
 0x219   :  { %14346 = vst [vmem:[#allocation125_spill] sm:$0xff] %v11831_v42  ;;  %14352 = vst [vmem:[#allocation38_spill] sm:$0xff] %v11849_v26  ;;  %v3575_v42 = vmul.f32 1.442695, %v14356_v11  ;;  %v3867_v1 = vsel %vm2978_vm2, %v11849_v26, 0.0  ;;  %v14361_v26 = vld [vmem:[#allocation44_spill] sm:$0xff] }
 0x21a   :  { %3847 = vadd.xlane.f32.xlu0 %v3846_v32  ;;  %v14355_v32 = vld [vmem:[#allocation40_spill] sm:$0xff] }
 0x21b   :  { %v11851_v24 = vpop.xlane.xlu1 %3208  ;;  %3871 = vadd.xlane.f32.xlu1 %v3870_v29  ;;  %v3843_v29 = vsel %vm2978_vm2, %v11845_v28, 0.0  ;;  %9240 = vpow2.f32 %v3575_v42  ;;  %v14381_v28 = vld [vmem:[#allocation104_spill] sm:$0xff] }
 0x21c   :  { %v11853_v27 = vpop.xlane.xlu0 %3184  ;;  %9242 = vpow2.f32 %v3581_v7  ;;  %v14367_v7 = vsub.f32 %v11046_v48, %v11545_v16  ;;  %v3324_v48 = vsel %vm2978_vm2, %v11563_v53, -inf  ;;  %v14369_v16 = vld [vmem:[#allocation47_spill] sm:$0xff]  ;;  %v14376_v53 = vld [vmem:[#allocation50_spill] sm:$0xff] }
 0x21e   :  { %3844 = vadd.xlane.f32.xlu0 %v3843_v29  ;;  %v3342_v29 = vsel %vm2978_vm2, %v11553_v2, -inf  ;;  %v14362_v2 = vsub.f32 %v11040_v37, %v11525_v17 }
 0x21f   :  { %v11869_v31 = vpop.xlane.xlu1 %3217  ;;  %3868 = vadd.xlane.f32.xlu1 %v3867_v1 }
 0x220   :  { %v11871_v39 = vpop.xlane.xlu0 %3193  ;;  %v3565_v42 = vmul.f32 1.442695, %v14362_v2 }
 0x222   :  { %3319 = vmax.xlane.f32.xlu0 %v3318_v30  ;;  %v3315_v30 = vsel %vm2978_vm2, %v11555_v47, -inf  ;;  %9244 = vpow2.f32 %v3565_v42  ;;  %v3563_v47 = vmul.f32 1.442695, %v14368_v54  ;;  %v14371_v54 = vld [vmem:[#allocation49_spill] sm:$0xff] }
 0x223   :  { %v11881_v21 = vpop.xlane.xlu1 %3214  ;;  %3343 = vmax.xlane.f32.xlu1 %v3342_v29  ;;  %v11897_v29 = vpop.eup %9234 }
 0x224   :  { %v11883_v1 = vpop.xlane.xlu0 %3190  ;;  %14363 = vst [vmem:[#allocation41_spill] sm:$0xff] %v11897_v29  ;;  %v11901_v49 = vpop.eup %9236  ;;  %v3852_v37 = vsel %vm2978_vm2, %v11897_v29, 0.0 }
 0x225   :  { %14364 = vst [vmem:[#allocation40_spill] sm:$0xff] %v11901_v49  ;;  %v11905_v17 = vpop.eup %9238  ;;  %v3876_v2 = vsel %vm2978_vm2, %v11901_v49, 0.0 }
 0x226   :  { %3316 = vmax.xlane.f32.xlu0 %v3315_v30  ;;  %14365 = vst [vmem:[#allocation43_spill] sm:$0xff] %v11905_v17  ;;  %v11909_v30 = vpop.eup %9240 }
 0x227   :  { %3340 = vmax.xlane.f32.xlu1 %v3339_v38  ;;  %14366 = vst [vmem:[#allocation42_spill] sm:$0xff] %v11909_v30  ;;  %v3579_v38 = vmul.f32 1.442695, %v14367_v7  ;;  %v11933_v7 = vpop.eup %9242 }
 0x228   :  { %v3752_v25 = vpop.xlane.xlu0 %3751  ;;  %v3776_v34 = vpop.xlane.xlu1 %3775  ;;  %14372 = vst [vmem:[#allocation44_spill] sm:$0xff] %v11933_v7 }
 0x229   :  { %9246 = vrcp.f32 %v3752_v25  ;;  %v3849_v25 = vsel %vm2978_vm2, %v11905_v17, 0.0  ;;  %v14379_v17 = vld [vmem:[#allocation46_spill] sm:$0xff] }
 0x22a   :  { %3853 = vadd.xlane.f32.xlu0 %v3852_v37  ;;  %9248 = vrcp.f32 %v3776_v34  ;;  %v3873_v34 = vsel %vm2978_vm2, %v11909_v30, 0.0 }
 0x22b   :  { %3877 = vadd.xlane.f32.xlu1 %v3876_v2  ;;  %v14378_v2 = vsub.f32 %v11050_v60, %v11567_v22  ;;  %v419_v60 = vld [vmem:[%s13905_s2 + $0x90] sm:$0xff]  ;;  %v420_v22 = vld [vmem:[%s13905_s2 + $0x98] sm:$0xff] }
 0x22c   :  { %v3749_v11 = vpop.xlane.xlu0 %3748  ;;  %v3773_v42 = vpop.xlane.xlu1 %3772 }
 0x22d   :  { %9250 = vrcp.f32 %v3749_v11 }
 0x22e   :  { %9252 = vrcp.f32 %v3773_v42  ;;  %3850 = vadd.xlane.f32.xlu0 %v3849_v25  ;;  %v11935_v42 = vpop.eup %9244 }
 0x22f   :  { %3874 = vadd.xlane.f32.xlu1 %v3873_v34  ;;  %9254 = vpow2.f32 %v3579_v38  ;;  %14373 = vst [vmem:[#allocation47_spill] sm:$0xff] %v11935_v42  ;;  %v14375_v34 = vsub.f32 %v11048_v56, %v11565_v5  ;;  %v14382_v5 = vld [vmem:[#allocation48_spill] sm:$0xff] }
 0x230   :  { %v11921_v37 = vpop.xlane.xlu0 %3223  ;;  %v11927_v43 = vpop.xlane.xlu1 %3247  ;;  %9256 = vpow2.f32 %v3563_v47 }
 0x231   :  { %14370 = vst [vmem:[#allocation45_spill] sm:$0xff] %v11927_v43  ;;  %v3585_v11 = vmul.f32 1.442695, %v14375_v34  ;;  %v3321_v43 = vsel %vm2978_vm2, %v14381_v28, -inf }
 0x232   :  { %3325 = vmax.xlane.f32.xlu0 %v3324_v48  ;;  %v3569_v48 = vmul.f32 1.442695, %v14378_v2 }
 0x233   :  { %3349 = vmax.xlane.f32.xlu1 %v3348_v45  ;;  %v9247_v38 = vpop.eup %9246  ;;  %9258 = vpow2.f32 %v3585_v11  ;;  %v3858_v11 = vsel %vm2978_vm2, %v11935_v42, 0.0 }
 0x234   :  { %v11937_v25 = vpop.xlane.xlu0 %3220  ;;  %v11944_v47 = vpop.xlane.xlu1 %3244  ;;  %v4260_v49 = vmul.f32 %v9247_v38, %v14379_v17  ;;  %v14384_v38 = vld [vmem:[#allocation51_spill] sm:$0xff]  ;;  %9260 = vpow2.f32 %v3569_v48 }
 0x235   :  { %14374 = vst [vmem:[#allocation49_spill] sm:$0xff] %v11937_v25  ;;  %14377 = vst [vmem:[#allocation50_spill] sm:$0xff] %v11944_v47  ;;  %v9249_v30 = vpop.eup %9248  ;;  %v3345_v25 = vsel %vm2978_vm2, %v14383_v52, -inf  ;;  %v14385_v52 = vld [vmem:[#allocation53_spill] sm:$0xff] }
 0x236   :  { %v4268_v34 = vmul.f32 %v9249_v30, %v14382_v5  ;;  %3322 = vmax.xlane.f32.xlu0 %v3321_v43  ;;  %6452 = vst.msk [vmem:[#allocation2 + $0x8] sm:$0xff] %vm2978_vm2, %v4260_v49  ;;  %v427_v30 = vld [vmem:[%s13905_s2 + $0xd0] sm:$0xff]  ;;  %v428_v43 = vld [vmem:[%s13905_s2 + $0xd8] sm:$0xff] }
 0x237   :  { %v9251_v56 = vpop.eup %9250  ;;  %3346 = vmax.xlane.f32.xlu1 %v3345_v25  ;;  %v8939_v25 = vpack.c.bf16 %v420_v22, %v419_v60  ;;  %v8955_v48 = vpack.c.bf16 %v428_v43, %v427_v30  ;;  %v422_v60 = vld [vmem:[%s13905_s2 + $0xa8] sm:$0xff]  ;;  %v429_v22 = vld [vmem:[%s13905_s2 + $0xe0] sm:$0xff] }
 0x238   :  { %v9253_v17 = vpop.eup %9252  ;;  %v3758_v2 = vpop.xlane.xlu0 %3757  ;;  %v4259_v29 = vmul.f32 %v9251_v56, %v14384_v38  ;;  %6460 = vst.msk [vmem:[#allocation2 + $0x48] sm:$0xff] %vm2978_vm2, %v4268_v34  ;;  %v14389_v38 = vld [vmem:[#allocation107_spill] sm:$0xff] }
 0x239   :  { %v3782_v5 = vpop.xlane.xlu1 %3781  ;;  %v4267_v28 = vmul.f32 %v9253_v17, %v14385_v52  ;;  %v11975_v56 = vpop.eup %9254  ;;  %9262 = vrcp.f32 %v3758_v2  ;;  %v3882_v52 = vsel %vm2978_vm2, %v11933_v7, 0.0  ;;  %v430_v17 = vld [vmem:[%s13905_s2 + $0xe8] sm:$0xff]  ;;  %v14388_v2 = vld [vmem:[#allocation12_spill] sm:$0xff] }
 0x23a   :  { %8087 = vmatprep.mubr.msk.f32.mxu0 %vm2978_vm2, %v4259_v29  ;;  %6451 = vst.msk [vmem:[#allocation2] sm:$0xff] %vm2978_vm2, %v4259_v29  ;;  %14386 = vst [vmem:[#allocation46_spill] sm:$0xff] %v11975_v56  ;;  %v421_v29 = vld [vmem:[%s13905_s2 + $0xa0] sm:$0xff]  ;;  %9264 = vrcp.f32 %v3782_v5  ;;  %3859 = vadd.xlane.f32.xlu0 %v3858_v11  ;;  %v14390_v30 = vsub.f32 %v14388_v2, %v14389_v38  ;;  %v14392_v11 = vld [vmem:[#allocation108_spill] sm:$0xff]  ;;  %v3879_v2 = vsel %vm2978_vm2, %v11975_v56, 0.0 }
 0x23b   :  { %8088 = vmatmul.mubr.msk.f32.vlgmr.msra.gmra.mrb[64].mxu0 %vm2978_vm2, %v4260_v49  ;;  %8115 = vmatprep.mubr.msk.f32.mxu1 %vm2978_vm2, %v4267_v28  ;;  %6459 = vst.msk [vmem:[#allocation2 + $0x40] sm:$0xff] %vm2978_vm2, %v4267_v28  ;;  %v11990_v49 = vpop.eup %9256  ;;  %v14391_v5 = vld [vmem:[#allocation13_spill] sm:$0xff]  ;;  %v8943_v47 = vpack.c.bf16 %v422_v60, %v421_v29  ;;  %v431_v29 = vld [vmem:[%s13905_s2 + $0xf0] sm:$0xff]  ;;  %v432_v60 = vld [vmem:[%s13905_s2 + $0xf8] sm:$0xff] }
 0x23c   :  { %14387 = vst [vmem:[#allocation48_spill] sm:$0xff] %v11990_v49  ;;  %3883 = vadd.xlane.f32.xlu1 %v3882_v52  ;;  %v3755_v28 = vpop.xlane.xlu0 %3754  ;;  %v3583_v43 = vmul.f32 1.442695, %v14390_v30  ;;  %8116 = vmatmul.mubr.msk.f32.vlgmr.msra.gmra.mrb[64].mxu1 %vm2978_vm2, %v4268_v34  ;;  %v14393_v52 = vsub.f32 %v14391_v5, %v14392_v11  ;;  %v3855_v45 = vsel %vm2978_vm2, %v11990_v49, 0.0  ;;  %v8959_v34 = vpack.c.bf16 %v430_v17, %v429_v22  ;;  %v14397_v38 = vld [vmem:[#allocation106_spill] sm:$0xff]  ;;  %v14398_v30 = vld [vmem:[#allocation109_spill] sm:$0xff] }
 0x23d   :  { %9266 = vrcp.f32 %v3755_v28  ;;  %v3779_v7 = vpop.xlane.xlu1 %3778  ;;  %8938 = vmatpush3.bf16.msra.mxu0 %v11643_v10  ;;  %8954 = vmatpush3.bf16.msra.mxu1 %v11664_v35  ;;  %v423_v10 = vld [vmem:[%s13905_s2 + $0xb0] sm:$0xff]  ;;  %v14395_v28 = vld [vmem:[#allocation54_spill] sm:$0xff]  ;;  %v3354_v5 = vsel %vm2978_vm2, %v14398_v30, -inf  ;;  %v8963_v22 = vpack.c.bf16 %v432_v60, %v431_v29  ;;  %v14410_v11 = vld [vmem:[#allocation65_spill] sm:$0xff] }
 0x23e   :  { %v3567_v42 = vmul.f32 1.442695, %v14393_v52  ;;  %9268 = vrcp.f32 %v3779_v7  ;;  %8940 = vmatprep.subr.bf16.mxu0 %v8939_v25  ;;  %8956 = vmatprep.subr.bf16.mxu1 %v8955_v48  ;;  %v424_v7 = vld [vmem:[%s13905_s2 + $0xb8] sm:$0xff]  ;;  %v14407_v29 = vld [vmem:[#allocation114_spill] sm:$0xff] }
 0x23f   :  { %3856 = vadd.xlane.f32.xlu0 %v3855_v45  ;;  %9270 = vpow2.f32 %v3583_v43  ;;  %v3330_v45 = vsel %vm2978_vm2, %v14397_v38, -inf  ;;  %v12035_v43 = vpop.eup %9258  ;;  %v14404_v52 = vld [vmem:[#allocation56_spill] sm:$0xff] }
 0x240   :  { %3880 = vadd.xlane.f32.xlu1 %v3879_v2  ;;  %v12017_v35 = vpop.xlane.xlu0 %3229  ;;  %9272 = vpow2.f32 %v3567_v42  ;;  %v8947_v2 = vpack.c.bf16 %v424_v7, %v423_v10  ;;  %14400 = vst [vmem:[#allocation12_spill] sm:$0xff] %v12035_v43  ;;  %v12037_v56 = vpop.eup %9260  ;;  %v14403_v42 = vsub.f32 %v14274_v62, %v11613_v44  ;;  %v14406_v7 = vld [vmem:[#allocation14_spill] sm:$0xff]  ;;  %v433_v44 = vld [vmem:[%s13905_s2 + $0x100] sm:$0xff] }
 0x241   :  { %14394 = vst [vmem:[#allocation51_spill] sm:$0xff] %v12017_v35  ;;  %v12027_v17 = vpop.xlane.xlu1 %3253  ;;  %8942 = vmatpush3.bf16.msra.mxu0 %v8939_v25  ;;  %8958 = vmatpush3.bf16.msra.mxu1 %v8955_v48  ;;  %14401 = vst [vmem:[#allocation107_spill] sm:$0xff] %v12037_v56  ;;  %v14408_v60 = vsub.f32 %v14406_v7, %v14407_v29  ;;  %v434_v62 = vld [vmem:[%s13905_s2 + $0x108] sm:$0xff]  ;;  %v14412_v29 = vld [vmem:[#allocation5_spill] sm:$0xff] }
 0x242   :  { %14396 = vst [vmem:[#allocation53_spill] sm:$0xff] %v12027_v17  ;;  %8944 = vmatprep.subr.bf16.mxu0 %v8943_v47  ;;  %8960 = vmatprep.subr.bf16.mxu1 %v8959_v34  ;;  %v3605_v25 = vmul.f32 1.442695, %v14403_v42  ;;  %v14411_v42 = vld [vmem:[#allocation110_spill] sm:$0xff] }
 0x243   :  { %3331 = vmax.xlane.f32.xlu0 %v3330_v45  ;;  %v9263_v38 = vpop.eup %9262  ;;  %v3589_v17 = vmul.f32 1.442695, %v14408_v60  ;;  %v3327_v7 = vsel %vm2978_vm2, %v14411_v42, -inf  ;;  %v3351_v60 = vsel %vm2978_vm2, %v14412_v29, -inf  ;;  %v14414_v45 = vld [vmem:[#allocation68_spill] sm:$0xff] }
 0x244   :  { %3355 = vmax.xlane.f32.xlu1 %v3354_v5  ;;  %v12039_v49 = vpop.xlane.xlu0 %3226  ;;  %v9265_v10 = vpop.eup %9264  ;;  %v4262_v35 = vmul.f32 %v9263_v38, %v14410_v11  ;;  %v14413_v5 = vld [vmem:[#allocation67_spill] sm:$0xff]  ;;  %v442_v38 = vld [vmem:[%s13905_s2 + $0x148] sm:$0xff]  ;;  %9274 = vpow2.f32 %v3605_v25 }
 0x245   :  { %14402 = vst [vmem:[#allocation13_spill] sm:$0xff] %v12039_v49  ;;  %v12046_v30 = vpop.xlane.xlu1 %3250  ;;  %8946 = vmatpush3.bf16.msra.mxu0 %v8943_v47  ;;  %8962 = vmatpush3.bf16.msra.mxu1 %v8959_v34  ;;  %v4270_v48 = vmul.f32 %v9265_v10, %v14413_v5  ;;  %v441_v34 = vld [vmem:[%s13905_s2 + $0x140] sm:$0xff]  ;;  %v12075_v49 = vpack.c.bf16 %v434_v62, %v433_v44  ;;  %9276 = vpow2.f32 %v3589_v17  ;;  %v3888_v17 = vsel %vm2978_vm2, %v12035_v43, 0.0 }
 0x246   :  { %14405 = vst [vmem:[#allocation108_spill] sm:$0xff] %v12046_v30  ;;  %8948 = vmatprep.subr.bf16.mxu0 %v8947_v2  ;;  %8964 = vmatprep.subr.bf16.mxu1 %v8963_v22  ;;  %6454 = vst.msk [vmem:[#allocation2 + $0x18] sm:$0xff] %vm2978_vm2, %v4262_v35  ;;  %v14415_v10 = vld [vmem:[#allocation69_spill] sm:$0xff] }
 0x247   :  { %v9267_v47 = vpop.eup %9266  ;;  %3328 = vmax.xlane.f32.xlu0 %v3327_v7  ;;  %6462 = vst.msk [vmem:[#allocation2 + $0x58] sm:$0xff] %vm2978_vm2, %v4270_v48  ;;  %v12079_v7 = vpack.c.bf16 %v442_v38, %v441_v34  ;;  %v14419_v62 = vld [vmem:[#allocation117_spill] sm:$0xff] }
 0x248   :  { %v9269_v11 = vpop.eup %9268  ;;  %3352 = vmax.xlane.f32.xlu1 %v3351_v60  ;;  %v3764_v30 = vpop.xlane.xlu0 %3763  ;;  %v4261_v42 = vmul.f32 %v9267_v47, %v14414_v45  ;;  %v14420_v47 = vsub.f32 %v14284_v20, %v14419_v62  ;;  %v14422_v20 = vld [vmem:[#allocation17_spill] sm:$0xff]  ;;  %v14428_v62 = vld [vmem:[#allocation59_spill] sm:$0xff] }
 0x249   :  { %v3788_v29 = vpop.xlane.xlu1 %3787  ;;  %v4269_v5 = vmul.f32 %v9269_v11, %v14415_v10  ;;  %8950 = vmatpush3.bf16.msra.mxu0 %v8947_v2  ;;  %8966 = vmatpush3.bf16.msra.mxu1 %v8963_v22  ;;  %v12081_v45 = vpop.eup %9270  ;;  %9278 = vrcp.f32 %v3764_v30  ;;  %v3864_v2 = vsel %vm2978_vm2, %v12037_v56, 0.0  ;;  %v14418_v30 = vsub.f32 %v14283_v0, %v11650_v4  ;;  %v14424_v11 = vld [vmem:[#allocation58_spill] sm:$0xff]  ;;  %v14434_v10 = vld [vmem:[#allocation20_spill] sm:$0xff] }
 0x24a   :  { %8090 = vmatprep.mubr.msk.f32.mxu0 %vm2978_vm2, %v4261_v42  ;;  %6453 = vst.msk [vmem:[#allocation2 + $0x10] sm:$0xff] %vm2978_vm2, %v4261_v42  ;;  %14416 = vst [vmem:[#allocation54_spill] sm:$0xff] %v12081_v45  ;;  %v12090_v25 = vpop.eup %9272  ;;  %9280 = vrcp.f32 %v3788_v29  ;;  %8968 = vmatprep.subr.bf16.mxu0 %v12075_v49  ;;  %v3587_v42 = vmul.f32 1.442695, %v14420_v47  ;;  %v3885_v4 = vsel %vm2978_vm2, %v12081_v45, 0.0  ;;  %v14423_v34 = vsub.f32 %v14287_v12, %v14422_v20  ;;  %v14430_v12 = vld [vmem:[#allocation21_spill] sm:$0xff] }
 0x24b   :  { %8091 = vmatmul.mubr.msk.f32.gmra.mrb[66].mxu0 %vm2978_vm2, %v4262_v35  ;;  %8118 = vmatprep.mubr.msk.f32.mxu1 %vm2978_vm2, %v4269_v5  ;;  %6461 = vst.msk [vmem:[#allocation2 + $0x50] sm:$0xff] %vm2978_vm2, %v4269_v5  ;;  %14417 = vst [vmem:[#allocation56_spill] sm:$0xff] %v12090_v25  ;;  %v3603_v35 = vmul.f32 1.442695, %v14418_v30  ;;  %v3861_v29 = vsel %vm2978_vm2, %v12090_v25, 0.0  ;;  %v14435_v45 = vld [vmem:[#allocation18_spill] sm:$0xff] }
 0x24c   :  { %3865 = vadd.xlane.f32.xlu0 %v3864_v2  ;;  %3889 = vadd.xlane.f32.xlu1 %v3888_v17  ;;  %v3761_v22 = vpop.xlane.xlu0 %3760  ;;  %v3609_v38 = vmul.f32 1.442695, %v14423_v34  ;;  %v14425_v2 = vld [vmem:[#allocation6_spill] sm:$0xff]  ;;  %v14436_v25 = vsub.f32 %v14434_v10, %v14435_v45  ;;  %v14442_v10 = vld [vmem:[#allocation61_spill] sm:$0xff] }
 0x24d   :  { %8119 = vmatmul.mubr.msk.f32.gmra.mrb[66].mxu1 %vm2978_vm2, %v4270_v48  ;;  %9282 = vrcp.f32 %v3761_v22  ;;  %v3785_v44 = vpop.xlane.xlu1 %3784  ;;  %8984 = vmatprep.subr.bf16.mxu1 %v12079_v7  ;;  %v14421_v48 = vld [vmem:[#allocation112_spill] sm:$0xff]  ;;  %v3360_v17 = vsel %vm2978_vm2, %v14425_v2, -inf  ;;  %v14440_v45 = vld [vmem:[#allocation118_spill] sm:$0xff] }
 0x24e   :  { %9284 = vrcp.f32 %v3785_v44  ;;  %v3336_v60 = vsel %vm2978_vm2, %v14421_v48, -inf  ;;  %v14426_v22 = vld [vmem:[#allocation16_spill] sm:$0xff]  ;;  %v12123_v47 = vpop.eup %9274  ;;  %v3591_v43 = vmul.f32 1.442695, %v14436_v25  ;;  %v14441_v25 = vsub.f32 %v14300_v18, %v14440_v45  ;;  %v14443_v56 = vld [vmem:[#allocation70_spill] sm:$0xff]  ;;  %v14446_v48 = vld [vmem:[#allocation71_spill] sm:$0xff] }
 0x24f   :  { %9286 = vpow2.f32 %v3603_v35  ;;  %v14427_v30 = vsub.f32 %v14288_v61, %v14426_v22  ;;  %14429 = vst [vmem:[#allocation14_spill] sm:$0xff] %v12123_v47  ;;  %v12128_v34 = vpop.eup %9276  ;;  %v14438_v22 = vsub.f32 %v14299_v51, %v11701_v13  ;;  %v14439_v35 = vld [vmem:[#allocation60_spill] sm:$0xff]  ;;  %v14444_v13 = vld [vmem:[#allocation15_spill] sm:$0xff]  ;;  %v14447_v45 = vld [vmem:[#allocation73_spill] sm:$0xff] }
 0x250   :  { %3862 = vadd.xlane.f32.xlu0 %v3861_v29  ;;  %3886 = vadd.xlane.f32.xlu1 %v3885_v4  ;;  %v12105_v0 = vpop.xlane.xlu0 %3235  ;;  %9288 = vpow2.f32 %v3587_v42  ;;  %v14431_v29 = vld [vmem:[#allocation19_spill] sm:$0xff]  ;;  %14433 = vst [vmem:[#allocation114_spill] sm:$0xff] %v12128_v34  ;;  %v3333_v51 = vsel %vm2978_vm2, %v14444_v13, -inf }
 0x251   :  { %v12114_v5 = vpop.xlane.xlu1 %3259  ;;  %v3593_v44 = vmul.f32 1.442695, %v14427_v30  ;;  %v14432_v4 = vsub.f32 %v14430_v12, %v14431_v29  ;;  %9290 = vpow2.f32 %v3609_v38  ;;  %v3613_v30 = vmul.f32 1.442695, %v14438_v22  ;;  %v14445_v22 = vld [vmem:[#allocation7_spill] sm:$0xff] }
 0x252   :  { %v3357_v12 = vsel %vm2978_vm2, %v14445_v22, -inf }
 0x253   :  { %v3607_v20 = vmul.f32 1.442695, %v14432_v4  ;;  %v9279_v61 = vpop.eup %9278  ;;  %9292 = vpow2.f32 %v3593_v44 }
 0x254   :  { %3337 = vmax.xlane.f32.xlu0 %v3336_v60  ;;  %3361 = vmax.xlane.f32.xlu1 %v3360_v17  ;;  %v12133_v42 = vpop.xlane.xlu0 %3232  ;;  %v9281_v4 = vpop.eup %9280  ;;  %v3597_v60 = vmul.f32 1.442695, %v14441_v25  ;;  %v4264_v38 = vmul.f32 %v9279_v61, %v14443_v56 }
 0x255   :  { %14437 = vst [vmem:[#allocation65_spill] sm:$0xff] %v12133_v42  ;;  %v12140_v29 = vpop.xlane.xlu1 %3256  ;;  %9294 = vpow2.f32 %v3607_v20  ;;  %v4272_v42 = vmul.f32 %v9281_v4, %v14446_v48  ;;  %v14448_v20 = vld [vmem:[#allocation76_spill] sm:$0xff]  ;;  %v14451_v4 = vld [vmem:[#allocation22_spill] sm:$0xff] }
 0x256   :  { %9296 = vpow2.f32 %v3591_v43  ;;  %6456 = vst.msk [vmem:[#allocation2 + $0x28] sm:$0xff] %vm2978_vm2, %v4264_v38  ;;  %v3894_v43 = vsel %vm2978_vm2, %v12128_v34, 0.0  ;;  %v14468_v34 = vld [vmem:[#allocation29_spill] sm:$0xff] }
 0x257   :  { %v9283_v2 = vpop.eup %9282  ;;  %9298 = vpow2.f32 %v3613_v30  ;;  %6464 = vst.msk [vmem:[#allocation2 + $0x68] sm:$0xff] %vm2978_vm2, %v4272_v42 }
 0x258   :  { %v9285_v44 = vpop.eup %9284  ;;  %3334 = vmax.xlane.f32.xlu0 %v3333_v51  ;;  %3358 = vmax.xlane.f32.xlu1 %v3357_v12  ;;  %v3770_v18 = vpop.xlane.xlu0 %3769  ;;  %v4263_v25 = vmul.f32 %v9283_v2, %v14447_v45  ;;  %9300 = vpow2.f32 %v3597_v60  ;;  %v3918_v2 = vsel %vm2978_vm2, %v12123_v47, 0.0  ;;  %v14452_v60 = vsub.f32 %v14306_v19, %v14451_v4 }
 0x259   :  { %v3794_v56 = vpop.xlane.xlu1 %3793  ;;  %v4271_v61 = vmul.f32 %v9285_v44, %v14448_v20  ;;  %v12159_v48 = vpop.eup %9286  ;;  %9302 = vrcp.f32 %v3770_v18  ;;  %v14453_v44 = vld [vmem:[#allocation24_spill] sm:$0xff]  ;;  %v14454_v18 = vld [vmem:[#allocation10_spill] sm:$0xff] }
 0x25a   :  { %8093 = vmatprep.mubr.msk.f32.mxu0 %vm2978_vm2, %v4263_v25  ;;  %6455 = vst.msk [vmem:[#allocation2 + $0x20] sm:$0xff] %vm2978_vm2, %v4263_v25  ;;  %14449 = vst [vmem:[#allocation67_spill] sm:$0xff] %v12159_v48  ;;  %v12168_v30 = vpop.eup %9288  ;;  %9304 = vrcp.f32 %v3794_v56  ;;  %v14455_v45 = vsub.f32 %v14453_v44, %v14454_v18 }
 0x25b   :  { %8094 = vmatmul.mubr.msk.f32.gmra.mrb[68].mxu0 %vm2978_vm2, %v4264_v38  ;;  %8121 = vmatprep.mubr.msk.f32.mxu1 %vm2978_vm2, %v4271_v61  ;;  %6463 = vst.msk [vmem:[#allocation2 + $0x60] sm:$0xff] %vm2978_vm2, %v4271_v61  ;;  %14450 = vst [vmem:[#allocation68_spill] sm:$0xff] %v12168_v30  ;;  %v3611_v38 = vmul.f32 1.442695, %v14452_v60  ;;  %v12177_v20 = vpop.eup %9290  ;;  %v3891_v56 = vsel %vm2978_vm2, %v12168_v30, 0.0  ;;  %v3915_v61 = vsel %vm2978_vm2, %v12159_v48, 0.0 }
 0x25c   :  { %3895 = vadd.xlane.f32.xlu0 %v3894_v43  ;;  %3919 = vadd.xlane.f32.xlu1 %v3918_v2  ;;  %v3767_v12 = vpop.xlane.xlu0 %3766  ;;  %v3595_v25 = vmul.f32 1.442695, %v14455_v45  ;;  %14456 = vst [vmem:[#allocation69_spill] sm:$0xff] %v12177_v20  ;;  %v14458_v2 = vld [vmem:[#allocation25_spill] sm:$0xff]  ;;  %v14460_v60 = vld [vmem:[#allocation62_spill] sm:$0xff]  ;;  %v14462_v45 = vld [vmem:[#allocation119_spill] sm:$0xff] }
 0x25d   :  { %8122 = vmatmul.mubr.msk.f32.gmra.mrb[68].mxu1 %vm2978_vm2, %v4272_v42  ;;  %9306 = vrcp.f32 %v3767_v12  ;;  %v3791_v51 = vpop.xlane.xlu1 %3790  ;;  %v12183_v43 = vpop.eup %9292  ;;  %v14459_v12 = vsub.f32 %v14311_v6, %v14458_v2  ;;  %v14465_v30 = vld [vmem:[#allocation28_spill] sm:$0xff]  ;;  %v14466_v6 = vld [vmem:[#allocation26_spill] sm:$0xff]  ;;  %v3924_v47 = vsel %vm2978_vm2, %v12177_v20, 0.0 }
 0x25e   :  { %9308 = vrcp.f32 %v3791_v51  ;;  %14457 = vst [vmem:[#allocation117_spill] sm:$0xff] %v12183_v43  ;;  %v14467_v2 = vsub.f32 %v14465_v30, %v14466_v6  ;;  %v3900_v51 = vsel %vm2978_vm2, %v12183_v43, 0.0  ;;  %v14471_v30 = vsub.f32 %v14324_v3, %v11761_v57 }
 0x25f   :  { %v12187_v42 = vpop.eup %9294  ;;  %9310 = vpow2.f32 %v3611_v38  ;;  %v3617_v4 = vmul.f32 1.442695, %v14459_v12 }
 0x260   :  { %3892 = vadd.xlane.f32.xlu0 %v3891_v56  ;;  %3916 = vadd.xlane.f32.xlu1 %v3915_v61  ;;  %v12185_v19 = vpop.xlane.xlu0 %3241  ;;  %v12196_v18 = vpop.eup %9296  ;;  %9312 = vpow2.f32 %v3595_v25  ;;  %v14463_v56 = vsub.f32 %v14312_v36, %v14462_v45  ;;  %v3615_v12 = vmul.f32 1.442695, %v14467_v2  ;;  %v14469_v36 = vld [vmem:[#allocation27_spill] sm:$0xff]  ;;  %v3637_v6 = vmul.f32 1.442695, %v14471_v30  ;;  %v14472_v2 = vld [vmem:[#allocation64_spill] sm:$0xff] }
 0x261   :  { %v12194_v44 = vpop.xlane.xlu1 %3265  ;;  %v12203_v38 = vpop.eup %9298  ;;  %v14470_v45 = vsub.f32 %v14468_v34, %v14469_v36  ;;  %9314 = vpow2.f32 %v3617_v4  ;;  %v14473_v34 = vld [vmem:[#allocation122_spill] sm:$0xff]  ;;  %v3897_v3 = vsel %vm2978_vm2, %v12196_v18, 0.0  ;;  %v3921_v57 = vsel %vm2978_vm2, %v12187_v42, 0.0 }
 0x262   :  { %14461 = vst [vmem:[#allocation17_spill] sm:$0xff] %v12194_v44  ;;  %v3601_v61 = vmul.f32 1.442695, %v14463_v56  ;;  %v12212_v25 = vpop.eup %9300  ;;  %v14474_v36 = vsub.f32 %v14325_v50, %v14473_v34  ;;  %v14476_v44 = vld [vmem:[#allocation87_spill] sm:$0xff]  ;;  %v14477_v30 = vld [vmem:[#allocation90_spill] sm:$0xff]  ;;  %v14478_v34 = vld [vmem:[#allocation92_spill] sm:$0xff] }
 0x263   :  { %v3599_v56 = vmul.f32 1.442695, %v14470_v45  ;;  %v9303_v22 = vpop.eup %9302 }
 0x264   :  { %3901 = vadd.xlane.f32.xlu0 %v3900_v51  ;;  %3925 = vadd.xlane.f32.xlu1 %v3924_v47  ;;  %v12217_v48 = vpop.xlane.xlu0 %3238  ;;  %v9305_v13 = vpop.eup %9304  ;;  %9316 = vpow2.f32 %v3601_v61  ;;  %v3621_v51 = vmul.f32 1.442695, %v14474_v36  ;;  %v14475_v47 = vld [vmem:[#allocation66_spill] sm:$0xff]  ;;  %v4266_v4 = vmul.f32 %v9303_v22, %v14476_v44  ;;  %v14479_v44 = vld [vmem:[#allocation93_spill] sm:$0xff] }
 0x265   :  { %v12224_v20 = vpop.xlane.xlu1 %3262  ;;  %9318 = vpow2.f32 %v3615_v12  ;;  %v4274_v43 = vmul.f32 %v9305_v13, %v14477_v30  ;;  %v14483_v30 = vld [vmem:[#allocation123_spill] sm:$0xff] }
 0x266   :  { %9320 = vpow2.f32 %v3599_v56  ;;  %6458 = vst.msk [vmem:[#allocation2 + $0x38] sm:$0xff] %vm2978_vm2, %v4266_v4  ;;  %v3930_v56 = vsel %vm2978_vm2, %v12203_v38, 0.0 }
 0x267   :  { %v9307_v17 = vpop.eup %9306  ;;  %9322 = vpow2.f32 %v3637_v6  ;;  %6466 = vst.msk [vmem:[#allocation2 + $0x78] sm:$0xff] %vm2978_vm2, %v4274_v43 }
 0x268   :  { %v9309_v61 = vpop.eup %9308  ;;  %3898 = vadd.xlane.f32.xlu0 %v3897_v3  ;;  %3922 = vadd.xlane.f32.xlu1 %v3921_v57  ;;  %v3800_v50 = vpop.xlane.xlu0 %3799  ;;  %v4265_v36 = vmul.f32 %v9307_v17, %v14478_v34  ;;  %9324 = vpow2.f32 %v3621_v51  ;;  %v3906_v17 = vsel %vm2978_vm2, %v12212_v25, 0.0  ;;  %v14482_v3 = vsub.f32 %v14331_v15, %v11783_v59 }
 0x269   :  { %v3824_v22 = vpop.xlane.xlu1 %3823  ;;  %v4273_v12 = vmul.f32 %v9309_v61, %v14479_v44  ;;  %v12243_v13 = vpop.eup %9310  ;;  %9326 = vrcp.f32 %v3800_v50  ;;  %v14484_v61 = vsub.f32 %v14332_v14, %v14483_v30  ;;  %v14487_v14 = vld [vmem:[#allocation33_spill] sm:$0xff] }
 0x26a   :  { %8096 = vmatprep.mubr.msk.f32.mxu0 %vm2978_vm2, %v4265_v36  ;;  %6457 = vst.msk [vmem:[#allocation2 + $0x30] sm:$0xff] %vm2978_vm2, %v4265_v36  ;;  %14480 = vst [vmem:[#allocation58_spill] sm:$0xff] %v12243_v13  ;;  %v12252_v6 = vpop.eup %9312  ;;  %9328 = vrcp.f32 %v3824_v22  ;;  %v3927_v22 = vsel %vm2978_vm2, %v12243_v13, 0.0  ;;  %v14490_v30 = vld [vmem:[#allocation37_spill] sm:$0xff] }
 0x26b   :  { %8097 = vmatmul.mubr.msk.f32.gmra.mrb[70].mxu0 %vm2978_vm2, %v4266_v4  ;;  %8124 = vmatprep.mubr.msk.f32.mxu1 %vm2978_vm2, %v4273_v12  ;;  %6465 = vst.msk [vmem:[#allocation2 + $0x70] sm:$0xff] %vm2978_vm2, %v4273_v12  ;;  %14481 = vst [vmem:[#allocation16_spill] sm:$0xff] %v12252_v6  ;;  %v3635_v4 = vmul.f32 1.442695, %v14482_v3  ;;  %v3619_v50 = vmul.f32 1.442695, %v14484_v61  ;;  %v12261_v34 = vpop.eup %9314 }
 0x26c   :  { %3907 = vadd.xlane.f32.xlu0 %v3906_v17  ;;  %3931 = vadd.xlane.f32.xlu1 %v3930_v56  ;;  %v3797_v51 = vpop.xlane.xlu0 %3796  ;;  %14485 = vst [vmem:[#allocation59_spill] sm:$0xff] %v12261_v34  ;;  %v3903_v36 = vsel %vm2978_vm2, %v12252_v6, 0.0  ;;  %v14491_v61 = vld [vmem:[#allocation32_spill] sm:$0xff] }
 0x26d   :  { %8125 = vmatmul.mubr.msk.f32.gmra.mrb[70].mxu1 %vm2978_vm2, %v4274_v43  ;;  %9330 = vrcp.f32 %v3797_v51  ;;  %v3821_v57 = vpop.xlane.xlu1 %3820  ;;  %v14488_v43 = vsub.f32 %v14336_v9, %v14487_v14  ;;  %v14489_v51 = vsub.f32 %v14337_v63, %v11803_v8  ;;  %v3936_v9 = vsel %vm2978_vm2, %v12261_v34, 0.0  ;;  %v14497_v34 = vld [vmem:[#allocation125_spill] sm:$0xff] }
 0x26e   :  { %9332 = vrcp.f32 %v3821_v57  ;;  %v12267_v44 = vpop.eup %9316 }
 0x26f   :  { %14486 = vst [vmem:[#allocation21_spill] sm:$0xff] %v12267_v44  ;;  %v12271_v15 = vpop.eup %9318  ;;  %9334 = vpow2.f32 %v3635_v4  ;;  %v3641_v12 = vmul.f32 1.442695, %v14488_v43  ;;  %v3625_v3 = vmul.f32 1.442695, %v14489_v51  ;;  %v3912_v4 = vsel %vm2978_vm2, %v12267_v44, 0.0 }
 0x270   :  { %3904 = vadd.xlane.f32.xlu0 %v3903_v36  ;;  %3928 = vadd.xlane.f32.xlu1 %v3927_v22  ;;  %v12269_v59 = vpop.xlane.xlu0 %3271  ;;  %v12278_v56 = vpop.eup %9320  ;;  %9336 = vpow2.f32 %v3619_v50  ;;  %v14492_v36 = vsub.f32 %v14490_v30, %v14491_v61  ;;  %v14493_v43 = vld [vmem:[#allocation36_spill] sm:$0xff]  ;;  %v14494_v50 = vld [vmem:[#allocation35_spill] sm:$0xff]  ;;  %v14496_v51 = vsub.f32 %v14348_v33, %v11829_v23  ;;  %v14498_v44 = vsub.f32 %v14349_v58, %v14497_v34 }
 0x271   :  { %v12276_v17 = vpop.xlane.xlu1 %3295  ;;  %v12283_v57 = vpop.eup %9322  ;;  %v14495_v45 = vsub.f32 %v14493_v43, %v14494_v50  ;;  %9338 = vpow2.f32 %v3641_v12  ;;  %v14499_v43 = vld [vmem:[#allocation94_spill] sm:$0xff]  ;;  %v3909_v12 = vsel %vm2978_vm2, %v12278_v56, 0.0  ;;  %v3933_v33 = vsel %vm2978_vm2, %v12271_v15, 0.0  ;;  %v435_v23 = vld [vmem:[%s13905_s2 + $0x110] sm:$0xff]  ;;  %v436_v58 = vld [vmem:[%s13905_s2 + $0x118] sm:$0xff] }
 0x272   :  { %v3639_v22 = vmul.f32 1.442695, %v14492_v36  ;;  %v12292_v14 = vpop.eup %9324  ;;  %v3645_v30 = vmul.f32 1.442695, %v14496_v51  ;;  %9340 = vpow2.f32 %v3625_v3  ;;  %v3629_v6 = vmul.f32 1.442695, %v14498_v44 }
 0x273   :  { %v3623_v13 = vmul.f32 1.442695, %v14495_v45  ;;  %v9327_v63 = vpop.eup %9326  ;;  %v14501_v3 = vld [vmem:[#allocation96_spill] sm:$0xff] }
 0x274   :  { %3913 = vadd.xlane.f32.xlu0 %v3912_v4  ;;  %3937 = vadd.xlane.f32.xlu1 %v3936_v9  ;;  %v12297_v8 = vpop.xlane.xlu0 %3268  ;;  %v9329_v36 = vpop.eup %9328  ;;  %v4276_v45 = vmul.f32 %v9327_v63, %v14499_v43  ;;  %9342 = vpow2.f32 %v3639_v22  ;;  %v14500_v9 = vld [vmem:[#allocation95_spill] sm:$0xff]  ;;  %v444_v51 = vld [vmem:[%s13905_s2 + $0x158] sm:$0xff] }
 0x275   :  { %v12302_v61 = vpop.xlane.xlu1 %3292  ;;  %v4284_v50 = vmul.f32 %v9329_v36, %v14500_v9  ;;  %9344 = vpow2.f32 %v3623_v13  ;;  %v443_v63 = vld [vmem:[%s13905_s2 + $0x150] sm:$0xff]  ;;  %v14502_v13 = vld [vmem:[#allocation98_spill] sm:$0xff] }
 0x276   :  { %6468 = vst.msk [vmem:[#allocation2 + $0x88] sm:$0xff] %vm2978_vm2, %v4276_v45  ;;  %9346 = vpow2.f32 %v3645_v30  ;;  %v3942_v30 = vsel %vm2978_vm2, %v12292_v14, 0.0 }
 0x277   :  { %v9331_v4 = vpop.eup %9330  ;;  %6476 = vst.msk [vmem:[#allocation2 + $0xc8] sm:$0xff] %vm2978_vm2, %v4284_v50  ;;  %9348 = vpow2.f32 %v3629_v6  ;;  %v3966_v6 = vsel %vm2978_vm2, %v12283_v57, 0.0 }
 0x278   :  { %v9333_v34 = vpop.eup %9332  ;;  %3910 = vadd.xlane.f32.xlu0 %v3909_v12  ;;  %3934 = vadd.xlane.f32.xlu1 %v3933_v33  ;;  %v3806_v44 = vpop.xlane.xlu0 %3805  ;;  %v4275_v22 = vmul.f32 %v9331_v4, %v14501_v3  ;;  %v8971_v4 = vpack.c.bf16 %v436_v58, %v435_v23  ;;  %v8987_v12 = vpack.c.bf16 %v444_v51, %v443_v63  ;;  %v437_v33 = vld [vmem:[%s13905_s2 + $0x120] sm:$0xff]  ;;  %v438_v23 = vld [vmem:[%s13905_s2 + $0x128] sm:$0xff] }
 0x279   :  { %v3830_v36 = vpop.xlane.xlu1 %3829  ;;  %v4283_v43 = vmul.f32 %v9333_v34, %v14502_v13  ;;  %v12331_v9 = vpop.eup %9334  ;;  %9350 = vrcp.f32 %v3806_v44  ;;  %v445_v34 = vld [vmem:[%s13905_s2 + $0x160] sm:$0xff]  ;;  %v446_v44 = vld [vmem:[%s13905_s2 + $0x168] sm:$0xff]  ;;  %v14503_v3 = vsub.f32 %v14354_v41, %v11851_v24  ;;  %v14504_v51 = vsub.f32 %v14355_v32, %v11853_v27  ;;  %v439_v27 = vld [vmem:[%s13905_s2 + $0x130] sm:$0xff] }
 0x27a   :  { %8143 = vmatprep.mubr.msk.f32.mxu0 %vm2978_vm2, %v4275_v22  ;;  %6467 = vst.msk [vmem:[#allocation2 + $0x80] sm:$0xff] %vm2978_vm2, %v4275_v22  ;;  %9352 = vrcp.f32 %v3830_v36  ;;  %v8975_v13 = vpack.c.bf16 %v438_v23, %v437_v33  ;;  %v3963_v41 = vsel %vm2978_vm2, %v12331_v9, 0.0  ;;  %v440_v32 = vld [vmem:[%s13905_s2 + $0x138] sm:$0xff]  ;;  %v14505_v23 = vsub.f32 %v14357_v40, %v11869_v31 }
 0x27b   :  { %8144 = vmatmul.mubr.msk.f32.vlgmr.msra.gmra.mrb[72].mxu0 %vm2978_vm2, %v4276_v45  ;;  %8171 = vmatprep.mubr.msk.f32.mxu1 %vm2978_vm2, %v4283_v43  ;;  %6475 = vst.msk [vmem:[#allocation2 + $0xc0] sm:$0xff] %vm2978_vm2, %v4283_v43  ;;  %v12346_v45 = vpop.eup %9336  ;;  %v3643_v22 = vmul.f32 1.442695, %v14503_v3  ;;  %v3627_v36 = vmul.f32 1.442695, %v14504_v51  ;;  %v14506_v3 = vsub.f32 %v14358_v46, %v11871_v39  ;;  %v8979_v51 = vpack.c.bf16 %v440_v32, %v439_v27 }
 0x27c   :  { %3943 = vadd.xlane.f32.xlu0 %v3942_v30  ;;  %3967 = vadd.xlane.f32.xlu1 %v3966_v6  ;;  %v3803_v58 = vpop.xlane.xlu0 %3802  ;;  %v12363_v43 = vpop.eup %9338  ;;  %v3939_v24 = vsel %vm2978_vm2, %v12346_v45, 0.0  ;;  %v447_v30 = vld [vmem:[%s13905_s2 + $0x170] sm:$0xff]  ;;  %v448_v6 = vld [vmem:[%s13905_s2 + $0x178] sm:$0xff]  ;;  %v14508_v39 = vsub.f32 %v14361_v26, %v11883_v1 }
 0x27d   :  { %8172 = vmatmul.mubr.msk.f32.vlgmr.msra.gmra.mrb[72].mxu1 %vm2978_vm2, %v4284_v50  ;;  %9354 = vrcp.f32 %v3803_v58  ;;  %v3827_v63 = vpop.xlane.xlu1 %3826  ;;  %8970 = vmatpush3.bf16.msra.mxu0 %v12075_v49  ;;  %v8991_v50 = vpack.c.bf16 %v446_v44, %v445_v34  ;;  %v12375_v49 = vpop.eup %9340  ;;  %v3649_v58 = vmul.f32 1.442695, %v14505_v23  ;;  %v14512_v1 = vld [vmem:[#allocation111_spill] sm:$0xff] }
 0x27e   :  { %9356 = vrcp.f32 %v3827_v63  ;;  %8986 = vmatpush3.bf16.msra.mxu1 %v12079_v7  ;;  %8972 = vmatprep.subr.bf16.mxu0 %v8971_v4  ;;  %v12385_v33 = vpop.eup %9342  ;;  %v3633_v63 = vmul.f32 1.442695, %v14506_v3  ;;  %v3948_v40 = vsel %vm2978_vm2, %v12375_v49, 0.0  ;;  %v3631_v46 = vmul.f32 1.442695, %v14508_v39  ;;  %v14514_v39 = vld [vmem:[#allocation115_spill] sm:$0xff] }
 0x27f   :  { %8988 = vmatprep.subr.bf16.mxu1 %v8987_v12  ;;  %9358 = vpow2.f32 %v3643_v22  ;;  %v12392_v44 = vpop.eup %9344  ;;  %v14507_v22 = vsub.f32 %v14360_v55, %v11881_v21  ;;  %v14509_v21 = vsub.f32 %v14369_v16, %v11921_v37  ;;  %v450_v37 = vld [vmem:[%s13905_s2 + $0x188] sm:$0xff] }
 0x280   :  { %3940 = vadd.xlane.f32.xlu0 %v3939_v24  ;;  %3964 = vadd.xlane.f32.xlu1 %v3963_v41  ;;  %v12377_v7 = vpop.xlane.xlu0 %3277  ;;  %9360 = vpow2.f32 %v3627_v36  ;;  %v12397_v24 = vpop.eup %9346  ;;  %v8995_v36 = vpack.c.bf16 %v448_v6, %v447_v30  ;;  %v14510_v6 = vld [vmem:[#allocation45_spill] sm:$0xff] }
 0x281   :  { %v12390_v34 = vpop.xlane.xlu1 %3301  ;;  %8974 = vmatpush3.bf16.msra.mxu0 %v8971_v4  ;;  %v3647_v31 = vmul.f32 1.442695, %v14507_v22  ;;  %v3972_v4 = vsel %vm2978_vm2, %v12363_v43, 0.0  ;;  %v12406_v41 = vpop.eup %9348  ;;  %9362 = vpow2.f32 %v3649_v58  ;;  %v3653_v27 = vmul.f32 1.442695, %v14509_v21  ;;  %v449_v58 = vld [vmem:[%s13905_s2 + $0x180] sm:$0xff] }
 0x282   :  { %8990 = vmatpush3.bf16.msra.mxu1 %v8987_v12  ;;  %8976 = vmatprep.subr.bf16.mxu0 %v8975_v13  ;;  %9364 = vpow2.f32 %v3633_v63  ;;  %v14511_v23 = vsub.f32 %v14371_v54, %v14510_v6  ;;  %v3969_v54 = vsel %vm2978_vm2, %v12385_v33, 0.0  ;;  %v14513_v63 = vld [vmem:[#allocation113_spill] sm:$0xff] }
 0x283   :  { %8992 = vmatprep.subr.bf16.mxu1 %v8991_v50  ;;  %v9351_v55 = vpop.eup %9350  ;;  %9366 = vpow2.f32 %v3647_v31 }
 0x284   :  { %3949 = vadd.xlane.f32.xlu0 %v3948_v40  ;;  %3973 = vadd.xlane.f32.xlu1 %v3972_v4  ;;  %v12411_v12 = vpop.xlane.xlu0 %3274  ;;  %v9353_v30 = vpop.eup %9352  ;;  %v3669_v26 = vmul.f32 1.442695, %v14511_v23  ;;  %v4278_v3 = vmul.f32 %v9351_v55, %v14512_v1  ;;  %v458_v40 = vld [vmem:[%s13905_s2 + $0x1c8] sm:$0xff]  ;;  %9368 = vpow2.f32 %v3631_v46  ;;  %v12443_v23 = vpack.c.bf16 %v450_v37, %v449_v58  ;;  %v14516_v58 = vld [vmem:[#allocation49_spill] sm:$0xff] }
 0x285   :  { %v12416_v32 = vpop.xlane.xlu1 %3298  ;;  %8978 = vmatpush3.bf16.msra.mxu0 %v8975_v13  ;;  %v3945_v13 = vsel %vm2978_vm2, %v12392_v44, 0.0  ;;  %v4286_v22 = vmul.f32 %v9353_v30, %v14513_v63  ;;  %9370 = vpow2.f32 %v3653_v27  ;;  %v14515_v30 = vld [vmem:[#allocation116_spill] sm:$0xff]  ;;  %v3978_v27 = vsel %vm2978_vm2, %v12397_v24, 0.0 }
 0x286   :  { %8994 = vmatpush3.bf16.msra.mxu1 %v8991_v50  ;;  %8980 = vmatprep.subr.bf16.mxu0 %v8979_v51  ;;  %v457_v50 = vld [vmem:[%s13905_s2 + $0x1c0] sm:$0xff]  ;;  %6470 = vst.msk [vmem:[#allocation2 + $0x98] sm:$0xff] %vm2978_vm2, %v4278_v3  ;;  %9372 = vpow2.f32 %v3669_v26  ;;  %v14517_v37 = vsub.f32 %v14376_v53, %v14516_v58 }
 0x287   :  { %v9355_v16 = vpop.eup %9354  ;;  %8996 = vmatprep.subr.bf16.mxu1 %v8995_v36  ;;  %6478 = vst.msk [vmem:[#allocation2 + $0xd8] sm:$0xff] %vm2978_vm2, %v4286_v22  ;;  %v12447_v46 = vpack.c.bf16 %v458_v40, %v457_v50 }
 0x288   :  { %v9357_v4 = vpop.eup %9356  ;;  %3946 = vadd.xlane.f32.xlu0 %v3945_v13  ;;  %3970 = vadd.xlane.f32.xlu1 %v3969_v54  ;;  %v3812_v31 = vpop.xlane.xlu0 %3811  ;;  %v4277_v55 = vmul.f32 %v9355_v16, %v14514_v39  ;;  %v14518_v13 = vld [vmem:[#allocation52_spill] sm:$0xff]  ;;  %v14519_v54 = vld [vmem:[#allocation50_spill] sm:$0xff] }
 0x289   :  { %v3836_v21 = vpop.xlane.xlu1 %3835  ;;  %v4285_v6 = vmul.f32 %v9357_v4, %v14515_v30  ;;  %8982 = vmatpush3.bf16.msra.mxu0 %v8979_v51  ;;  %v12449_v1 = vpop.eup %9358  ;;  %9374 = vrcp.f32 %v3812_v31  ;;  %v3954_v51 = vsel %vm2978_vm2, %v12406_v41, 0.0  ;;  %v14520_v63 = vsub.f32 %v14518_v13, %v14519_v54  ;;  %v14528_v13 = vld [vmem:[#allocation13_spill] sm:$0xff] }
 0x28a   :  { %8146 = vmatprep.mubr.msk.f32.mxu0 %vm2978_vm2, %v4277_v55  ;;  %6469 = vst.msk [vmem:[#allocation2 + $0x90] sm:$0xff] %vm2978_vm2, %v4277_v55  ;;  %8998 = vmatpush3.bf16.msra.mxu1 %v8995_v36  ;;  %v12458_v26 = vpop.eup %9360  ;;  %9376 = vrcp.f32 %v3836_v21  ;;  %v3975_v53 = vsel %vm2978_vm2, %v12449_v1, 0.0  ;;  %v14523_v55 = vld [vmem:[#allocation51_spill] sm:$0xff]  ;;  %v14529_v54 = vsub.f32 %v14404_v52, %v14528_v13  ;;  %v14533_v52 = vsub.f32 %v14424_v11, %v12105_v0  ;;  %v14536_v0 = vld [vmem:[#allocation8_spill] sm:$0xff] }
 0x28b   :  { %8147 = vmatmul.mubr.msk.f32.gmra.mrb[74].mxu0 %vm2978_vm2, %v4278_v3  ;;  %8174 = vmatprep.mubr.msk.f32.mxu1 %vm2978_vm2, %v4285_v6  ;;  %6477 = vst.msk [vmem:[#allocation2 + $0xd0] sm:$0xff] %vm2978_vm2, %v4285_v6  ;;  %v3651_v3 = vmul.f32 1.442695, %v14517_v37  ;;  %v3667_v50 = vmul.f32 1.442695, %v14520_v63  ;;  %v12469_v40 = vpop.eup %9362  ;;  %v3951_v4 = vsel %vm2978_vm2, %v12458_v26, 0.0  ;;  %v14524_v21 = vsub.f32 %v14395_v28, %v14523_v55 }
 0x28c   :  { %3955 = vadd.xlane.f32.xlu0 %v3954_v51  ;;  %3979 = vadd.xlane.f32.xlu1 %v3978_v27  ;;  %v3809_v36 = vpop.xlane.xlu0 %3808  ;;  %14521 = vst [vmem:[#allocation19_spill] sm:$0xff] %v12469_v40  ;;  %v14525_v27 = vld [vmem:[#allocation55_spill] sm:$0xff]  ;;  %v3655_v63 = vmul.f32 1.442695, %v14529_v54  ;;  %v3984_v28 = vsel %vm2978_vm2, %v12469_v40, 0.0  ;;  %v14534_v40 = vsub.f32 %v14428_v62, %v12114_v5 }
 0x28d   :  { %8175 = vmatmul.mubr.msk.f32.gmra.mrb[74].mxu1 %vm2978_vm2, %v4286_v22  ;;  %9378 = vrcp.f32 %v3809_v36  ;;  %v3833_v16 = vpop.xlane.xlu1 %3832  ;;  %9000 = vmatprep.subr.bf16.mxu0 %v12443_v23  ;;  %v12475_v22 = vpop.eup %9364  ;;  %v3657_v30 = vmul.f32 1.442695, %v14524_v21  ;;  %v14526_v36 = vld [vmem:[#allocation53_spill] sm:$0xff] }
 0x28e   :  { %9380 = vrcp.f32 %v3833_v16  ;;  %9016 = vmatprep.subr.bf16.mxu1 %v12447_v46  ;;  %14522 = vst [vmem:[#allocation20_spill] sm:$0xff] %v12475_v22  ;;  %v12479_v39 = vpop.eup %9366  ;;  %v14527_v58 = vsub.f32 %v14525_v27, %v14526_v36 }
 0x28f   :  { %9382 = vpow2.f32 %v3651_v3  ;;  %v12486_v51 = vpop.eup %9368  ;;  %v3960_v3 = vsel %vm2978_vm2, %v12475_v22, 0.0  ;;  %v3677_v22 = vmul.f32 1.442695, %v14534_v40  ;;  %v14538_v40 = vld [vmem:[#allocation23_spill] sm:$0xff] }
 0x290   :  { %3952 = vadd.xlane.f32.xlu0 %v3951_v4  ;;  %3976 = vadd.xlane.f32.xlu1 %v3975_v53  ;;  %v12477_v31 = vpop.xlane.xlu0 %3283  ;;  %9384 = vpow2.f32 %v3667_v50  ;;  %v3673_v37 = vmul.f32 1.442695, %v14527_v58  ;;  %v12491_v16 = vpop.eup %9370  ;;  %v14530_v53 = vld [vmem:[#allocation57_spill] sm:$0xff]  ;;  %v14531_v50 = vld [vmem:[#allocation108_spill] sm:$0xff]  ;;  %v3661_v58 = vmul.f32 1.442695, %v14533_v52 }
 0x291   :  { %v12484_v6 = vpop.xlane.xlu1 %3307  ;;  %v12500_v4 = vpop.eup %9372  ;;  %v14532_v55 = vsub.f32 %v14530_v53, %v14531_v50  ;;  %9386 = vpow2.f32 %v3657_v30  ;;  %v14535_v53 = vld [vmem:[#allocation9_spill] sm:$0xff]  ;;  %v3981_v30 = vsel %vm2978_vm2, %v12479_v39, 0.0  ;;  %v14537_v52 = vld [vmem:[#allocation11_spill] sm:$0xff] }
 0x292   :  { %9388 = vpow2.f32 %v3673_v37 }
 0x293   :  { %v3671_v21 = vmul.f32 1.442695, %v14532_v55  ;;  %v9375_v36 = vpop.eup %9374  ;;  %9390 = vpow2.f32 %v3655_v63 }
 0x294   :  { %3961 = vadd.xlane.f32.xlu0 %v3960_v3  ;;  %3985 = vadd.xlane.f32.xlu1 %v3984_v28  ;;  %v12505_v27 = vpop.xlane.xlu0 %3280  ;;  %v9377_v54 = vpop.eup %9376  ;;  %v4280_v50 = vmul.f32 %v9375_v36, %v14535_v53  ;;  %v3957_v28 = vsel %vm2978_vm2, %v12486_v51, 0.0  ;;  %v14539_v53 = vld [vmem:[#allocation65_spill] sm:$0xff] }
 0x295   :  { %v12510_v13 = vpop.xlane.xlu1 %3304  ;;  %v4288_v11 = vmul.f32 %v9377_v54, %v14536_v0  ;;  %9392 = vpow2.f32 %v3671_v21  ;;  %v3990_v21 = vsel %vm2978_vm2, %v12491_v16, 0.0 }
 0x296   :  { %6472 = vst.msk [vmem:[#allocation2 + $0xa8] sm:$0xff] %vm2978_vm2, %v4280_v50  ;;  %9394 = vpow2.f32 %v3661_v58  ;;  %v4014_v58 = vsel %vm2978_vm2, %v12500_v4, 0.0 }
 0x297   :  { %v9379_v3 = vpop.eup %9378  ;;  %6480 = vst.msk [vmem:[#allocation2 + $0xe8] sm:$0xff] %vm2978_vm2, %v4288_v11  ;;  %9396 = vpow2.f32 %v3677_v22 }
 0x298   :  { %v9381_v55 = vpop.eup %9380  ;;  %3958 = vadd.xlane.f32.xlu0 %v3957_v28  ;;  %3982 = vadd.xlane.f32.xlu1 %v3981_v30  ;;  %v3818_v37 = vpop.xlane.xlu0 %3817  ;;  %v4279_v5 = vmul.f32 %v9379_v3, %v14537_v52  ;;  %v14540_v3 = vsub.f32 %v14439_v35, %v14539_v53  ;;  %v14541_v30 = vsub.f32 %v14442_v10, %v12140_v29 }
 0x299   :  { %v3842_v62 = vpop.xlane.xlu1 %3841  ;;  %v4287_v63 = vmul.f32 %v9381_v55, %v14538_v40  ;;  %v12527_v36 = vpop.eup %9382  ;;  %9398 = vrcp.f32 %v3818_v37  ;;  %v14543_v29 = vsub.f32 %v14460_v60, %v12185_v19  ;;  %v14549_v19 = vsub.f32 %v14472_v2, %v12217_v48 }
 0x29a   :  { %8149 = vmatprep.mubr.msk.f32.mxu0 %vm2978_vm2, %v4279_v5  ;;  %6471 = vst.msk [vmem:[#allocation2 + $0xa0] sm:$0xff] %vm2978_vm2, %v4279_v5  ;;  %v12536_v22 = vpop.eup %9384  ;;  %9400 = vrcp.f32 %v3842_v62  ;;  %v3675_v0 = vmul.f32 1.442695, %v14541_v30  ;;  %v3987_v37 = vsel %vm2978_vm2, %v12527_v36, 0.0  ;;  %v14544_v62 = vld [vmem:[#allocation72_spill] sm:$0xff] }
 0x29b   :  { %8150 = vmatmul.mubr.msk.f32.gmra.mrb[76].mxu0 %vm2978_vm2, %v4280_v50  ;;  %8177 = vmatprep.mubr.msk.f32.mxu1 %vm2978_vm2, %v4287_v63  ;;  %6479 = vst.msk [vmem:[#allocation2 + $0xe0] sm:$0xff] %vm2978_vm2, %v4287_v63  ;;  %v3659_v50 = vmul.f32 1.442695, %v14540_v3  ;;  %v12545_v55 = vpop.eup %9386  ;;  %v4011_v52 = vsel %vm2978_vm2, %v12536_v22, 0.0  ;;  %v3665_v10 = vmul.f32 1.442695, %v14543_v29  ;;  %v3460_v40 = vsub.f32 %v14544_v62, %v12269_v59 }
 0x29c   :  { %3991 = vadd.xlane.f32.xlu0 %v3990_v21  ;;  %4015 = vadd.xlane.f32.xlu1 %v4014_v58  ;;  %v3815_v54 = vpop.xlane.xlu0 %3814  ;;  %v12551_v5 = vpop.eup %9388  ;;  %v14545_v58 = vld [vmem:[#allocation63_spill] sm:$0xff]  ;;  %v3663_v60 = vmul.f32 1.442695, %v14549_v19  ;;  %v3996_v59 = vsel %vm2978_vm2, %v12545_v55, 0.0 }
 0x29d   :  { %8178 = vmatmul.mubr.msk.f32.gmra.mrb[76].mxu1 %vm2978_vm2, %v4288_v11  ;;  %9402 = vrcp.f32 %v3815_v54  ;;  %v3839_v28 = vpop.xlane.xlu1 %3838  ;;  %v12555_v11 = vpop.eup %9390  ;;  %v14546_v54 = vld [vmem:[#allocation17_spill] sm:$0xff]  ;;  %v3685_v48 = vmul.f32 1.442695, %v3460_v40  ;;  %v14553_v40 = vld [vmem:[#allocation31_spill] sm:$0xff] }
 0x29e   :  { %9404 = vrcp.f32 %v3839_v28  ;;  %14542 = vst [vmem:[#allocation18_spill] sm:$0xff] %v12555_v11  ;;  %v14547_v53 = vsub.f32 %v14545_v58, %v14546_v54  ;;  %v14548_v28 = vld [vmem:[#allocation74_spill] sm:$0xff] }
 0x29f   :  { %9406 = vpow2.f32 %v3659_v50  ;;  %v12564_v21 = vpop.eup %9392  ;;  %v3468_v30 = vsub.f32 %v14548_v28, %v12276_v17 }
 0x2a0   :  { %3988 = vadd.xlane.f32.xlu0 %v3987_v37  ;;  %4012 = vadd.xlane.f32.xlu1 %v4011_v52  ;;  %v12553_v35 = vpop.xlane.xlu0 %3289  ;;  %9408 = vpow2.f32 %v3675_v0  ;;  %v3681_v3 = vmul.f32 1.442695, %v14547_v53  ;;  %v12571_v50 = vpop.eup %9394  ;;  %v4020_v37 = vsel %vm2978_vm2, %v12551_v5, 0.0  ;;  %v14550_v52 = vsub.f32 %v14475_v47, %v12224_v20  ;;  %v14551_v53 = vld [vmem:[#allocation120_spill] sm:$0xff] }
 0x2a1   :  { %v12562_v63 = vpop.xlane.xlu1 %3313  ;;  %v12580_v0 = vpop.eup %9396  ;;  %9410 = vpow2.f32 %v3665_v10  ;;  %v3701_v54 = vmul.f32 1.442695, %v3468_v30  ;;  %v3993_v20 = vsel %vm2978_vm2, %v12555_v11, 0.0  ;;  %v4017_v47 = vsel %vm2978_vm2, %v12564_v21, 0.0  ;;  %v14554_v30 = vld [vmem:[#allocation75_spill] sm:$0xff] }
 0x2a2   :  { %v3679_v29 = vmul.f32 1.442695, %v14550_v52  ;;  %9412 = vpow2.f32 %v3681_v3 }
 0x2a3   :  { %v9399_v62 = vpop.eup %9398  ;;  %9414 = vpow2.f32 %v3663_v60  ;;  %v3459_v60 = vsub.f32 %v14554_v30, %v12297_v8  ;;  %v4002_v8 = vsel %vm2978_vm2, %v12571_v50, 0.0 }
 0x2a4   :  { %3997 = vadd.xlane.f32.xlu0 %v3996_v59  ;;  %4021 = vadd.xlane.f32.xlu1 %v4020_v37  ;;  %v12585_v17 = vpop.xlane.xlu0 %3286  ;;  %v9401_v58 = vpop.eup %9400  ;;  %v4282_v28 = vmul.f32 %v9399_v62, %v14551_v53  ;;  %v14552_v59 = vld [vmem:[#allocation121_spill] sm:$0xff]  ;;  %9416 = vpow2.f32 %v3679_v29  ;;  %v14555_v53 = vld [vmem:[#allocation30_spill] sm:$0xff] }
 0x2a5   :  { %v12587_v2 = vpop.xlane.xlu1 %3310  ;;  %v4290_v37 = vmul.f32 %v9401_v58, %v14552_v59  ;;  %9418 = vpow2.f32 %v3685_v48  ;;  %v14556_v58 = vld [vmem:[#allocation77_spill] sm:$0xff]  ;;  %v4026_v48 = vsel %vm2978_vm2, %v12580_v0, 0.0 }
 0x2a6   :  { %6474 = vst.msk [vmem:[#allocation2 + $0xb8] sm:$0xff] %vm2978_vm2, %v4282_v28  ;;  %9420 = vpow2.f32 %v3701_v54  ;;  %v3467_v29 = vsub.f32 %v14556_v58, %v12302_v61 }
 0x2a7   :  { %v9403_v19 = vpop.eup %9402  ;;  %6482 = vst.msk [vmem:[#allocation2 + $0xf8] sm:$0xff] %vm2978_vm2, %v4290_v37 }
 0x2a8   :  { %v9405_v52 = vpop.eup %9404  ;;  %3994 = vadd.xlane.f32.xlu0 %v3993_v20  ;;  %4018 = vadd.xlane.f32.xlu1 %v4017_v47  ;;  %v3848_v10 = vpop.xlane.xlu0 %3847  ;;  %v4281_v3 = vmul.f32 %v9403_v19, %v14553_v40  ;;  %v3683_v20 = vmul.f32 1.442695, %v3459_v60  ;;  %v14558_v47 = vld [vmem:[#allocation78_spill] sm:$0xff]  ;;  %v3699_v59 = vmul.f32 1.442695, %v3467_v29 }
 0x2a9   :  { %v3872_v62 = vpop.xlane.xlu1 %3871  ;;  %v4289_v11 = vmul.f32 %v9405_v52, %v14555_v53  ;;  %v12605_v19 = vpop.eup %9406  ;;  %9422 = vrcp.f32 %v3848_v10  ;;  %v14559_v52 = vld [vmem:[#allocation79_spill] sm:$0xff] }
 0x2aa   :  { %8152 = vmatprep.mubr.msk.f32.mxu0 %vm2978_vm2, %v4281_v3  ;;  %6473 = vst.msk [vmem:[#allocation2 + $0xb0] sm:$0xff] %vm2978_vm2, %v4281_v3  ;;  %v12614_v61 = vpop.eup %9408  ;;  %9424 = vrcp.f32 %v3872_v62  ;;  %v3470_v10 = vsub.f32 %v14559_v52, %v12390_v34  ;;  %v14561_v3 = vld [vmem:[#allocation80_spill] sm:$0xff]  ;;  %v3999_v60 = vsel %vm2978_vm2, %v12605_v19, 0.0 }
 0x2ab   :  { %8153 = vmatmul.mubr.msk.f32.gmra.mrb[78].mxu0 %vm2978_vm2, %v4282_v28  ;;  %8180 = vmatprep.mubr.msk.f32.mxu1 %vm2978_vm2, %v4289_v11  ;;  %6481 = vst.msk [vmem:[#allocation2 + $0xf0] sm:$0xff] %vm2978_vm2, %v4289_v11  ;;  %14557 = vst [vmem:[#allocation60_spill] sm:$0xff] %v12614_v61  ;;  %v3462_v28 = vsub.f32 %v14558_v47, %v12377_v7  ;;  %v12621_v40 = vpop.eup %9410  ;;  %v3461_v30 = vsub.f32 %v14561_v3, %v12411_v12  ;;  %v4023_v7 = vsel %vm2978_vm2, %v12614_v61, 0.0  ;;  %v14565_v12 = vld [vmem:[#allocation82_spill] sm:$0xff] }
 0x2ac   :  { %4003 = vadd.xlane.f32.xlu0 %v4002_v8  ;;  %4027 = vadd.xlane.f32.xlu1 %v4026_v48  ;;  %v3845_v54 = vpop.xlane.xlu0 %3844  ;;  %14560 = vst [vmem:[#allocation118_spill] sm:$0xff] %v12621_v40  ;;  %v12629_v62 = vpop.eup %9412  ;;  %v3464_v8 = vsub.f32 %v14565_v12, %v12477_v31  ;;  %v3705_v47 = vmul.f32 1.442695, %v3470_v10  ;;  %v14568_v12 = vld [vmem:[#allocation34_spill] sm:$0xff] }
 0x2ad   :  { %8181 = vmatmul.mubr.msk.f32.gmra.mrb[78].mxu1 %vm2978_vm2, %v4290_v37  ;;  %9426 = vrcp.f32 %v3845_v54  ;;  %v3869_v11 = vpop.xlane.xlu1 %3868  ;;  %14562 = vst [vmem:[#allocation61_spill] sm:$0xff] %v12629_v62  ;;  %v14563_v37 = vld [vmem:[#allocation81_spill] sm:$0xff]  ;;  %v12635_v58 = vpop.eup %9414  ;;  %v3689_v29 = vmul.f32 1.442695, %v3462_v28  ;;  %v3687_v3 = vmul.f32 1.442695, %v3461_v30 }
 0x2ae   :  { %9428 = vrcp.f32 %v3869_v11  ;;  %v3469_v53 = vsub.f32 %v14563_v37, %v12416_v32  ;;  %14564 = vst [vmem:[#allocation70_spill] sm:$0xff] %v12635_v58  ;;  %v12641_v54 = vpop.eup %9416  ;;  %v14567_v11 = vld [vmem:[#allocation83_spill] sm:$0xff]  ;;  %v3693_v10 = vmul.f32 1.442695, %v3464_v8  ;;  %v452_v8 = vld [vmem:[%s13905_s2 + $0x198] sm:$0xff] }
 0x2af   :  { %9430 = vpow2.f32 %v3683_v20  ;;  %14566 = vst [vmem:[#allocation71_spill] sm:$0xff] %v12641_v54  ;;  %v3472_v32 = vsub.f32 %v14567_v11, %v12484_v6  ;;  %v12645_v52 = vpop.eup %9418  ;;  %v4032_v20 = vsel %vm2978_vm2, %v12629_v62, 0.0  ;;  %v14569_v62 = vld [vmem:[#allocation124_spill] sm:$0xff] }
 0x2b0   :  { %4000 = vadd.xlane.f32.xlu0 %v3999_v60  ;;  %4024 = vadd.xlane.f32.xlu1 %v4023_v7  ;;  %v12633_v34 = vpop.xlane.xlu0 %3319  ;;  %9432 = vpow2.f32 %v3699_v59  ;;  %v4008_v60 = vsel %vm2978_vm2, %v12621_v40, 0.0  ;;  %v12651_v28 = vpop.eup %9420  ;;  %v3703_v31 = vmul.f32 1.442695, %v3469_v53  ;;  %v4005_v53 = vsel %vm2978_vm2, %v12635_v58, 0.0 }
 0x2b1   :  { %v12639_v48 = vpop.xlane.xlu1 %3343  ;;  %9434 = vpow2.f32 %v3689_v29  ;;  %v3709_v30 = vmul.f32 1.442695, %v3472_v32  ;;  %v451_v29 = vld [vmem:[%s13905_s2 + $0x190] sm:$0xff] }
 0x2b2   :  { %9436 = vpow2.f32 %v3705_v47  ;;  %v14570_v32 = vld [vmem:[#allocation39_spill] sm:$0xff] }
 0x2b3   :  { %v9423_v59 = vpop.eup %9422  ;;  %9438 = vpow2.f32 %v3687_v3 }
 0x2b4   :  { %4009 = vadd.xlane.f32.xlu0 %v4008_v60  ;;  %4033 = vadd.xlane.f32.xlu1 %v4032_v20  ;;  %v12653_v7 = vpop.xlane.xlu0 %3316  ;;  %v9425_v37 = vpop.eup %9424  ;;  %v4292_v11 = vmul.f32 %v9423_v59, %v14568_v12  ;;  %v4029_v60 = vsel %vm2978_vm2, %v12641_v54, 0.0  ;;  %9440 = vpow2.f32 %v3703_v31  ;;  %v459_v20 = vld [vmem:[%s13905_s2 + $0x1d0] sm:$0xff]  ;;  %v460_v59 = vld [vmem:[%s13905_s2 + $0x1d8] sm:$0xff]  ;;  %v9003_v54 = vpack.c.bf16 %v452_v8, %v451_v29  ;;  %v454_v29 = vld [vmem:[%s13905_s2 + $0x1a8] sm:$0xff] }
 0x2b5   :  { %v12655_v6 = vpop.xlane.xlu1 %3340  ;;  %v4300_v61 = vmul.f32 %v9425_v37, %v14569_v62  ;;  %9442 = vpow2.f32 %v3693_v10  ;;  %v14571_v37 = vld [vmem:[#allocation84_spill] sm:$0xff]  ;;  %v9019_v10 = vpack.c.bf16 %v460_v59, %v459_v20  ;;  %v14576_v20 = vld [vmem:[#allocation86_spill] sm:$0xff] }
 0x2b6   :  { %6484 = vst.msk [vmem:[#allocation2 + $0x108] sm:$0xff] %vm2978_vm2, %v4292_v11  ;;  %v3463_v12 = vsub.f32 %v14571_v37, %v12505_v27  ;;  %9444 = vpow2.f32 %v3709_v30  ;;  %v4038_v27 = vsel %vm2978_vm2, %v12645_v52, 0.0  ;;  %v453_v30 = vld [vmem:[%s13905_s2 + $0x1a0] sm:$0xff]  ;;  %v3466_v59 = vsub.f32 %v14576_v20, %v12553_v35  ;;  %v14582_v20 = vld [vmem:[#allocation91_spill] sm:$0xff] }
 0x2b7   :  { %v9427_v40 = vpop.eup %9426  ;;  %6492 = vst.msk [vmem:[#allocation2 + $0x148] sm:$0xff] %vm2978_vm2, %v4300_v61 }
 0x2b8   :  { %v9429_v47 = vpop.eup %9428  ;;  %4006 = vadd.xlane.f32.xlu0 %v4005_v53  ;;  %4030 = vadd.xlane.f32.xlu1 %v4029_v60  ;;  %v3854_v62 = vpop.xlane.xlu0 %3853  ;;  %v4291_v3 = vmul.f32 %v9427_v40, %v14570_v32  ;;  %v14572_v53 = vld [vmem:[#allocation38_spill] sm:$0xff]  ;;  %v14573_v40 = vld [vmem:[#allocation85_spill] sm:$0xff] }
 0x2b9   :  { %v3878_v31 = vpop.xlane.xlu1 %3877  ;;  %v4299_v60 = vmul.f32 %v9429_v47, %v14572_v53  ;;  %v3471_v32 = vsub.f32 %v14573_v40, %v12510_v13  ;;  %v12685_v58 = vpop.eup %9430  ;;  %9446 = vrcp.f32 %v3854_v62  ;;  %v4062_v13 = vsel %vm2978_vm2, %v12651_v28, 0.0  ;;  %v461_v47 = vld [vmem:[%s13905_s2 + $0x1e0] sm:$0xff]  ;;  %v462_v62 = vld [vmem:[%s13905_s2 + $0x1e8] sm:$0xff]  ;;  %v14577_v53 = vld [vmem:[#allocation88_spill] sm:$0xff] }
 0x2ba   :  { %8199 = vmatprep.mubr.msk.f32.mxu0 %vm2978_vm2, %v4291_v3  ;;  %6483 = vst.msk [vmem:[#allocation2 + $0x100] sm:$0xff] %vm2978_vm2, %v4291_v3  ;;  %14574 = vst [vmem:[#allocation73_spill] sm:$0xff] %v12685_v58  ;;  %9448 = vrcp.f32 %v3878_v31  ;;  %v3691_v3 = vmul.f32 1.442695, %v3463_v12  ;;  %v9007_v40 = vpack.c.bf16 %v454_v29, %v453_v30  ;;  %v4035_v35 = vsel %vm2978_vm2, %v12685_v58, 0.0  ;;  %v463_v29 = vld [vmem:[%s13905_s2 + $0x1f0] sm:$0xff] }
 0x2bb   :  { %8200 = vmatmul.mubr.msk.f32.vlgmr.msra.gmra.mrb[80].mxu0 %vm2978_vm2, %v4292_v11  ;;  %8227 = vmatprep.mubr.msk.f32.mxu1 %vm2978_vm2, %v4299_v60  ;;  %6491 = vst.msk [vmem:[#allocation2 + $0x140] sm:$0xff] %vm2978_vm2, %v4299_v60  ;;  %v12700_v11 = vpop.eup %9432  ;;  %v3707_v31 = vmul.f32 1.442695, %v3471_v32  ;;  %v3474_v60 = vsub.f32 %v14577_v53, %v12562_v63  ;;  %v9023_v12 = vpack.c.bf16 %v462_v62, %v461_v47  ;;  %v14580_v32 = vld [vmem:[#allocation89_spill] sm:$0xff]  ;;  %v3697_v62 = vmul.f32 1.442695, %v3466_v59 }
 0x2bc   :  { %14575 = vst [vmem:[#allocation76_spill] sm:$0xff] %v12700_v11  ;;  %4039 = vadd.xlane.f32.xlu0 %v4038_v27  ;;  %4063 = vadd.xlane.f32.xlu1 %v4062_v13  ;;  %v3851_v8 = vpop.xlane.xlu0 %3850  ;;  %v12715_v27 = vpop.eup %9434  ;;  %v3465_v13 = vsub.f32 %v14580_v32, %v12585_v17 }
 0x2bd   :  { %8228 = vmatmul.mubr.msk.f32.vlgmr.msra.gmra.mrb[80].mxu1 %vm2978_vm2, %v4300_v61  ;;  %9450 = vrcp.f32 %v3851_v8  ;;  %v3875_v37 = vpop.xlane.xlu1 %3874  ;;  %9002 = vmatpush3.bf16.msra.mxu0 %v12443_v23  ;;  %14578 = vst [vmem:[#allocation22_spill] sm:$0xff] %v12715_v27  ;;  %v4059_v61 = vsel %vm2978_vm2, %v12700_v11, 0.0  ;;  %v455_v23 = vld [vmem:[%s13905_s2 + $0x1b0] sm:$0xff]  ;;  %v12727_v63 = vpop.eup %9436  ;;  %v464_v8 = vld [vmem:[%s13905_s2 + $0x1f8] sm:$0xff] }
 0x2be   :  { %9452 = vrcp.f32 %v3875_v37  ;;  %9018 = vmatpush3.bf16.msra.mxu1 %v12447_v46  ;;  %9004 = vmatprep.subr.bf16.mxu0 %v9003_v54  ;;  %v456_v46 = vld [vmem:[%s13905_s2 + $0x1b8] sm:$0xff]  ;;  %14579 = vst [vmem:[#allocation24_spill] sm:$0xff] %v12727_v63  ;;  %v12739_v47 = vpop.eup %9438  ;;  %v3473_v37 = vsub.f32 %v14582_v20, %v12587_v2  ;;  %v4068_v2 = vsel %vm2978_vm2, %v12727_v63, 0.0 }
 0x2bf   :  { %9020 = vmatprep.subr.bf16.mxu1 %v9019_v10  ;;  %14581 = vst [vmem:[#allocation10_spill] sm:$0xff] %v12739_v47  ;;  %9454 = vpow2.f32 %v3691_v3  ;;  %v12745_v53 = vpop.eup %9440  ;;  %v9011_v11 = vpack.c.bf16 %v456_v46, %v455_v23  ;;  %v4044_v3 = vsel %vm2978_vm2, %v12715_v27, 0.0  ;;  %v14585_v23 = vld [vmem:[#allocation99_spill] sm:$0xff] }
 0x2c0   :  { %4036 = vadd.xlane.f32.xlu0 %v4035_v35  ;;  %4060 = vadd.xlane.f32.xlu1 %v4059_v61  ;;  %v12731_v30 = vpop.xlane.xlu0 %3325  ;;  %14583 = vst [vmem:[#allocation25_spill] sm:$0xff] %v12745_v53  ;;  %9456 = vpow2.f32 %v3707_v31  ;;  %v3713_v35 = vmul.f32 1.442695, %v3474_v60  ;;  %v14584_v61 = vld [vmem:[#allocation97_spill] sm:$0xff]  ;;  %v12749_v58 = vpop.eup %9442  ;;  %v3695_v31 = vmul.f32 1.442695, %v3465_v13  ;;  %v3484_v46 = vsub.f32 %v14585_v23, %v12639_v48 }
 0x2c1   :  { %v12743_v17 = vpop.xlane.xlu1 %3349  ;;  %9006 = vmatpush3.bf16.msra.mxu0 %v9003_v54  ;;  %v3476_v32 = vsub.f32 %v14584_v61, %v12633_v34  ;;  %v9027_v54 = vpack.c.bf16 %v464_v8, %v463_v29  ;;  %v12755_v59 = vpop.eup %9444  ;;  %9458 = vpow2.f32 %v3697_v62  ;;  %v14586_v29 = vld [vmem:[#allocation41_spill] sm:$0xff]  ;;  %v466_v62 = vld [vmem:[%s13905_s2 + $0x208] sm:$0xff]  ;;  %v4041_v48 = vsel %vm2978_vm2, %v12739_v47, 0.0 }
 0x2c2   :  { %9022 = vmatpush3.bf16.msra.mxu1 %v9019_v10  ;;  %9008 = vmatprep.subr.bf16.mxu0 %v9007_v40  ;;  %v3711_v10 = vmul.f32 1.442695, %v3473_v37  ;;  %9460 = vpow2.f32 %v3713_v35  ;;  %v465_v13 = vld [vmem:[%s13905_s2 + $0x200] sm:$0xff]  ;;  %v14587_v35 = vld [vmem:[#allocation40_spill] sm:$0xff] }
 0x2c3   :  { %9024 = vmatprep.subr.bf16.mxu1 %v9023_v12  ;;  %v9447_v34 = vpop.eup %9446  ;;  %v3717_v63 = vmul.f32 1.442695, %v3476_v32  ;;  %9462 = vpow2.f32 %v3695_v31  ;;  %v12785_v27 = vpack.c.bf16 %v466_v62, %v465_v13  ;;  %v14590_v31 = vld [vmem:[#allocation100_spill] sm:$0xff] }
 0x2c4   :  { %4045 = vadd.xlane.f32.xlu0 %v4044_v3  ;;  %4069 = vadd.xlane.f32.xlu1 %v4068_v2  ;;  %v12757_v60 = vpop.xlane.xlu0 %3322  ;;  %v9449_v61 = vpop.eup %9448  ;;  %v4294_v8 = vmul.f32 %v9447_v34, %v14586_v29  ;;  %v474_v3 = vld [vmem:[%s13905_s2 + $0x248] sm:$0xff]  ;;  %v14588_v34 = vld [vmem:[#allocation43_spill] sm:$0xff]  ;;  %9464 = vpow2.f32 %v3711_v10  ;;  %v3733_v29 = vmul.f32 1.442695, %v3484_v46 }
 0x2c5   :  { %v12761_v20 = vpop.xlane.xlu1 %3346  ;;  %9010 = vmatpush3.bf16.msra.mxu0 %v9007_v40  ;;  %v4065_v40 = vsel %vm2978_vm2, %v12745_v53, 0.0  ;;  %v4302_v32 = vmul.f32 %v9449_v61, %v14587_v35  ;;  %v14589_v53 = vld [vmem:[#allocation42_spill] sm:$0xff]  ;;  %9466 = vpow2.f32 %v3717_v63 }
 0x2c6   :  { %9026 = vmatpush3.bf16.msra.mxu1 %v9023_v12  ;;  %9012 = vmatprep.subr.bf16.mxu0 %v9011_v11  ;;  %v473_v12 = vld [vmem:[%s13905_s2 + $0x240] sm:$0xff]  ;;  %6486 = vst.msk [vmem:[#allocation2 + $0x118] sm:$0xff] %vm2978_vm2, %v4294_v8 }
 0x2c7   :  { %v9451_v37 = vpop.eup %9450  ;;  %9028 = vmatprep.subr.bf16.mxu1 %v9027_v54  ;;  %6494 = vst.msk [vmem:[#allocation2 + $0x158] sm:$0xff] %vm2978_vm2, %v4302_v32  ;;  %v12791_v10 = vpack.c.bf16 %v474_v3, %v473_v12  ;;  %v14593_v3 = vld [vmem:[#allocation103_spill] sm:$0xff] }
 0x2c8   :  { %v9453_v2 = vpop.eup %9452  ;;  %4042 = vadd.xlane.f32.xlu0 %v4041_v48  ;;  %4066 = vadd.xlane.f32.xlu1 %v4065_v40  ;;  %v4293_v23 = vmul.f32 %v9451_v37, %v14588_v34  ;;  %v3860_v61 = vpop.xlane.xlu0 %3859  ;;  %v3475_v48 = vsub.f32 %v14590_v31, %v12653_v7  ;;  %v4050_v7 = vsel %vm2978_vm2, %v12749_v58, 0.0 }
 0x2c9   :  { %v3884_v35 = vpop.xlane.xlu1 %3883  ;;  %v4301_v47 = vmul.f32 %v9453_v2, %v14589_v53  ;;  %9014 = vmatpush3.bf16.msra.mxu0 %v9011_v11  ;;  %v12793_v46 = vpop.eup %9454  ;;  %v14591_v53 = vld [vmem:[#allocation101_spill] sm:$0xff]  ;;  %9468 = vrcp.f32 %v3860_v61  ;;  %v4074_v11 = vsel %vm2978_vm2, %v12755_v59, 0.0 }
 0x2ca   :  { %8202 = vmatprep.mubr.msk.f32.mxu0 %vm2978_vm2, %v4293_v23  ;;  %6485 = vst.msk [vmem:[#allocation2 + $0x110] sm:$0xff] %vm2978_vm2, %v4293_v23  ;;  %9030 = vmatpush3.bf16.msra.mxu1 %v9027_v54  ;;  %v3483_v37 = vsub.f32 %v14591_v53, %v12655_v6  ;;  %v12804_v63 = vpop.eup %9456  ;;  %9470 = vrcp.f32 %v3884_v35  ;;  %v4047_v62 = vsel %vm2978_vm2, %v12793_v46, 0.0  ;;  %v14597_v53 = vld [vmem:[#allocation106_spill] sm:$0xff] }
 0x2cb   :  { %8203 = vmatmul.mubr.msk.f32.gmra.mrb[82].mxu0 %vm2978_vm2, %v4294_v8  ;;  %8230 = vmatprep.mubr.msk.f32.mxu1 %vm2978_vm2, %v4301_v47  ;;  %6493 = vst.msk [vmem:[#allocation2 + $0x150] sm:$0xff] %vm2978_vm2, %v4301_v47  ;;  %9472 = vpow2.f32 %v3733_v29  ;;  %v3715_v8 = vmul.f32 1.442695, %v3475_v48  ;;  %v14592_v47 = vld [vmem:[#allocation102_spill] sm:$0xff]  ;;  %v12813_v40 = vpop.eup %9458  ;;  %v4071_v2 = vsel %vm2978_vm2, %v12804_v63, 0.0  ;;  %v14595_v29 = vld [vmem:[#allocation105_spill] sm:$0xff] }
 0x2cc   :  { %4051 = vadd.xlane.f32.xlu0 %v4050_v7  ;;  %4075 = vadd.xlane.f32.xlu1 %v4074_v11  ;;  %v3857_v6 = vpop.xlane.xlu0 %3856  ;;  %v3478_v13 = vsub.f32 %v14592_v47, %v12731_v30  ;;  %v3731_v12 = vmul.f32 1.442695, %v3483_v37  ;;  %v12819_v34 = vpop.eup %9460  ;;  %v14594_v30 = vld [vmem:[#allocation104_spill] sm:$0xff]  ;;  %v3485_v61 = vsub.f32 %v14595_v29, %v12761_v20  ;;  %v4056_v7 = vsel %vm2978_vm2, %v12813_v40, 0.0 }
 0x2cd   :  { %8231 = vmatmul.mubr.msk.f32.gmra.mrb[82].mxu1 %vm2978_vm2, %v4302_v32  ;;  %v3881_v54 = vpop.xlane.xlu1 %3880  ;;  %9032 = vmatprep.subr.bf16.mxu0 %v12785_v27  ;;  %9474 = vrcp.f32 %v3857_v6  ;;  %v3486_v32 = vsub.f32 %v14593_v3, %v12743_v17  ;;  %v3477_v23 = vsub.f32 %v14594_v30, %v12757_v60  ;;  %v12825_v48 = vpop.eup %9462  ;;  %v14599_v6 = vld [vmem:[#allocation109_spill] sm:$0xff]  ;;  %v4080_v20 = vsel %vm2978_vm2, %v12819_v34, 0.0 }
 0x2ce   :  { %9048 = vmatprep.subr.bf16.mxu1 %v12791_v10  ;;  %9476 = vrcp.f32 %v3881_v54  ;;  %14596 = vst [vmem:[#allocation62_spill] sm:$0xff] %v12825_v48  ;;  %v3721_v17 = vmul.f32 1.442695, %v3478_v13  ;;  %v12830_v11 = vpop.eup %9464  ;;  %v3735_v13 = vmul.f32 1.442695, %v3485_v61 }
 0x2cf   :  { %9478 = vpow2.f32 %v3715_v8  ;;  %14598 = vst [vmem:[#allocation119_spill] sm:$0xff] %v12830_v11  ;;  %v3737_v60 = vmul.f32 1.442695, %v3486_v32  ;;  %v12835_v47 = vpop.eup %9466  ;;  %v14601_v32 = vld [vmem:[#allocation47_spill] sm:$0xff] }
 0x2d0   :  { %4048 = vadd.xlane.f32.xlu0 %v4047_v62  ;;  %4072 = vadd.xlane.f32.xlu1 %v4071_v2  ;;  %v3332_v35 = vpop.xlane.xlu0 %3331  ;;  %9480 = vpow2.f32 %v3731_v12  ;;  %14600 = vst [vmem:[#allocation28_spill] sm:$0xff] %v12835_v47  ;;  %v3719_v62 = vmul.f32 1.442695, %v3477_v23  ;;  %v4053_v12 = vsel %vm2978_vm2, %v12825_v48, 0.0  ;;  %v4077_v23 = vsel %vm2978_vm2, %v12830_v11, 0.0  ;;  %v14606_v11 = vld [vmem:[#allocation46_spill] sm:$0xff] }
 0x2d1   :  { %v3356_v31 = vpop.xlane.xlu1 %3355  ;;  %v3480_v37 = vsub.f32 %v14597_v53, %v3332_v35  ;;  %9482 = vpow2.f32 %v3721_v17 }
 0x2d2   :  { %v3488_v54 = vsub.f32 %v14599_v6, %v3356_v31  ;;  %9484 = vpow2.f32 %v3737_v60  ;;  %v14605_v60 = vld [vmem:[#allocation110_spill] sm:$0xff] }
 0x2d3   :  { %v9469_v8 = vpop.eup %9468  ;;  %v3725_v29 = vmul.f32 1.442695, %v3480_v37  ;;  %9486 = vpow2.f32 %v3719_v62 }
 0x2d4   :  { %4057 = vadd.xlane.f32.xlu0 %v4056_v7  ;;  %4081 = vadd.xlane.f32.xlu1 %v4080_v20  ;;  %v3329_v3 = vpop.xlane.xlu0 %3328  ;;  %v9471_v30 = vpop.eup %9470  ;;  %v4296_v35 = vmul.f32 %v9469_v8, %v14601_v32  ;;  %v3741_v53 = vmul.f32 1.442695, %v3488_v54  ;;  %v14603_v7 = vld [vmem:[#allocation44_spill] sm:$0xff]  ;;  %9488 = vpow2.f32 %v3735_v13  ;;  %v4086_v13 = vsel %vm2978_vm2, %v12835_v47, 0.0 }
 0x2d5   :  { %v3353_v2 = vpop.xlane.xlu1 %3352  ;;  %v12840_v31 = vpop.eup %9472  ;;  %v4304_v6 = vmul.f32 %v9471_v30, %v14603_v7  ;;  %v14604_v8 = vld [vmem:[#allocation48_spill] sm:$0xff]  ;;  %9490 = vpow2.f32 %v3725_v29  ;;  %v3479_v54 = vsub.f32 %v14605_v60, %v3329_v3  ;;  %v14607_v30 = vld [vmem:[#allocation5_spill] sm:$0xff] }
 0x2d6   :  { %14602 = vst [vmem:[#allocation26_spill] sm:$0xff] %v12840_v31  ;;  %6488 = vst.msk [vmem:[#allocation2 + $0x128] sm:$0xff] %vm2978_vm2, %v4296_v35  ;;  %9492 = vpow2.f32 %v3741_v53  ;;  %v3487_v62 = vsub.f32 %v14607_v30, %v3353_v2 }
 0x2d7   :  { %v9475_v61 = vpop.eup %9474  ;;  %6496 = vst.msk [vmem:[#allocation2 + $0x168] sm:$0xff] %vm2978_vm2, %v4304_v6  ;;  %v3723_v53 = vmul.f32 1.442695, %v3479_v54 }
 0x2d8   :  { %4054 = vadd.xlane.f32.xlu0 %v4053_v12  ;;  %4078 = vadd.xlane.f32.xlu1 %v4077_v23  ;;  %v9477_v17 = vpop.eup %9476  ;;  %v4295_v32 = vmul.f32 %v9475_v61, %v14604_v8 }
 0x2d9   :  { %v3866_v37 = vpop.xlane.xlu0 %3865  ;;  %v3890_v20 = vpop.xlane.xlu1 %3889  ;;  %v4303_v48 = vmul.f32 %v9477_v17, %v14606_v11  ;;  %v4110_v11 = vsel %vm2978_vm2, %v12840_v31, 0.0 }
 0x2da   :  { %8205 = vmatprep.mubr.msk.f32.mxu0 %vm2978_vm2, %v4295_v32  ;;  %6487 = vst.msk [vmem:[#allocation2 + $0x120] sm:$0xff] %vm2978_vm2, %v4295_v32  ;;  %v12853_v12 = vpop.eup %9478  ;;  %9494 = vrcp.f32 %v3866_v37  ;;  %v14614_v32 = vld [vmem:[#allocation6_spill] sm:$0xff] }
 0x2db   :  { %14608 = vst [vmem:[#allocation29_spill] sm:$0xff] %v12853_v12  ;;  %8206 = vmatmul.mubr.msk.f32.gmra.mrb[84].mxu0 %vm2978_vm2, %v4296_v35  ;;  %8233 = vmatprep.mubr.msk.f32.mxu1 %vm2978_vm2, %v4303_v48  ;;  %6495 = vst.msk [vmem:[#allocation2 + $0x160] sm:$0xff] %vm2978_vm2, %v4303_v48  ;;  %v12862_v3 = vpop.eup %9480  ;;  %9496 = vrcp.f32 %v3890_v20  ;;  %v3739_v35 = vmul.f32 1.442695, %v3487_v62  ;;  %v4083_v23 = vsel %vm2978_vm2, %v12853_v12, 0.0 }
 0x2dc   :  { %14609 = vst [vmem:[#allocation27_spill] sm:$0xff] %v12862_v3  ;;  %4087 = vadd.xlane.f32.xlu0 %v4086_v13  ;;  %4111 = vadd.xlane.f32.xlu1 %v4110_v11  ;;  %v12865_v48 = vpop.eup %9482  ;;  %v4107_v7 = vsel %vm2978_vm2, %v12862_v3, 0.0 }
 0x2dd   :  { %v3863_v2 = vpop.xlane.xlu0 %3862  ;;  %v3887_v29 = vpop.xlane.xlu1 %3886  ;;  %8234 = vmatmul.mubr.msk.f32.gmra.mrb[84].mxu1 %vm2978_vm2, %v4304_v6  ;;  %14610 = vst [vmem:[#allocation64_spill] sm:$0xff] %v12865_v48  ;;  %v14613_v6 = vld [vmem:[#allocation112_spill] sm:$0xff]  ;;  %v4092_v13 = vsel %vm2978_vm2, %v12865_v48, 0.0 }
 0x2de   :  { %9498 = vrcp.f32 %v3863_v2  ;;  %v12871_v61 = vpop.eup %9484 }
 0x2df   :  { %9500 = vrcp.f32 %v3887_v29  ;;  %14611 = vst [vmem:[#allocation122_spill] sm:$0xff] %v12871_v61  ;;  %v12873_v20 = vpop.eup %9486  ;;  %v4116_v11 = vsel %vm2978_vm2, %v12871_v61, 0.0  ;;  %v14618_v61 = vld [vmem:[#allocation107_spill] sm:$0xff] }
 0x2e0   :  { %4084 = vadd.xlane.f32.xlu0 %v4083_v23  ;;  %4108 = vadd.xlane.f32.xlu1 %v4107_v7  ;;  %14612 = vst [vmem:[#allocation66_spill] sm:$0xff] %v12873_v20  ;;  %9502 = vpow2.f32 %v3723_v53  ;;  %v12877_v54 = vpop.eup %9488 }
 0x2e1   :  { %v3338_v17 = vpop.xlane.xlu0 %3337  ;;  %v3362_v37 = vpop.xlane.xlu1 %3361  ;;  %14615 = vst [vmem:[#allocation87_spill] sm:$0xff] %v12877_v54  ;;  %9504 = vpow2.f32 %v3739_v35  ;;  %v14617_v35 = vld [vmem:[#allocation7_spill] sm:$0xff]  ;;  %v4113_v48 = vsel %vm2978_vm2, %v12877_v54, 0.0  ;;  %v14621_v54 = vld [vmem:[#allocation54_spill] sm:$0xff] }
 0x2e2   :  { %v3482_v8 = vsub.f32 %v14613_v6, %v3338_v17  ;;  %v3490_v60 = vsub.f32 %v14614_v32, %v3362_v37  ;;  %v12879_v30 = vpop.eup %9490  ;;  %v14616_v17 = vld [vmem:[#allocation15_spill] sm:$0xff] }
 0x2e3   :  { %v12885_v2 = vpop.eup %9492 }
 0x2e4   :  { %v3729_v62 = vmul.f32 1.442695, %v3482_v8  ;;  %v3745_v29 = vmul.f32 1.442695, %v3490_v60  ;;  %4093 = vadd.xlane.f32.xlu0 %v4092_v13  ;;  %4117 = vadd.xlane.f32.xlu1 %v4116_v11  ;;  %v9495_v7 = vpop.eup %9494  ;;  %v4089_v8 = vsel %vm2978_vm2, %v12873_v20, 0.0  ;;  %v14619_v11 = vld [vmem:[#allocation12_spill] sm:$0xff] }
 0x2e5   :  { %v3335_v53 = vpop.xlane.xlu0 %3334  ;;  %v3359_v23 = vpop.xlane.xlu1 %3358  ;;  %v4298_v3 = vmul.f32 %v9495_v7, %v14618_v61 }
 0x2e6   :  { %v3481_v37 = vsub.f32 %v14616_v17, %v3335_v53  ;;  %v3489_v6 = vsub.f32 %v14617_v35, %v3359_v23  ;;  %v9497_v32 = vpop.eup %9496  ;;  %9506 = vpow2.f32 %v3729_v62  ;;  %v14620_v17 = vld [vmem:[#allocation56_spill] sm:$0xff] }
 0x2e7   :  { %v4306_v31 = vmul.f32 %v9497_v32, %v14619_v11  ;;  %9508 = vpow2.f32 %v3745_v29  ;;  %6490 = vst.msk [vmem:[#allocation2 + $0x138] sm:$0xff] %vm2978_vm2, %v4298_v3 }
 0x2e8   :  { %v9499_v12 = vpop.eup %9498  ;;  %v3727_v60 = vmul.f32 1.442695, %v3481_v37  ;;  %v3743_v13 = vmul.f32 1.442695, %v3489_v6  ;;  %4090 = vadd.xlane.f32.xlu0 %v4089_v8  ;;  %4114 = vadd.xlane.f32.xlu1 %v4113_v48 }
 0x2e9   :  { %v9501_v47 = vpop.eup %9500  ;;  %v3896_v53 = vpop.xlane.xlu0 %3895  ;;  %v4297_v35 = vmul.f32 %v9499_v12, %v14620_v17  ;;  %6498 = vst.msk [vmem:[#allocation2 + $0x178] sm:$0xff] %vm2978_vm2, %v4306_v31  ;;  %v4098_v12 = vsel %vm2978_vm2, %v12879_v30, 0.0  ;;  %v14624_v17 = vld [vmem:[#allocation114_spill] sm:$0xff] }
 0x2ea   :  { %v3920_v23 = vpop.xlane.xlu1 %3919  ;;  %9510 = vpow2.f32 %v3727_v60  ;;  %v4305_v20 = vmul.f32 %v9501_v47, %v14621_v54  ;;  %v12901_v61 = vpop.eup %9502  ;;  %v4122_v47 = vsel %vm2978_vm2, %v12885_v2, 0.0 }
 0x2eb   :  { %9512 = vpow2.f32 %v3743_v13  ;;  %8208 = vmatprep.mubr.msk.f32.mxu0 %vm2978_vm2, %v4297_v35  ;;  %6489 = vst.msk [vmem:[#allocation2 + $0x130] sm:$0xff] %vm2978_vm2, %v4297_v35  ;;  %v12910_v48 = vpop.eup %9504 }
 0x2ec   :  { %9514 = vrcp.f32 %v3896_v53  ;;  %8209 = vmatmul.mubr.msk.f32.gmra.mrb[86].mxu0 %vm2978_vm2, %v4298_v3  ;;  %8236 = vmatprep.mubr.msk.f32.mxu1 %vm2978_vm2, %v4305_v20  ;;  %6497 = vst.msk [vmem:[#allocation2 + $0x170] sm:$0xff] %vm2978_vm2, %v4305_v20  ;;  %v4095_v3 = vsel %vm2978_vm2, %v12901_v61, 0.0  ;;  %v4119_v20 = vsel %vm2978_vm2, %v12910_v48, 0.0 }
 0x2ed   :  { %9516 = vrcp.f32 %v3920_v23  ;;  %4099 = vadd.xlane.f32.xlu0 %v4098_v12  ;;  %4123 = vadd.xlane.f32.xlu1 %v4122_v47  ;;  %v3893_v54 = vpop.xlane.xlu0 %3892  ;;  %v467_v12 = vld [vmem:[%s13905_s2 + $0x210] sm:$0xff]  ;;  %v468_v47 = vld [vmem:[%s13905_s2 + $0x218] sm:$0xff] }
 0x2ee   :  { %v3917_v62 = vpop.xlane.xlu1 %3916  ;;  %8237 = vmatmul.mubr.msk.f32.gmra.mrb[86].mxu1 %vm2978_vm2, %v4306_v31  ;;  %9518 = vrcp.f32 %v3893_v54 }
 0x2ef   :  { %9520 = vrcp.f32 %v3917_v62  ;;  %v14625_v62 = vld [vmem:[#allocation14_spill] sm:$0xff] }
 0x2f0   :  { %v12917_v37 = vpop.eup %9506 }
 0x2f1   :  { %4096 = vadd.xlane.f32.xlu0 %v4095_v3  ;;  %4120 = vadd.xlane.f32.xlu1 %v4119_v20  ;;  %v3902_v29 = vpop.xlane.xlu0 %3901  ;;  %v12919_v6 = vpop.eup %9508  ;;  %v475_v20 = vld [vmem:[%s13905_s2 + $0x250] sm:$0xff] }
 0x2f2   :  { %v3926_v7 = vpop.xlane.xlu1 %3925  ;;  %9522 = vrcp.f32 %v3902_v29  ;;  %v476_v29 = vld [vmem:[%s13905_s2 + $0x258] sm:$0xff] }
 0x2f3   :  { %9524 = vrcp.f32 %v3926_v7 }
 0x2f4   :  { %v12921_v32 = vpop.eup %9510 }
 0x2f5   :  { %14622 = vst [vmem:[#allocation90_spill] sm:$0xff] %v12921_v32  ;;  %v12923_v31 = vpop.eup %9512  ;;  %v3899_v8 = vpop.xlane.xlu0 %3898  ;;  %v4101_v13 = vsel %vm2978_vm2, %v12921_v32, 0.0  ;;  %v9051_v32 = vpack.c.bf16 %v476_v29, %v475_v20 }
 0x2f6   :  { %14623 = vst [vmem:[#allocation92_spill] sm:$0xff] %v12923_v31  ;;  %v3923_v60 = vpop.xlane.xlu1 %3922  ;;  %v9515_v11 = vpop.eup %9514  ;;  %9526 = vrcp.f32 %v3899_v8  ;;  %4102 = vadd.xlane.f32.xlu0 %v4101_v13  ;;  %v4125_v53 = vsel %vm2978_vm2, %v12923_v31, 0.0  ;;  %v4104_v13 = vsel %vm2978_vm2, %v12917_v37, 0.0  ;;  %v9035_v31 = vpack.c.bf16 %v468_v47, %v467_v12  ;;  %v477_v12 = vld [vmem:[%s13905_s2 + $0x260] sm:$0xff]  ;;  %v478_v47 = vld [vmem:[%s13905_s2 + $0x268] sm:$0xff] }
 0x2f7   :  { %v9517_v23 = vpop.eup %9516  ;;  %v4308_v35 = vmul.f32 %v9515_v11, %v14624_v17  ;;  %9528 = vrcp.f32 %v3923_v60  ;;  %4126 = vadd.xlane.f32.xlu1 %v4125_v53  ;;  %v14626_v11 = vld [vmem:[#allocation68_spill] sm:$0xff]  ;;  %v14627_v17 = vld [vmem:[#allocation67_spill] sm:$0xff] }
 0x2f8   :  { %v9519_v54 = vpop.eup %9518  ;;  %v4316_v3 = vmul.f32 %v9517_v23, %v14625_v62  ;;  %v4128_v23 = vsel %vm2978_vm2, %v12919_v6, 0.0 }
 0x2f9   :  { %v9521_v7 = vpop.eup %9520  ;;  %6500 = vst.msk [vmem:[#allocation2 + $0x188] sm:$0xff] %vm2978_vm2, %v4308_v35  ;;  %v3908_v8 = vpop.xlane.xlu0 %3907  ;;  %v4307_v53 = vmul.f32 %v9519_v54, %v14626_v11  ;;  %v469_v54 = vld [vmem:[%s13905_s2 + $0x220] sm:$0xff] }
 0x2fa   :  { %v3932_v60 = vpop.xlane.xlu1 %3931  ;;  %6508 = vst.msk [vmem:[#allocation2 + $0x1c8] sm:$0xff] %vm2978_vm2, %v4316_v3  ;;  %9530 = vrcp.f32 %v3908_v8  ;;  %4105 = vadd.xlane.f32.xlu0 %v4104_v13  ;;  %v4315_v62 = vmul.f32 %v9521_v7, %v14627_v17  ;;  %v470_v8 = vld [vmem:[%s13905_s2 + $0x228] sm:$0xff]  ;;  %v9055_v17 = vpack.c.bf16 %v478_v47, %v477_v12 }
 0x2fb   :  { %9532 = vrcp.f32 %v3932_v60  ;;  %4129 = vadd.xlane.f32.xlu1 %v4128_v23  ;;  %8255 = vmatprep.mubr.msk.f32.mxu0 %vm2978_vm2, %v4307_v53  ;;  %6499 = vst.msk [vmem:[#allocation2 + $0x180] sm:$0xff] %vm2978_vm2, %v4307_v53  ;;  %v14628_v60 = vld [vmem:[#allocation117_spill] sm:$0xff]  ;;  %v9039_v23 = vpack.c.bf16 %v470_v8, %v469_v54  ;;  %v480_v54 = vld [vmem:[%s13905_s2 + $0x278] sm:$0xff] }
 0x2fc   :  { %v9523_v13 = vpop.eup %9522  ;;  %8256 = vmatmul.mubr.msk.f32.vlgmr.msra.gmra.mrb[88].mxu0 %vm2978_vm2, %v4308_v35  ;;  %8283 = vmatprep.mubr.msk.f32.mxu1 %vm2978_vm2, %v4315_v62  ;;  %6507 = vst.msk [vmem:[#allocation2 + $0x1c0] sm:$0xff] %vm2978_vm2, %v4315_v62  ;;  %v14629_v35 = vld [vmem:[#allocation69_spill] sm:$0xff] }
 0x2fd   :  { %v9525_v20 = vpop.eup %9524  ;;  %8284 = vmatmul.mubr.msk.f32.vlgmr.msra.gmra.mrb[88].mxu1 %vm2978_vm2, %v4316_v3  ;;  %v3905_v29 = vpop.xlane.xlu0 %3904  ;;  %v4310_v11 = vmul.f32 %v9523_v13, %v14628_v60  ;;  %9034 = vmatpush3.bf16.msra.mxu0 %v12785_v27  ;;  %v471_v3 = vld [vmem:[%s13905_s2 + $0x230] sm:$0xff]  ;;  %v472_v27 = vld [vmem:[%s13905_s2 + $0x238] sm:$0xff]  ;;  %v481_v60 = vld [vmem:[%s13905_s2 + $0x280] sm:$0xff] }
 0x2fe   :  { %v3929_v7 = vpop.xlane.xlu1 %3928  ;;  %9534 = vrcp.f32 %v3905_v29  ;;  %v4318_v53 = vmul.f32 %v9525_v20, %v14629_v35  ;;  %9050 = vmatpush3.bf16.msra.mxu1 %v12791_v10  ;;  %9036 = vmatprep.subr.bf16.mxu0 %v9035_v31  ;;  %v479_v10 = vld [vmem:[%s13905_s2 + $0x270] sm:$0xff]  ;;  %v9043_v29 = vpack.c.bf16 %v472_v27, %v471_v3 }
 0x2ff   :  { %9536 = vrcp.f32 %v3929_v7  ;;  %6502 = vst.msk [vmem:[#allocation2 + $0x198] sm:$0xff] %vm2978_vm2, %v4310_v11  ;;  %9052 = vmatprep.subr.bf16.mxu1 %v9051_v32  ;;  %v9059_v7 = vpack.c.bf16 %v480_v54, %v479_v10 }
 0x300   :  { %v9527_v62 = vpop.eup %9526  ;;  %6510 = vst.msk [vmem:[#allocation2 + $0x1d8] sm:$0xff] %vm2978_vm2, %v4318_v53 }
 0x301   :  { %v9529_v8 = vpop.eup %9528  ;;  %v3914_v13 = vpop.xlane.xlu0 %3913  ;;  %v4309_v47 = vmul.f32 %v9527_v62, %v12196_v18  ;;  %9038 = vmatpush3.bf16.msra.mxu0 %v9035_v31  ;;  %v482_v18 = vld [vmem:[%s13905_s2 + $0x288] sm:$0xff] }
 0x302   :  { %v3938_v12 = vpop.xlane.xlu1 %3937  ;;  %9538 = vrcp.f32 %v3914_v13  ;;  %v4317_v20 = vmul.f32 %v9529_v8, %v12187_v42  ;;  %9054 = vmatpush3.bf16.msra.mxu1 %v9051_v32  ;;  %9040 = vmatprep.subr.bf16.mxu0 %v9039_v23  ;;  %v489_v42 = vld [vmem:[%s13905_s2 + $0x2c0] sm:$0xff]  ;;  %v490_v32 = vld [vmem:[%s13905_s2 + $0x2c8] sm:$0xff]  ;;  %v13009_v10 = vpack.c.bf16 %v482_v18, %v481_v60 }
 0x303   :  { %9540 = vrcp.f32 %v3938_v12  ;;  %8258 = vmatprep.mubr.msk.f32.mxu0 %vm2978_vm2, %v4309_v47  ;;  %6501 = vst.msk [vmem:[#allocation2 + $0x190] sm:$0xff] %vm2978_vm2, %v4309_v47  ;;  %9056 = vmatprep.subr.bf16.mxu1 %v9055_v17  ;;  %v13012_v54 = vpack.c.bf16 %v490_v32, %v489_v42  ;;  %v14632_v60 = vld [vmem:[#allocation21_spill] sm:$0xff]  ;;  %v14633_v42 = vld [vmem:[#allocation59_spill] sm:$0xff] }
 0x304   :  { %v9531_v31 = vpop.eup %9530  ;;  %8259 = vmatmul.mubr.msk.f32.gmra.mrb[90].mxu0 %vm2978_vm2, %v4310_v11  ;;  %8286 = vmatprep.mubr.msk.f32.mxu1 %vm2978_vm2, %v4317_v20  ;;  %6509 = vst.msk [vmem:[#allocation2 + $0x1d0] sm:$0xff] %vm2978_vm2, %v4317_v20 }
 0x305   :  { %v9533_v35 = vpop.eup %9532  ;;  %8287 = vmatmul.mubr.msk.f32.gmra.mrb[90].mxu1 %vm2978_vm2, %v4318_v53  ;;  %v3911_v3 = vpop.xlane.xlu0 %3910  ;;  %v4312_v62 = vmul.f32 %v9531_v31, %v12212_v25  ;;  %9042 = vmatpush3.bf16.msra.mxu0 %v9039_v23  ;;  %v14630_v23 = vld [vmem:[#allocation16_spill] sm:$0xff] }
 0x306   :  { %v3935_v27 = vpop.xlane.xlu1 %3934  ;;  %9542 = vrcp.f32 %v3911_v3  ;;  %v4320_v11 = vmul.f32 %v9533_v35, %v12203_v38  ;;  %9058 = vmatpush3.bf16.msra.mxu1 %v9055_v17  ;;  %9044 = vmatprep.subr.bf16.mxu0 %v9043_v29  ;;  %v14631_v38 = vld [vmem:[#allocation58_spill] sm:$0xff] }
 0x307   :  { %9544 = vrcp.f32 %v3935_v27  ;;  %6504 = vst.msk [vmem:[#allocation2 + $0x1a8] sm:$0xff] %vm2978_vm2, %v4312_v62  ;;  %9060 = vmatprep.subr.bf16.mxu1 %v9059_v7 }
 0x308   :  { %v9535_v8 = vpop.eup %9534  ;;  %6512 = vst.msk [vmem:[#allocation2 + $0x1e8] sm:$0xff] %vm2978_vm2, %v4320_v11 }
 0x309   :  { %v9537_v53 = vpop.eup %9536  ;;  %v3944_v13 = vpop.xlane.xlu0 %3943  ;;  %v4311_v12 = vmul.f32 %v9535_v8, %v14630_v23  ;;  %9046 = vmatpush3.bf16.msra.mxu0 %v9043_v29 }
 0x30a   :  { %v3968_v25 = vpop.xlane.xlu1 %3967  ;;  %9546 = vrcp.f32 %v3944_v13  ;;  %v4319_v17 = vmul.f32 %v9537_v53, %v14631_v38  ;;  %9062 = vmatpush3.bf16.msra.mxu1 %v9059_v7  ;;  %9064 = vmatprep.subr.bf16.mxu0 %v13009_v10 }
 0x30b   :  { %9548 = vrcp.f32 %v3968_v25  ;;  %8261 = vmatprep.mubr.msk.f32.mxu0 %vm2978_vm2, %v4311_v12  ;;  %6503 = vst.msk [vmem:[#allocation2 + $0x1a0] sm:$0xff] %vm2978_vm2, %v4311_v12  ;;  %9080 = vmatprep.subr.bf16.mxu1 %v13012_v54 }
 0x30c   :  { %v9539_v47 = vpop.eup %9538  ;;  %8262 = vmatmul.mubr.msk.f32.gmra.mrb[92].mxu0 %vm2978_vm2, %v4312_v62  ;;  %8289 = vmatprep.mubr.msk.f32.mxu1 %vm2978_vm2, %v4319_v17  ;;  %6511 = vst.msk [vmem:[#allocation2 + $0x1e0] sm:$0xff] %vm2978_vm2, %v4319_v17 }
 0x30d   :  { %v9541_v20 = vpop.eup %9540  ;;  %8290 = vmatmul.mubr.msk.f32.gmra.mrb[92].mxu1 %vm2978_vm2, %v4320_v11  ;;  %v3941_v29 = vpop.xlane.xlu0 %3940  ;;  %v4314_v18 = vmul.f32 %v9539_v47, %v14632_v60  ;;  %v483_v47 = vld [vmem:[%s13905_s2 + $0x290] sm:$0xff] }
 0x30e   :  { %v3965_v7 = vpop.xlane.xlu1 %3964  ;;  %9550 = vrcp.f32 %v3941_v29  ;;  %v8089_v31 = vpop.f32.mrb[64].mxu0  ;;  %v4322_v32 = vmul.f32 %v9541_v20, %v14633_v42  ;;  %v484_v20 = vld [vmem:[%s13905_s2 + $0x298] sm:$0xff] }
 0x30f   :  { %9552 = vrcp.f32 %v3965_v7  ;;  %6580 = vst.msk [vmem:[%s13906_s3 + $0x8] sm:$0xff] %vm529_vm0, %v8089_v31  ;;  %v4477_v35 = vpop.f32.mrb[65].mxu0  ;;  %v8117_v27 = vpop.f32.mrb[64].mxu1 }
 0x310   :  { %6506 = vst.msk [vmem:[#allocation2 + $0x1b8] sm:$0xff] %vm2978_vm2, %v4314_v18  ;;  %v9543_v3 = vpop.eup %9542  ;;  %6514 = vst.msk [vmem:[#allocation2 + $0x1f8] sm:$0xff] %vm2978_vm2, %v4322_v32  ;;  %v4606_v11 = vpop.f32.mrb[65].mxu1 }
 0x311   :  { %6579 = vst.msk [vmem:[%s13906_s3] sm:$0xff] %vm529_vm0, %v4477_v35  ;;  %v9545_v62 = vpop.eup %9544  ;;  %6588 = vst.msk [vmem:[%s13906_s3 + $0x48] sm:$0xff] %vm529_vm0, %v8117_v27  ;;  %v3950_v8 = vpop.xlane.xlu0 %3949  ;;  %v4313_v53 = vmul.f32 %v9543_v3, %v12278_v56  ;;  %v485_v3 = vld [vmem:[%s13905_s2 + $0x2a0] sm:$0xff]  ;;  %v486_v27 = vld [vmem:[%s13905_s2 + $0x2a8] sm:$0xff] }
 0x312   :  { %6587 = vst.msk [vmem:[%s13906_s3 + $0x40] sm:$0xff] %vm529_vm0, %v4606_v11  ;;  %9554 = vrcp.f32 %v3950_v8  ;;  %v3974_v13 = vpop.xlane.xlu1 %3973  ;;  %v4321_v25 = vmul.f32 %v9545_v62, %v12271_v15  ;;  %v494_v62 = vld [vmem:[%s13905_s2 + $0x2e8] sm:$0xff] }
 0x313   :  { %9556 = vrcp.f32 %v3974_v13  ;;  %8264 = vmatprep.mubr.msk.f32.mxu0 %vm2978_vm2, %v4313_v53  ;;  %6505 = vst.msk [vmem:[#allocation2 + $0x1b0] sm:$0xff] %vm2978_vm2, %v4313_v53 }
 0x314   :  { %v9547_v23 = vpop.eup %9546  ;;  %8265 = vmatmul.mubr.msk.f32.gmra.mrb[94].mxu0 %vm2978_vm2, %v4314_v18  ;;  %8292 = vmatprep.mubr.msk.f32.mxu1 %vm2978_vm2, %v4321_v25  ;;  %6513 = vst.msk [vmem:[#allocation2 + $0x1f0] sm:$0xff] %vm2978_vm2, %v4321_v25 }
 0x315   :  { %v9549_v56 = vpop.eup %9548  ;;  %v4324_v12 = vmul.f32 %v9547_v23, %v12292_v14  ;;  %8293 = vmatmul.mubr.msk.f32.gmra.mrb[94].mxu1 %vm2978_vm2, %v4322_v32  ;;  %v3947_v38 = vpop.xlane.xlu0 %3946  ;;  %v492_v14 = vld [vmem:[%s13905_s2 + $0x2d8] sm:$0xff]  ;;  %v9067_v32 = vpack.c.bf16 %v484_v20, %v483_v47 }
 0x316   :  { %v4332_v15 = vmul.f32 %v9549_v56, %v12283_v57  ;;  %9558 = vrcp.f32 %v3947_v38  ;;  %v3971_v17 = vpop.xlane.xlu1 %3970  ;;  %v491_v57 = vld [vmem:[%s13905_s2 + $0x2d0] sm:$0xff]  ;;  %v9071_v56 = vpack.c.bf16 %v486_v27, %v485_v3 }
 0x317   :  { %6516 = vst.msk [vmem:[#allocation2 + $0x208] sm:$0xff] %vm2978_vm2, %v4324_v12  ;;  %9560 = vrcp.f32 %v3971_v17  ;;  %v9083_v35 = vpack.c.bf16 %v492_v14, %v491_v57  ;;  %v496_v17 = vld [vmem:[%s13905_s2 + $0x2f8] sm:$0xff] }
 0x318   :  { %v9551_v29 = vpop.eup %9550  ;;  %6524 = vst.msk [vmem:[#allocation2 + $0x248] sm:$0xff] %vm2978_vm2, %v4332_v15 }
 0x319   :  { %v9553_v7 = vpop.eup %9552  ;;  %v3956_v60 = vpop.xlane.xlu0 %3955  ;;  %v4323_v18 = vmul.f32 %v9551_v29, %v12346_v45 }
 0x31a   :  { %9562 = vrcp.f32 %v3956_v60  ;;  %v3980_v31 = vpop.xlane.xlu1 %3979  ;;  %v4331_v42 = vmul.f32 %v9553_v7, %v12331_v9  ;;  %v493_v9 = vld [vmem:[%s13905_s2 + $0x2e0] sm:$0xff] }
 0x31b   :  { %9564 = vrcp.f32 %v3980_v31  ;;  %8311 = vmatprep.mubr.msk.f32.mxu0 %vm2978_vm2, %v4323_v18  ;;  %6515 = vst.msk [vmem:[#allocation2 + $0x200] sm:$0xff] %vm2978_vm2, %v4323_v18  ;;  %v497_v18 = vld [vmem:[%s13905_s2 + $0x300] sm:$0xff]  ;;  %v498_v31 = vld [vmem:[%s13905_s2 + $0x308] sm:$0xff] }
 0x31c   :  { %v9555_v45 = vpop.eup %9554  ;;  %8312 = vmatmul.mubr.msk.f32.vlgmr.msra.gmra.mrb[96].mxu0 %vm2978_vm2, %v4324_v12  ;;  %8339 = vmatprep.mubr.msk.f32.mxu1 %vm2978_vm2, %v4331_v42  ;;  %6523 = vst.msk [vmem:[#allocation2 + $0x240] sm:$0xff] %vm2978_vm2, %v4331_v42 }
 0x31d   :  { %v9557_v11 = vpop.eup %9556  ;;  %8340 = vmatmul.mubr.msk.f32.vlgmr.msra.gmra.mrb[96].mxu1 %vm2978_vm2, %v4332_v15  ;;  %v3953_v8 = vpop.xlane.xlu0 %3952  ;;  %v4326_v53 = vmul.f32 %v9555_v45, %v12375_v49  ;;  %9066 = vmatpush3.bf16.msra.mxu0 %v13009_v10  ;;  %v9087_v49 = vpack.c.bf16 %v494_v62, %v493_v9  ;;  %v487_v10 = vld [vmem:[%s13905_s2 + $0x2b0] sm:$0xff]  ;;  %v13145_v62 = vpack.c.bf16 %v498_v31, %v497_v18 }
 0x31e   :  { %9566 = vrcp.f32 %v3953_v8  ;;  %v3977_v13 = vpop.xlane.xlu1 %3976  ;;  %v8092_v25 = vpop.f32.mrb[66].mxu0  ;;  %v4334_v23 = vmul.f32 %v9557_v11, %v12363_v43  ;;  %9082 = vmatpush3.bf16.msra.mxu1 %v13012_v54  ;;  %9068 = vmatprep.subr.bf16.mxu0 %v9067_v32  ;;  %v488_v43 = vld [vmem:[%s13905_s2 + $0x2b8] sm:$0xff]  ;;  %v495_v15 = vld [vmem:[%s13905_s2 + $0x2f0] sm:$0xff] }
 0x31f   :  { %9568 = vrcp.f32 %v3977_v13  ;;  %6582 = vst.msk [vmem:[%s13906_s3 + $0x18] sm:$0xff] %vm529_vm0, %v8092_v25  ;;  %v4487_v12 = vpop.f32.mrb[67].mxu0  ;;  %9084 = vmatprep.subr.bf16.mxu1 %v9083_v35  ;;  %v9075_v60 = vpack.c.bf16 %v488_v43, %v487_v10  ;;  %v14635_v43 = vld [vmem:[#allocation19_spill] sm:$0xff] }
 0x320   :  { %6518 = vst.msk [vmem:[#allocation2 + $0x218] sm:$0xff] %vm2978_vm2, %v4326_v53  ;;  %v9559_v54 = vpop.eup %9558  ;;  %v8120_v38 = vpop.f32.mrb[66].mxu1  ;;  %6526 = vst.msk [vmem:[#allocation2 + $0x258] sm:$0xff] %vm2978_vm2, %v4334_v23 }
 0x321   :  { %6581 = vst.msk [vmem:[%s13906_s3 + $0x10] sm:$0xff] %vm529_vm0, %v4487_v12  ;;  %v9561_v47 = vpop.eup %9560  ;;  %6590 = vst.msk [vmem:[%s13906_s3 + $0x58] sm:$0xff] %vm529_vm0, %v8120_v38  ;;  %v4616_v20 = vpop.f32.mrb[67].mxu1  ;;  %v4325_v57 = vmul.f32 %v9559_v54, %v12392_v44  ;;  %9070 = vmatpush3.bf16.msra.mxu0 %v9067_v32  ;;  %v9091_v44 = vpack.c.bf16 %v496_v17, %v495_v15  ;;  %v506_v32 = vld [vmem:[%s13905_s2 + $0x348] sm:$0xff] }
 0x322   :  { %v3962_v29 = vpop.xlane.xlu0 %3961  ;;  %6589 = vst.msk [vmem:[%s13906_s3 + $0x50] sm:$0xff] %vm529_vm0, %v4616_v20  ;;  %v3986_v14 = vpop.xlane.xlu1 %3985  ;;  %v4333_v7 = vmul.f32 %v9561_v47, %v12385_v33  ;;  %9086 = vmatpush3.bf16.msra.mxu1 %v9083_v35  ;;  %9072 = vmatprep.subr.bf16.mxu0 %v9071_v56  ;;  %v505_v33 = vld [vmem:[%s13905_s2 + $0x340] sm:$0xff] }
 0x323   :  { %9570 = vrcp.f32 %v3962_v29  ;;  %8314 = vmatprep.mubr.msk.f32.mxu0 %vm2978_vm2, %v4325_v57  ;;  %6517 = vst.msk [vmem:[#allocation2 + $0x210] sm:$0xff] %vm2978_vm2, %v4325_v57  ;;  %9088 = vmatprep.subr.bf16.mxu1 %v9087_v49  ;;  %v13148_v11 = vpack.c.bf16 %v506_v32, %v505_v33  ;;  %v500_v33 = vld [vmem:[%s13905_s2 + $0x318] sm:$0xff] }
 0x324   :  { %9572 = vrcp.f32 %v3986_v14  ;;  %v9563_v42 = vpop.eup %9562  ;;  %8315 = vmatmul.mubr.msk.f32.gmra.mrb[98].mxu0 %vm2978_vm2, %v4326_v53  ;;  %8342 = vmatprep.mubr.msk.f32.mxu1 %vm2978_vm2, %v4333_v7  ;;  %6525 = vst.msk [vmem:[#allocation2 + $0x250] sm:$0xff] %vm2978_vm2, %v4333_v7 }
 0x325   :  { %v9565_v35 = vpop.eup %9564  ;;  %8343 = vmatmul.mubr.msk.f32.gmra.mrb[98].mxu1 %vm2978_vm2, %v4334_v23  ;;  %v4328_v27 = vmul.f32 %v9563_v42, %v12406_v41  ;;  %9074 = vmatpush3.bf16.msra.mxu0 %v9071_v56  ;;  %v14634_v56 = vld [vmem:[#allocation20_spill] sm:$0xff]  ;;  %v499_v42 = vld [vmem:[%s13905_s2 + $0x310] sm:$0xff] }
 0x326   :  { %v3959_v3 = vpop.xlane.xlu0 %3958  ;;  %v3983_v45 = vpop.xlane.xlu1 %3982  ;;  %v4336_v9 = vmul.f32 %v9565_v35, %v12397_v24  ;;  %9090 = vmatpush3.bf16.msra.mxu1 %v9087_v49  ;;  %9076 = vmatprep.subr.bf16.mxu0 %v9075_v60 }
 0x327   :  { %9574 = vrcp.f32 %v3959_v3  ;;  %6520 = vst.msk [vmem:[#allocation2 + $0x228] sm:$0xff] %vm2978_vm2, %v4328_v27  ;;  %9092 = vmatprep.subr.bf16.mxu1 %v9091_v44 }
 0x328   :  { %9576 = vrcp.f32 %v3983_v45  ;;  %v9567_v8 = vpop.eup %9566  ;;  %6528 = vst.msk [vmem:[#allocation2 + $0x268] sm:$0xff] %vm2978_vm2, %v4336_v9 }
 0x329   :  { %v9569_v53 = vpop.eup %9568  ;;  %v4327_v13 = vmul.f32 %v9567_v8, %v12458_v26  ;;  %9078 = vmatpush3.bf16.msra.mxu0 %v9075_v60  ;;  %v9099_v8 = vpack.c.bf16 %v500_v33, %v499_v42 }
 0x32a   :  { %v3992_v41 = vpop.xlane.xlu0 %3991  ;;  %v4016_v24 = vpop.xlane.xlu1 %4015  ;;  %v4335_v25 = vmul.f32 %v9569_v53, %v12449_v1  ;;  %9094 = vmatpush3.bf16.msra.mxu1 %v9091_v44  ;;  %9096 = vmatprep.subr.bf16.mxu0 %v13145_v62 }
 0x32b   :  { %9578 = vrcp.f32 %v3992_v41  ;;  %8317 = vmatprep.mubr.msk.f32.mxu0 %vm2978_vm2, %v4327_v13  ;;  %6519 = vst.msk [vmem:[#allocation2 + $0x220] sm:$0xff] %vm2978_vm2, %v4327_v13  ;;  %9112 = vmatprep.subr.bf16.mxu1 %v13148_v11  ;;  %v501_v41 = vld [vmem:[%s13905_s2 + $0x320] sm:$0xff]  ;;  %v502_v13 = vld [vmem:[%s13905_s2 + $0x328] sm:$0xff] }
 0x32c   :  { %9580 = vrcp.f32 %v4016_v24  ;;  %8318 = vmatmul.mubr.msk.f32.gmra.mrb[100].mxu0 %vm2978_vm2, %v4328_v27  ;;  %8345 = vmatprep.mubr.msk.f32.mxu1 %vm2978_vm2, %v4335_v25  ;;  %6527 = vst.msk [vmem:[#allocation2 + $0x260] sm:$0xff] %vm2978_vm2, %v4335_v25  ;;  %v510_v24 = vld [vmem:[%s13905_s2 + $0x368] sm:$0xff] }
 0x32d   :  { %v9571_v23 = vpop.eup %9570  ;;  %8346 = vmatmul.mubr.msk.f32.gmra.mrb[100].mxu1 %vm2978_vm2, %v4336_v9 }
 0x32e   :  { %v9573_v26 = vpop.eup %9572  ;;  %v3989_v1 = vpop.xlane.xlu0 %3988  ;;  %v4330_v12 = vmul.f32 %v9571_v23, %v14634_v56 }
 0x32f   :  { %9582 = vrcp.f32 %v3989_v1  ;;  %v4013_v49 = vpop.xlane.xlu1 %4012  ;;  %v8095_v10 = vpop.f32.mrb[68].mxu0  ;;  %v4338_v54 = vmul.f32 %v9573_v26, %v14635_v43 }
 0x330   :  { %9584 = vrcp.f32 %v4013_v49  ;;  %6584 = vst.msk [vmem:[%s13906_s3 + $0x28] sm:$0xff] %vm529_vm0, %v8095_v10  ;;  %v4497_v38 = vpop.f32.mrb[69].mxu0  ;;  %v8123_v17 = vpop.f32.mrb[68].mxu1  ;;  %v9103_v49 = vpack.c.bf16 %v502_v13, %v501_v41  ;;  %v14638_v13 = vld [vmem:[#allocation118_spill] sm:$0xff] }
 0x331   :  { %6522 = vst.msk [vmem:[#allocation2 + $0x238] sm:$0xff] %vm2978_vm2, %v4330_v12  ;;  %v9575_v15 = vpop.eup %9574  ;;  %6530 = vst.msk [vmem:[#allocation2 + $0x278] sm:$0xff] %vm2978_vm2, %v4338_v54  ;;  %v4626_v20 = vpop.f32.mrb[69].mxu1 }
 0x332   :  { %6583 = vst.msk [vmem:[%s13906_s3 + $0x20] sm:$0xff] %vm529_vm0, %v4497_v38  ;;  %v9577_v47 = vpop.eup %9576  ;;  %6592 = vst.msk [vmem:[%s13906_s3 + $0x68] sm:$0xff] %vm529_vm0, %v8123_v17  ;;  %v3998_v29 = vpop.xlane.xlu0 %3997  ;;  %v4329_v57 = vmul.f32 %v9575_v15, %v12486_v51  ;;  %v512_v38 = vld [vmem:[%s13905_s2 + $0x378] sm:$0xff] }
 0x333   :  { %6591 = vst.msk [vmem:[%s13906_s3 + $0x60] sm:$0xff] %vm529_vm0, %v4626_v20  ;;  %9586 = vrcp.f32 %v3998_v29  ;;  %v4022_v14 = vpop.xlane.xlu1 %4021  ;;  %v4337_v7 = vmul.f32 %v9577_v47, %v12479_v39  ;;  %v14636_v20 = vld [vmem:[#allocation18_spill] sm:$0xff] }
 0x334   :  { %9588 = vrcp.f32 %v4022_v14  ;;  %8320 = vmatprep.mubr.msk.f32.mxu0 %vm2978_vm2, %v4329_v57  ;;  %6521 = vst.msk [vmem:[#allocation2 + $0x230] sm:$0xff] %vm2978_vm2, %v4329_v57 }
 0x335   :  { %v9579_v60 = vpop.eup %9578  ;;  %8321 = vmatmul.mubr.msk.f32.gmra.mrb[102].mxu0 %vm2978_vm2, %v4330_v12  ;;  %8348 = vmatprep.mubr.msk.f32.mxu1 %vm2978_vm2, %v4337_v7  ;;  %6529 = vst.msk [vmem:[#allocation2 + $0x270] sm:$0xff] %vm2978_vm2, %v4337_v7 }
 0x336   :  { %v9581_v51 = vpop.eup %9580  ;;  %v4340_v44 = vmul.f32 %v9579_v60, %v12491_v16  ;;  %8349 = vmatmul.mubr.msk.f32.gmra.mrb[102].mxu1 %vm2978_vm2, %v4338_v54  ;;  %v3995_v18 = vpop.xlane.xlu0 %3994  ;;  %v507_v16 = vld [vmem:[%s13905_s2 + $0x350] sm:$0xff] }
 0x337   :  { %v4348_v39 = vmul.f32 %v9581_v51, %v12500_v4  ;;  %9590 = vrcp.f32 %v3995_v18  ;;  %v4019_v31 = vpop.xlane.xlu1 %4018  ;;  %v508_v4 = vld [vmem:[%s13905_s2 + $0x358] sm:$0xff]  ;;  %v511_v54 = vld [vmem:[%s13905_s2 + $0x370] sm:$0xff]  ;;  %v513_v51 = vld [vmem:[%s13905_s2 + $0x380] sm:$0xff] }
 0x338   :  { %6532 = vst.msk [vmem:[#allocation2 + $0x288] sm:$0xff] %vm2978_vm2, %v4340_v44  ;;  %9592 = vrcp.f32 %v4019_v31  ;;  %v9115_v53 = vpack.c.bf16 %v508_v4, %v507_v16  ;;  %v9123_v60 = vpack.c.bf16 %v512_v38, %v511_v54 }
 0x339   :  { %v9583_v32 = vpop.eup %9582  ;;  %6540 = vst.msk [vmem:[#allocation2 + $0x2c8] sm:$0xff] %vm2978_vm2, %v4348_v39 }
 0x33a   :  { %v9585_v35 = vpop.eup %9584  ;;  %v4004_v3 = vpop.xlane.xlu0 %4003  ;;  %v4339_v27 = vmul.f32 %v9583_v32, %v12527_v36 }
 0x33b   :  { %9594 = vrcp.f32 %v4004_v3  ;;  %v4028_v45 = vpop.xlane.xlu1 %4027  ;;  %v4347_v9 = vmul.f32 %v9585_v35, %v12536_v22  ;;  %v509_v22 = vld [vmem:[%s13905_s2 + $0x360] sm:$0xff] }
 0x33c   :  { %9596 = vrcp.f32 %v4028_v45  ;;  %8367 = vmatprep.mubr.msk.f32.mxu0 %vm2978_vm2, %v4339_v27  ;;  %6531 = vst.msk [vmem:[#allocation2 + $0x280] sm:$0xff] %vm2978_vm2, %v4339_v27 }
 0x33d   :  { %v9587_v36 = vpop.eup %9586  ;;  %8368 = vmatmul.mubr.msk.f32.vlgmr.msra.gmra.mrb[104].mxu0 %vm2978_vm2, %v4340_v44  ;;  %8395 = vmatprep.mubr.msk.f32.mxu1 %vm2978_vm2, %v4347_v9  ;;  %6539 = vst.msk [vmem:[#allocation2 + $0x2c0] sm:$0xff] %vm2978_vm2, %v4347_v9  ;;  %v514_v44 = vld [vmem:[%s13905_s2 + $0x388] sm:$0xff]  ;;  %v14637_v9 = vld [vmem:[#allocation60_spill] sm:$0xff] }
 0x33e   :  { %v9589_v25 = vpop.eup %9588  ;;  %8396 = vmatmul.mubr.msk.f32.vlgmr.msra.gmra.mrb[104].mxu1 %vm2978_vm2, %v4348_v39  ;;  %v4001_v23 = vpop.xlane.xlu0 %4000  ;;  %v4342_v26 = vmul.f32 %v9587_v36, %v12545_v55  ;;  %9098 = vmatpush3.bf16.msra.mxu0 %v13145_v62  ;;  %v9119_v55 = vpack.c.bf16 %v510_v24, %v509_v22  ;;  %v503_v62 = vld [vmem:[%s13905_s2 + $0x330] sm:$0xff]  ;;  %v522_v39 = vld [vmem:[%s13905_s2 + $0x3c8] sm:$0xff]  ;;  %v13281_v4 = vpack.c.bf16 %v514_v44, %v513_v51  ;;  %v14642_v51 = vld [vmem:[#allocation73_spill] sm:$0xff] }
 0x33f   :  { %9598 = vrcp.f32 %v4001_v23  ;;  %v4025_v1 = vpop.xlane.xlu1 %4024  ;;  %v8098_v56 = vpop.f32.mrb[70].mxu0  ;;  %v4350_v12 = vmul.f32 %v9589_v25, %v12551_v5  ;;  %9114 = vmatpush3.bf16.msra.mxu1 %v13148_v11  ;;  %9100 = vmatprep.subr.bf16.mxu0 %v9099_v8  ;;  %v504_v5 = vld [vmem:[%s13905_s2 + $0x338] sm:$0xff]  ;;  %v14639_v25 = vld [vmem:[#allocation61_spill] sm:$0xff] }
 0x340   :  { %9600 = vrcp.f32 %v4025_v1  ;;  %6586 = vst.msk [vmem:[%s13906_s3 + $0x38] sm:$0xff] %vm529_vm0, %v8098_v56  ;;  %v4507_v10 = vpop.f32.mrb[71].mxu0  ;;  %9116 = vmatprep.subr.bf16.mxu1 %v9115_v53  ;;  %v8126_v43 = vpop.f32.mrb[70].mxu1  ;;  %v9107_v7 = vpack.c.bf16 %v504_v5, %v503_v62 }
 0x341   :  { %6534 = vst.msk [vmem:[#allocation2 + $0x298] sm:$0xff] %vm2978_vm2, %v4342_v26  ;;  %v9591_v11 = vpop.eup %9590  ;;  %6542 = vst.msk [vmem:[#allocation2 + $0x2d8] sm:$0xff] %vm2978_vm2, %v4350_v12  ;;  %v4636_v17 = vpop.f32.mrb[71].mxu1 }
 0x342   :  { %6585 = vst.msk [vmem:[%s13906_s3 + $0x30] sm:$0xff] %vm529_vm0, %v4507_v10  ;;  %v9593_v15 = vpop.eup %9592  ;;  %6594 = vst.msk [vmem:[%s13906_s3 + $0x78] sm:$0xff] %vm529_vm0, %v8126_v43  ;;  %v4010_v47 = vpop.xlane.xlu0 %4009  ;;  %v4341_v29 = vmul.f32 %v9591_v11, %v14636_v20  ;;  %9102 = vmatpush3.bf16.msra.mxu0 %v9099_v8  ;;  %v14641_v11 = vld [vmem:[#allocation71_spill] sm:$0xff] }
 0x343   :  { %6593 = vst.msk [vmem:[%s13906_s3 + $0x70] sm:$0xff] %vm529_vm0, %v4636_v17  ;;  %9602 = vrcp.f32 %v4010_v47  ;;  %v4034_v57 = vpop.xlane.xlu1 %4033  ;;  %v4349_v14 = vmul.f32 %v9593_v15, %v12564_v21  ;;  %9118 = vmatpush3.bf16.msra.mxu1 %v9115_v53  ;;  %9104 = vmatprep.subr.bf16.mxu0 %v9103_v49  ;;  %v521_v21 = vld [vmem:[%s13905_s2 + $0x3c0] sm:$0xff] }
 0x344   :  { %9604 = vrcp.f32 %v4034_v57  ;;  %8370 = vmatprep.mubr.msk.f32.mxu0 %vm2978_vm2, %v4341_v29  ;;  %6533 = vst.msk [vmem:[#allocation2 + $0x290] sm:$0xff] %vm2978_vm2, %v4341_v29  ;;  %9120 = vmatprep.subr.bf16.mxu1 %v9119_v55  ;;  %v13284_v35 = vpack.c.bf16 %v522_v39, %v521_v21  ;;  %v515_v29 = vld [vmem:[%s13905_s2 + $0x390] sm:$0xff]  ;;  %v516_v57 = vld [vmem:[%s13905_s2 + $0x398] sm:$0xff] }
 0x345   :  { %v9595_v18 = vpop.eup %9594  ;;  %8371 = vmatmul.mubr.msk.f32.gmra.mrb[106].mxu0 %vm2978_vm2, %v4342_v26  ;;  %8398 = vmatprep.mubr.msk.f32.mxu1 %vm2978_vm2, %v4349_v14  ;;  %6541 = vst.msk [vmem:[#allocation2 + $0x2d0] sm:$0xff] %vm2978_vm2, %v4349_v14  ;;  %v14643_v21 = vld [vmem:[#allocation76_spill] sm:$0xff] }
 0x346   :  { %v9597_v31 = vpop.eup %9596  ;;  %8399 = vmatmul.mubr.msk.f32.gmra.mrb[106].mxu1 %vm2978_vm2, %v4350_v12  ;;  %v4007_v42 = vpop.xlane.xlu0 %4006  ;;  %v4344_v33 = vmul.f32 %v9595_v18, %v12571_v50  ;;  %9106 = vmatpush3.bf16.msra.mxu0 %v9103_v49 }
 0x347   :  { %9606 = vrcp.f32 %v4007_v42  ;;  %v4031_v32 = vpop.xlane.xlu1 %4030  ;;  %v4352_v16 = vmul.f32 %v9597_v31, %v12580_v0  ;;  %9122 = vmatpush3.bf16.msra.mxu1 %v9119_v55  ;;  %9108 = vmatprep.subr.bf16.mxu0 %v9107_v7  ;;  %v14640_v55 = vld [vmem:[#allocation70_spill] sm:$0xff]  ;;  %v9131_v31 = vpack.c.bf16 %v516_v57, %v515_v29 }
 0x348   :  { %9608 = vrcp.f32 %v4031_v32  ;;  %6536 = vst.msk [vmem:[#allocation2 + $0x2a8] sm:$0xff] %vm2978_vm2, %v4344_v33  ;;  %9124 = vmatprep.subr.bf16.mxu1 %v9123_v60  ;;  %v518_v32 = vld [vmem:[%s13905_s2 + $0x3a8] sm:$0xff] }
 0x349   :  { %v9599_v3 = vpop.eup %9598  ;;  %6544 = vst.msk [vmem:[#allocation2 + $0x2e8] sm:$0xff] %vm2978_vm2, %v4352_v16 }
 0x34a   :  { %v9601_v27 = vpop.eup %9600  ;;  %v4040_v50 = vpop.xlane.xlu0 %4039  ;;  %v4343_v45 = vmul.f32 %v9599_v3, %v12605_v19  ;;  %9110 = vmatpush3.bf16.msra.mxu0 %v9107_v7  ;;  %v525_v3 = vld [vmem:[%s13905_s2 + $0x3e0] sm:$0xff] }
 0x34b   :  { %9610 = vrcp.f32 %v4040_v50  ;;  %v4064_v0 = vpop.xlane.xlu1 %4063  ;;  %v4351_v8 = vmul.f32 %v9601_v27, %v14637_v9  ;;  %9126 = vmatpush3.bf16.msra.mxu1 %v9123_v60  ;;  %9128 = vmatprep.subr.bf16.mxu0 %v13281_v4  ;;  %v526_v27 = vld [vmem:[%s13905_s2 + $0x3e8] sm:$0xff] }
 0x34c   :  { %9612 = vrcp.f32 %v4064_v0  ;;  %8373 = vmatprep.mubr.msk.f32.mxu0 %vm2978_vm2, %v4343_v45  ;;  %6535 = vst.msk [vmem:[#allocation2 + $0x2a0] sm:$0xff] %vm2978_vm2, %v4343_v45  ;;  %9144 = vmatprep.subr.bf16.mxu1 %v13284_v35  ;;  %v14644_v0 = vld [vmem:[#allocation22_spill] sm:$0xff] }
 0x34d   :  { %v9603_v53 = vpop.eup %9602  ;;  %8374 = vmatmul.mubr.msk.f32.gmra.mrb[108].mxu0 %vm2978_vm2, %v4344_v33  ;;  %8401 = vmatprep.mubr.msk.f32.mxu1 %vm2978_vm2, %v4351_v8  ;;  %6543 = vst.msk [vmem:[#allocation2 + $0x2e0] sm:$0xff] %vm2978_vm2, %v4351_v8  ;;  %v517_v33 = vld [vmem:[%s13905_s2 + $0x3a0] sm:$0xff] }
 0x34e   :  { %v9605_v19 = vpop.eup %9604  ;;  %8402 = vmatmul.mubr.msk.f32.gmra.mrb[108].mxu1 %vm2978_vm2, %v4352_v16  ;;  %v4037_v41 = vpop.xlane.xlu0 %4036  ;;  %v4346_v36 = vmul.f32 %v9603_v53, %v14638_v13  ;;  %v9135_v13 = vpack.c.bf16 %v518_v32, %v517_v33 }
 0x34f   :  { %9614 = vrcp.f32 %v4037_v41  ;;  %v4061_v22 = vpop.xlane.xlu1 %4060  ;;  %v8145_v24 = vpop.f32.mrb[72].mxu0  ;;  %v4354_v23 = vmul.f32 %v9605_v19, %v14639_v25  ;;  %v14645_v19 = vld [vmem:[#allocation24_spill] sm:$0xff] }
 0x350   :  { %9616 = vrcp.f32 %v4061_v22  ;;  %6596 = vst.msk [vmem:[%s13906_s3 + $0x88] sm:$0xff] %vm529_vm0, %v8145_v24  ;;  %v4735_v26 = vpop.f32.mrb[73].mxu0  ;;  %v8173_v56 = vpop.f32.mrb[72].mxu1  ;;  %v519_v22 = vld [vmem:[%s13905_s2 + $0x3b0] sm:$0xff] }
 0x351   :  { %6538 = vst.msk [vmem:[#allocation2 + $0x2b8] sm:$0xff] %vm2978_vm2, %v4346_v36  ;;  %v9607_v1 = vpop.eup %9606  ;;  %6546 = vst.msk [vmem:[#allocation2 + $0x2f8] sm:$0xff] %vm2978_vm2, %v4354_v23  ;;  %v4864_v49 = vpop.f32.mrb[73].mxu1 }
 0x352   :  { %6595 = vst.msk [vmem:[%s13906_s3 + $0x80] sm:$0xff] %vm529_vm0, %v4735_v26  ;;  %v9609_v12 = vpop.eup %9608  ;;  %6604 = vst.msk [vmem:[%s13906_s3 + $0xc8] sm:$0xff] %vm529_vm0, %v8173_v56  ;;  %v4046_v10 = vpop.xlane.xlu0 %4045  ;;  %v4345_v62 = vmul.f32 %v9607_v1, %v14640_v55  ;;  %v528_v26 = vld [vmem:[%s13905_s2 + $0x3f8] sm:$0xff] }
 0x353   :  { %6603 = vst.msk [vmem:[%s13906_s3 + $0xc0] sm:$0xff] %vm529_vm0, %v4864_v49  ;;  %9618 = vrcp.f32 %v4046_v10  ;;  %v4070_v5 = vpop.xlane.xlu1 %4069  ;;  %v4353_v43 = vmul.f32 %v9609_v12, %v14641_v11  ;;  %v14646_v49 = vld [vmem:[#allocation10_spill] sm:$0xff] }
 0x354   :  { %9620 = vrcp.f32 %v4070_v5  ;;  %8376 = vmatprep.mubr.msk.f32.mxu0 %vm2978_vm2, %v4345_v62  ;;  %6537 = vst.msk [vmem:[#allocation2 + $0x2b0] sm:$0xff] %vm2978_vm2, %v4345_v62  ;;  %v14647_v62 = vld [vmem:[#allocation25_spill] sm:$0xff] }
 0x355   :  { %v9611_v54 = vpop.eup %9610  ;;  %8377 = vmatmul.mubr.msk.f32.gmra.mrb[110].mxu0 %vm2978_vm2, %v4346_v36  ;;  %8404 = vmatprep.mubr.msk.f32.mxu1 %vm2978_vm2, %v4353_v43  ;;  %6545 = vst.msk [vmem:[#allocation2 + $0x2f0] sm:$0xff] %vm2978_vm2, %v4353_v43 }
 0x356   :  { %v9613_v38 = vpop.eup %9612  ;;  %v4356_v15 = vmul.f32 %v9611_v54, %v12645_v52  ;;  %8405 = vmatmul.mubr.msk.f32.gmra.mrb[110].mxu1 %vm2978_vm2, %v4354_v23  ;;  %v4043_v17 = vpop.xlane.xlu0 %4042  ;;  %v523_v52 = vld [vmem:[%s13905_s2 + $0x3d0] sm:$0xff] }
 0x357   :  { %v4364_v47 = vmul.f32 %v9613_v38, %v12651_v28  ;;  %9622 = vrcp.f32 %v4043_v17  ;;  %v4067_v20 = vpop.xlane.xlu1 %4066  ;;  %v524_v28 = vld [vmem:[%s13905_s2 + $0x3d8] sm:$0xff]  ;;  %v527_v23 = vld [vmem:[%s13905_s2 + $0x3f0] sm:$0xff] }
 0x358   :  { %6548 = vst.msk [vmem:[#allocation2 + $0x308] sm:$0xff] %vm2978_vm2, %v4356_v15  ;;  %9624 = vrcp.f32 %v4067_v20  ;;  %v9147_v42 = vpack.c.bf16 %v524_v28, %v523_v52  ;;  %v9155_v43 = vpack.c.bf16 %v528_v26, %v527_v23 }
 0x359   :  { %v9615_v14 = vpop.eup %9614  ;;  %6556 = vst.msk [vmem:[#allocation2 + $0x348] sm:$0xff] %vm2978_vm2, %v4364_v47 }
 0x35a   :  { %v9617_v7 = vpop.eup %9616  ;;  %v4052_v60 = vpop.xlane.xlu0 %4051  ;;  %v4355_v44 = vmul.f32 %v9615_v14, %v14642_v51 }
 0x35b   :  { %9626 = vrcp.f32 %v4052_v60  ;;  %v4076_v18 = vpop.xlane.xlu1 %4075  ;;  %v4363_v39 = vmul.f32 %v9617_v7, %v14643_v21 }
 0x35c   :  { %9628 = vrcp.f32 %v4076_v18  ;;  %8423 = vmatprep.mubr.msk.f32.mxu0 %vm2978_vm2, %v4355_v44  ;;  %6547 = vst.msk [vmem:[#allocation2 + $0x300] sm:$0xff] %vm2978_vm2, %v4355_v44 }
 0x35d   :  { %v9619_v16 = vpop.eup %9618  ;;  %8424 = vmatmul.mubr.msk.f32.vlgmr.msra.gmra.mrb[112].mxu0 %vm2978_vm2, %v4356_v15  ;;  %8451 = vmatprep.mubr.msk.f32.mxu1 %vm2978_vm2, %v4363_v39  ;;  %6555 = vst.msk [vmem:[#allocation2 + $0x340] sm:$0xff] %vm2978_vm2, %v4363_v39 }
 0x35e   :  { %v9621_v50 = vpop.eup %9620  ;;  %8452 = vmatmul.mubr.msk.f32.vlgmr.msra.gmra.mrb[112].mxu1 %vm2978_vm2, %v4364_v47  ;;  %v4049_v45 = vpop.xlane.xlu0 %4048  ;;  %v4358_v9 = vmul.f32 %v9619_v16, %v14644_v0  ;;  %9130 = vmatpush3.bf16.msra.mxu0 %v13281_v4  ;;  %v9151_v4 = vpack.c.bf16 %v526_v27, %v525_v3  ;;  %v14649_v16 = vld [vmem:[#allocation119_spill] sm:$0xff] }
 0x35f   :  { %9630 = vrcp.f32 %v4049_v45  ;;  %v4073_v8 = vpop.xlane.xlu1 %4072  ;;  %v8148_v53 = vpop.f32.mrb[74].mxu0  ;;  %v4366_v41 = vmul.f32 %v9621_v50, %v14645_v19  ;;  %9146 = vmatpush3.bf16.msra.mxu1 %v13284_v35  ;;  %9132 = vmatprep.subr.bf16.mxu0 %v9131_v31  ;;  %v520_v35 = vld [vmem:[%s13905_s2 + $0x3b8] sm:$0xff] }
 0x360   :  { %9632 = vrcp.f32 %v4073_v8  ;;  %6598 = vst.msk [vmem:[%s13906_s3 + $0x98] sm:$0xff] %vm529_vm0, %v8148_v53  ;;  %v4745_v36 = vpop.f32.mrb[75].mxu0  ;;  %9148 = vmatprep.subr.bf16.mxu1 %v9147_v42  ;;  %v8176_v25 = vpop.f32.mrb[74].mxu1  ;;  %v9139_v11 = vpack.c.bf16 %v520_v35, %v519_v22  ;;  %v14650_v45 = vld [vmem:[#allocation28_spill] sm:$0xff]  ;;  %v14651_v53 = vld [vmem:[#allocation26_spill] sm:$0xff]  ;;  %v14652_v22 = vld [vmem:[#allocation29_spill] sm:$0xff] }
 0x361   :  { %6550 = vst.msk [vmem:[#allocation2 + $0x318] sm:$0xff] %vm2978_vm2, %v4358_v9  ;;  %v9623_v24 = vpop.eup %9622  ;;  %6558 = vst.msk [vmem:[#allocation2 + $0x358] sm:$0xff] %vm2978_vm2, %v4366_v41  ;;  %v4874_v56 = vpop.f32.mrb[75].mxu1 }
 0x362   :  { %6597 = vst.msk [vmem:[%s13906_s3 + $0x90] sm:$0xff] %vm529_vm0, %v4745_v36  ;;  %v9625_v1 = vpop.eup %9624  ;;  %6606 = vst.msk [vmem:[%s13906_s3 + $0xd8] sm:$0xff] %vm529_vm0, %v8176_v25  ;;  %v4058_v12 = vpop.xlane.xlu0 %4057  ;;  %v4357_v10 = vmul.f32 %v9623_v24, %v14646_v49  ;;  %9134 = vmatpush3.bf16.msra.mxu0 %v9131_v31  ;;  %v14648_v31 = vld [vmem:[#allocation62_spill] sm:$0xff]  ;;  %v14653_v24 = vld [vmem:[#allocation27_spill] sm:$0xff] }
 0x363   :  { %6605 = vst.msk [vmem:[%s13906_s3 + $0xd0] sm:$0xff] %vm529_vm0, %v4874_v56  ;;  %9634 = vrcp.f32 %v4058_v12  ;;  %v4082_v55 = vpop.xlane.xlu1 %4081  ;;  %v4365_v5 = vmul.f32 %v9625_v1, %v14647_v62  ;;  %9150 = vmatpush3.bf16.msra.mxu1 %v9147_v42  ;;  %9136 = vmatprep.subr.bf16.mxu0 %v9135_v13  ;;  %v14654_v12 = vld [vmem:[#allocation64_spill] sm:$0xff] }
 0x364   :  { %9636 = vrcp.f32 %v4082_v55  ;;  %8426 = vmatprep.mubr.msk.f32.mxu0 %vm2978_vm2, %v4357_v10  ;;  %6549 = vst.msk [vmem:[#allocation2 + $0x310] sm:$0xff] %vm2978_vm2, %v4357_v10  ;;  %9152 = vmatprep.subr.bf16.mxu1 %v9151_v4  ;;  %v14655_v55 = vld [vmem:[#allocation122_spill] sm:$0xff] }
 0x365   :  { %v9627_v54 = vpop.eup %9626  ;;  %8427 = vmatmul.mubr.msk.f32.gmra.mrb[114].mxu0 %vm2978_vm2, %v4358_v9  ;;  %8454 = vmatprep.mubr.msk.f32.mxu1 %vm2978_vm2, %v4365_v5  ;;  %6557 = vst.msk [vmem:[#allocation2 + $0x350] sm:$0xff] %vm2978_vm2, %v4365_v5 }
 0x366   :  { %v9629_v38 = vpop.eup %9628  ;;  %8455 = vmatmul.mubr.msk.f32.gmra.mrb[114].mxu1 %vm2978_vm2, %v4366_v41  ;;  %v4055_v15 = vpop.xlane.xlu0 %4054  ;;  %v4360_v17 = vmul.f32 %v9627_v54, %v12749_v58  ;;  %9138 = vmatpush3.bf16.msra.mxu0 %v9135_v13 }
 0x367   :  { %9638 = vrcp.f32 %v4055_v15  ;;  %v4079_v47 = vpop.xlane.xlu1 %4078  ;;  %v4368_v20 = vmul.f32 %v9629_v38, %v12755_v59  ;;  %9154 = vmatpush3.bf16.msra.mxu1 %v9151_v4  ;;  %9140 = vmatprep.subr.bf16.mxu0 %v9139_v11  ;;  %v14656_v15 = vld [vmem:[#allocation66_spill] sm:$0xff] }
 0x368   :  { %9640 = vrcp.f32 %v4079_v47  ;;  %6552 = vst.msk [vmem:[#allocation2 + $0x328] sm:$0xff] %vm2978_vm2, %v4360_v17  ;;  %9156 = vmatprep.subr.bf16.mxu1 %v9155_v43 }
 0x369   :  { %v9631_v29 = vpop.eup %9630  ;;  %6560 = vst.msk [vmem:[#allocation2 + $0x368] sm:$0xff] %vm2978_vm2, %v4368_v20 }
 0x36a   :  { %v9633_v57 = vpop.eup %9632  ;;  %v4359_v14 = vmul.f32 %v9631_v29, %v12793_v46  ;;  %9142 = vmatpush3.bf16.msra.mxu0 %v9139_v11  ;;  %v4088_v52 = vpop.xlane.xlu0 %4087 }
 0x36b   :  { %v4112_v58 = vpop.xlane.xlu1 %4111  ;;  %v4367_v28 = vmul.f32 %v9633_v57, %v12804_v63  ;;  %9158 = vmatpush3.bf16.msra.mxu1 %v9155_v43  ;;  %9642 = vrcp.f32 %v4088_v52 }
 0x36c   :  { %8429 = vmatprep.mubr.msk.f32.mxu0 %vm2978_vm2, %v4359_v14  ;;  %6551 = vst.msk [vmem:[#allocation2 + $0x320] sm:$0xff] %vm2978_vm2, %v4359_v14  ;;  %9644 = vrcp.f32 %v4112_v58 }
 0x36d   :  { %v9635_v59 = vpop.eup %9634  ;;  %8430 = vmatmul.mubr.msk.f32.gmra.mrb[116].mxu0 %vm2978_vm2, %v4360_v17  ;;  %8457 = vmatprep.mubr.msk.f32.mxu1 %vm2978_vm2, %v4367_v28  ;;  %6559 = vst.msk [vmem:[#allocation2 + $0x360] sm:$0xff] %vm2978_vm2, %v4367_v28 }
 0x36e   :  { %v9637_v46 = vpop.eup %9636  ;;  %8458 = vmatmul.mubr.msk.f32.gmra.mrb[116].mxu1 %vm2978_vm2, %v4368_v20  ;;  %v4362_v7 = vmul.f32 %v9635_v59, %v12813_v40  ;;  %v4085_v63 = vpop.xlane.xlu0 %4084  ;;  %v14657_v20 = vld [vmem:[#allocation87_spill] sm:$0xff] }
 0x36f   :  { %v4109_v60 = vpop.xlane.xlu1 %4108  ;;  %v4370_v51 = vmul.f32 %v9637_v46, %v12819_v34  ;;  %9646 = vrcp.f32 %v4085_v63  ;;  %v8151_v44 = vpop.f32.mrb[76].mxu0 }
 0x370   :  { %6554 = vst.msk [vmem:[#allocation2 + $0x338] sm:$0xff] %vm2978_vm2, %v4362_v7  ;;  %9648 = vrcp.f32 %v4109_v60  ;;  %v4755_v21 = vpop.f32.mrb[77].mxu0  ;;  %v8179_v39 = vpop.f32.mrb[76].mxu1 }
 0x371   :  { %v9639_v18 = vpop.eup %9638  ;;  %6600 = vst.msk [vmem:[%s13906_s3 + $0xa8] sm:$0xff] %vm529_vm0, %v8151_v44  ;;  %6599 = vst.msk [vmem:[%s13906_s3 + $0xa0] sm:$0xff] %vm529_vm0, %v4755_v21  ;;  %v4884_v34 = vpop.f32.mrb[77].mxu1 }
 0x372   :  { %6562 = vst.msk [vmem:[#allocation2 + $0x378] sm:$0xff] %vm2978_vm2, %v4370_v51  ;;  %v9641_v40 = vpop.eup %9640  ;;  %v4361_v42 = vmul.f32 %v9639_v18, %v14648_v31  ;;  %v4094_v33 = vpop.xlane.xlu0 %4093 }
 0x373   :  { %6608 = vst.msk [vmem:[%s13906_s3 + $0xe8] sm:$0xff] %vm529_vm0, %v8179_v39  ;;  %6607 = vst.msk [vmem:[%s13906_s3 + $0xe0] sm:$0xff] %vm529_vm0, %v4884_v34  ;;  %v4118_v32 = vpop.xlane.xlu1 %4117  ;;  %v4369_v3 = vmul.f32 %v9641_v40, %v14649_v16  ;;  %9650 = vrcp.f32 %v4094_v33  ;;  %v14659_v39 = vld [vmem:[#allocation92_spill] sm:$0xff] }
 0x374   :  { %8432 = vmatprep.mubr.msk.f32.mxu0 %vm2978_vm2, %v4361_v42  ;;  %6553 = vst.msk [vmem:[#allocation2 + $0x330] sm:$0xff] %vm2978_vm2, %v4361_v42  ;;  %9652 = vrcp.f32 %v4118_v32 }
 0x375   :  { %8433 = vmatmul.mubr.msk.f32.gmra.mrb[118].mxu0 %vm2978_vm2, %v4362_v7  ;;  %8460 = vmatprep.mubr.msk.f32.mxu1 %vm2978_vm2, %v4369_v3  ;;  %6561 = vst.msk [vmem:[#allocation2 + $0x370] sm:$0xff] %vm2978_vm2, %v4369_v3  ;;  %v9643_v27 = vpop.eup %9642 }
 0x376   :  { %8461 = vmatmul.mubr.msk.f32.gmra.mrb[118].mxu1 %vm2978_vm2, %v4370_v51  ;;  %v9645_v50 = vpop.eup %9644  ;;  %v4372_v0 = vmul.f32 %v9643_v27, %v14650_v45  ;;  %v4091_v9 = vpop.xlane.xlu0 %4090 }
 0x377   :  { %v4115_v8 = vpop.xlane.xlu1 %4114  ;;  %v4380_v19 = vmul.f32 %v9645_v50, %v14651_v53  ;;  %9654 = vrcp.f32 %v4091_v9 }
 0x378   :  { %6564 = vst.msk [vmem:[#allocation2 + $0x388] sm:$0xff] %vm2978_vm2, %v4372_v0  ;;  %9656 = vrcp.f32 %v4115_v8 }
 0x379   :  { %v9647_v41 = vpop.eup %9646  ;;  %6572 = vst.msk [vmem:[#allocation2 + $0x3c8] sm:$0xff] %vm2978_vm2, %v4380_v19 }
 0x37a   :  { %v9649_v13 = vpop.eup %9648  ;;  %v4100_v36 = vpop.xlane.xlu0 %4099  ;;  %v4371_v35 = vmul.f32 %v9647_v41, %v14652_v22 }
 0x37b   :  { %v4124_v4 = vpop.xlane.xlu1 %4123  ;;  %9658 = vrcp.f32 %v4100_v36  ;;  %v4379_v25 = vmul.f32 %v9649_v13, %v14653_v24 }
 0x37c   :  { %9660 = vrcp.f32 %v4124_v4  ;;  %8479 = vmatprep.mubr.msk.f32.mxu0 %vm2978_vm2, %v4371_v35  ;;  %6563 = vst.msk [vmem:[#allocation2 + $0x380] sm:$0xff] %vm2978_vm2, %v4371_v35 }
 0x37d   :  { %v9651_v23 = vpop.eup %9650  ;;  %8480 = vmatmul.mubr.msk.f32.vlgmr.msra.gmra.mrb[120].mxu0 %vm2978_vm2, %v4372_v0  ;;  %8507 = vmatprep.mubr.msk.f32.mxu1 %vm2978_vm2, %v4379_v25  ;;  %6571 = vst.msk [vmem:[#allocation2 + $0x3c0] sm:$0xff] %vm2978_vm2, %v4379_v25 }
 0x37e   :  { %v9653_v26 = vpop.eup %9652  ;;  %8508 = vmatmul.mubr.msk.f32.vlgmr.msra.gmra.mrb[120].mxu1 %vm2978_vm2, %v4380_v19  ;;  %v4097_v1 = vpop.xlane.xlu0 %4096  ;;  %v4374_v49 = vmul.f32 %v9651_v23, %v14654_v12 }
 0x37f   :  { %v4121_v56 = vpop.xlane.xlu1 %4120  ;;  %9662 = vrcp.f32 %v4097_v1  ;;  %v8154_v10 = vpop.f32.mrb[78].mxu0  ;;  %v4382_v62 = vmul.f32 %v9653_v26, %v14655_v55 }
 0x380   :  { %9664 = vrcp.f32 %v4121_v56  ;;  %6602 = vst.msk [vmem:[%s13906_s3 + $0xb8] sm:$0xff] %vm529_vm0, %v8154_v10  ;;  %v4765_v5 = vpop.f32.mrb[79].mxu0  ;;  %v8182_v11 = vpop.f32.mrb[78].mxu1 }
 0x381   :  { %6566 = vst.msk [vmem:[#allocation2 + $0x398] sm:$0xff] %vm2978_vm2, %v4374_v49  ;;  %v9655_v43 = vpop.eup %9654  ;;  %v4894_v54 = vpop.f32.mrb[79].mxu1  ;;  %6574 = vst.msk [vmem:[#allocation2 + $0x3d8] sm:$0xff] %vm2978_vm2, %v4382_v62 }
 0x382   :  { %6601 = vst.msk [vmem:[%s13906_s3 + $0xb0] sm:$0xff] %vm529_vm0, %v4765_v5  ;;  %6610 = vst.msk [vmem:[%s13906_s3 + $0xf8] sm:$0xff] %vm529_vm0, %v8182_v11  ;;  %v9657_v38 = vpop.eup %9656  ;;  %v4373_v17 = vmul.f32 %v9655_v43, %v14656_v15 }
 0x383   :  { %6609 = vst.msk [vmem:[%s13906_s3 + $0xf0] sm:$0xff] %vm529_vm0, %v4894_v54  ;;  %v4103_v47 = vpop.xlane.xlu0 %4102  ;;  %v4381_v29 = vmul.f32 %v9657_v38, %v14657_v20 }
 0x384   :  { %8482 = vmatprep.mubr.msk.f32.mxu0 %vm2978_vm2, %v4373_v17  ;;  %6565 = vst.msk [vmem:[#allocation2 + $0x390] sm:$0xff] %vm2978_vm2, %v4373_v17  ;;  %9666 = vrcp.f32 %v4103_v47  ;;  %v4127_v57 = vpop.xlane.xlu1 %4126 }
 0x385   :  { %v9659_v14 = vpop.eup %9658  ;;  %8510 = vmatprep.mubr.msk.f32.mxu1 %vm2978_vm2, %v4381_v29  ;;  %6573 = vst.msk [vmem:[#allocation2 + $0x3d0] sm:$0xff] %vm2978_vm2, %v4381_v29  ;;  %9668 = vrcp.f32 %v4127_v57  ;;  %8483 = vmatmul.mubr.msk.f32.gmra.mrb[122].mxu0 %vm2978_vm2, %v4374_v49 }
 0x386   :  { %v9661_v52 = vpop.eup %9660  ;;  %8511 = vmatmul.mubr.msk.f32.gmra.mrb[122].mxu1 %vm2978_vm2, %v4382_v62  ;;  %v4376_v58 = vmul.f32 %v9659_v14, %v12879_v30 }
 0x387   :  { %v4106_v28 = vpop.xlane.xlu0 %4105  ;;  %v4384_v59 = vmul.f32 %v9661_v52, %v12885_v2 }
 0x388   :  { %9670 = vrcp.f32 %v4106_v28  ;;  %v4130_v46 = vpop.xlane.xlu1 %4129  ;;  %6568 = vst.msk [vmem:[#allocation2 + $0x3a8] sm:$0xff] %vm2978_vm2, %v4376_v58 }
 0x389   :  { %v9663_v7 = vpop.eup %9662  ;;  %9672 = vrcp.f32 %v4130_v46  ;;  %6576 = vst.msk [vmem:[#allocation2 + $0x3e8] sm:$0xff] %vm2978_vm2, %v4384_v59 }
 0x38a   :  { %v9665_v63 = vpop.eup %9664  ;;  %v4375_v60 = vmul.f32 %v9663_v7, %v12901_v61 }
 0x38b   :  { %v4383_v51 = vmul.f32 %v9665_v63, %v12910_v48  ;;  %v14658_v48 = vld [vmem:[#allocation90_spill] sm:$0xff] }
 0x38c   :  { %8485 = vmatprep.mubr.msk.f32.mxu0 %vm2978_vm2, %v4375_v60  ;;  %6567 = vst.msk [vmem:[#allocation2 + $0x3a0] sm:$0xff] %vm2978_vm2, %v4375_v60 }
 0x38d   :  { %8486 = vmatmul.mubr.msk.f32.gmra.mrb[124].mxu0 %vm2978_vm2, %v4376_v58  ;;  %8513 = vmatprep.mubr.msk.f32.mxu1 %vm2978_vm2, %v4383_v51  ;;  %6575 = vst.msk [vmem:[#allocation2 + $0x3e0] sm:$0xff] %vm2978_vm2, %v4383_v51 }
 0x38e   :  { %v9667_v30 = vpop.eup %9666  ;;  %8514 = vmatmul.mubr.msk.f32.gmra.mrb[124].mxu1 %vm2978_vm2, %v4384_v59  ;;  %v8201_v2 = vpop.f32.mrb[80].mxu0 }
 0x38f   :  { %v9669_v44 = vpop.eup %9668  ;;  %6612 = vst.msk [vmem:[%s13906_s3 + $0x108] sm:$0xff] %vm529_vm0, %v8201_v2  ;;  %v4993_v61 = vpop.f32.mrb[81].mxu0  ;;  %v4377_v18 = vmul.f32 %v9667_v30, %v14658_v48 }
 0x390   :  { %6611 = vst.msk [vmem:[%s13906_s3 + $0x100] sm:$0xff] %vm529_vm0, %v4993_v61  ;;  %v8229_v21 = vpop.f32.mrb[80].mxu1  ;;  %v4385_v40 = vmul.f32 %v9669_v44, %v14659_v39 }
 0x391   :  { %6620 = vst.msk [vmem:[%s13906_s3 + $0x148] sm:$0xff] %vm529_vm0, %v8229_v21  ;;  %v5122_v34 = vpop.f32.mrb[81].mxu1  ;;  %8488 = vmatprep.mubr.msk.f32.mxu0 %vm2978_vm2, %v4377_v18 }
 0x392   :  { %6569 = vst.msk [vmem:[#allocation2 + $0x3b0] sm:$0xff] %vm2978_vm2, %v4377_v18  ;;  %v9671_v31 = vpop.eup %9670  ;;  %8516 = vmatprep.mubr.msk.f32.mxu1 %vm2978_vm2, %v4385_v40  ;;  %6577 = vst.msk [vmem:[#allocation2 + $0x3f0] sm:$0xff] %vm2978_vm2, %v4385_v40 }
 0x393   :  { %6619 = vst.msk [vmem:[%s13906_s3 + $0x140] sm:$0xff] %vm529_vm0, %v5122_v34  ;;  %v9673_v42 = vpop.eup %9672  ;;  %v4378_v33 = vmul.f32 %v9671_v31, %v12917_v37 }
 0x394   :  { %v4386_v32 = vmul.f32 %v9673_v42, %v12919_v6 }
 0x395   :  { %8489 = vmatmul.mubr.msk.f32.gmra.mrb[126].mxu0 %vm2978_vm2, %v4378_v33  ;;  %6570 = vst.msk [vmem:[#allocation2 + $0x3b8] sm:$0xff] %vm2978_vm2, %v4378_v33 }
 0x396   :  { %8517 = vmatmul.mubr.msk.f32.gmra.mrb[126].mxu1 %vm2978_vm2, %v4386_v32  ;;  %6578 = vst.msk [vmem:[#allocation2 + $0x3f8] sm:$0xff] %vm2978_vm2, %v4386_v32 }
 0x39e   :  { %v8204_v16 = vpop.f32.mrb[82].mxu0 }
 0x39f   :  { %6614 = vst.msk [vmem:[%s13906_s3 + $0x118] sm:$0xff] %vm529_vm0, %v8204_v16  ;;  %v5003_v3 = vpop.f32.mrb[83].mxu0 }
 0x3a0   :  { %6613 = vst.msk [vmem:[%s13906_s3 + $0x110] sm:$0xff] %vm529_vm0, %v5003_v3  ;;  %v8232_v37 = vpop.f32.mrb[82].mxu1 }
 0x3a1   :  { %6622 = vst.msk [vmem:[%s13906_s3 + $0x158] sm:$0xff] %vm529_vm0, %v8232_v37  ;;  %v5132_v6 = vpop.f32.mrb[83].mxu1 }
 0x3a2   :  { %6621 = vst.msk [vmem:[%s13906_s3 + $0x150] sm:$0xff] %vm529_vm0, %v5132_v6 }
 0x3ae   :  { %v8207_v27 = vpop.f32.mrb[84].mxu0 }
 0x3af   :  { %6616 = vst.msk [vmem:[%s13906_s3 + $0x128] sm:$0xff] %vm529_vm0, %v8207_v27  ;;  %v5013_v50 = vpop.f32.mrb[85].mxu0 }
 0x3b0   :  { %6615 = vst.msk [vmem:[%s13906_s3 + $0x120] sm:$0xff] %vm529_vm0, %v5013_v50  ;;  %v8235_v45 = vpop.f32.mrb[84].mxu1 }
 0x3b1   :  { %6624 = vst.msk [vmem:[%s13906_s3 + $0x168] sm:$0xff] %vm529_vm0, %v8235_v45  ;;  %v5142_v0 = vpop.f32.mrb[85].mxu1 }
 0x3b2   :  { %6623 = vst.msk [vmem:[%s13906_s3 + $0x160] sm:$0xff] %vm529_vm0, %v5142_v0 }
 0x3bf   :  { %v8210_v9 = vpop.f32.mrb[86].mxu0 }
 0x3c0   :  { %6618 = vst.msk [vmem:[%s13906_s3 + $0x138] sm:$0xff] %vm529_vm0, %v8210_v9  ;;  %v5023_v8 = vpop.f32.mrb[87].mxu0 }
 0x3c1   :  { %6617 = vst.msk [vmem:[%s13906_s3 + $0x130] sm:$0xff] %vm529_vm0, %v5023_v8  ;;  %v8238_v53 = vpop.f32.mrb[86].mxu1 }
 0x3c2   :  { %6626 = vst.msk [vmem:[%s13906_s3 + $0x178] sm:$0xff] %vm529_vm0, %v8238_v53  ;;  %v5152_v19 = vpop.f32.mrb[87].mxu1 }
 0x3c3   :  { %6625 = vst.msk [vmem:[%s13906_s3 + $0x170] sm:$0xff] %vm529_vm0, %v5152_v19 }
 0x3cf   :  { %v8257_v41 = vpop.f32.mrb[88].mxu0 }
 0x3d0   :  { %6628 = vst.msk [vmem:[%s13906_s3 + $0x188] sm:$0xff] %vm529_vm0, %v8257_v41  ;;  %v5251_v13 = vpop.f32.mrb[89].mxu0  ;;  %v8285_v36 = vpop.f32.mrb[88].mxu1 }
 0x3d1   :  { %6627 = vst.msk [vmem:[%s13906_s3 + $0x180] sm:$0xff] %vm529_vm0, %v5251_v13  ;;  %6636 = vst.msk [vmem:[%s13906_s3 + $0x1c8] sm:$0xff] %vm529_vm0, %v8285_v36  ;;  %v5380_v4 = vpop.f32.mrb[89].mxu1 }
 0x3d2   :  { %6635 = vst.msk [vmem:[%s13906_s3 + $0x1c0] sm:$0xff] %vm529_vm0, %v5380_v4 }
 0x3d7   :  { %v8260_v22 = vpop.f32.mrb[90].mxu0 }
 0x3d8   :  { %6630 = vst.msk [vmem:[%s13906_s3 + $0x198] sm:$0xff] %vm529_vm0, %v8260_v22  ;;  %v5261_v35 = vpop.f32.mrb[91].mxu0  ;;  %v8288_v24 = vpop.f32.mrb[90].mxu1 }
 0x3d9   :  { %6629 = vst.msk [vmem:[%s13906_s3 + $0x190] sm:$0xff] %vm529_vm0, %v5261_v35  ;;  %6638 = vst.msk [vmem:[%s13906_s3 + $0x1d8] sm:$0xff] %vm529_vm0, %v8288_v24  ;;  %v5390_v25 = vpop.f32.mrb[91].mxu1 }
 0x3da   :  { %6637 = vst.msk [vmem:[%s13906_s3 + $0x1d0] sm:$0xff] %vm529_vm0, %v5390_v25 }
 0x3df   :  { %v8263_v23 = vpop.f32.mrb[92].mxu0 }
 0x3e0   :  { %6632 = vst.msk [vmem:[%s13906_s3 + $0x1a8] sm:$0xff] %vm529_vm0, %v8263_v23  ;;  %v5271_v26 = vpop.f32.mrb[93].mxu0  ;;  %v8291_v1 = vpop.f32.mrb[92].mxu1 }
 0x3e1   :  { %6631 = vst.msk [vmem:[%s13906_s3 + $0x1a0] sm:$0xff] %vm529_vm0, %v5271_v26  ;;  %6640 = vst.msk [vmem:[%s13906_s3 + $0x1e8] sm:$0xff] %vm529_vm0, %v8291_v1  ;;  %v5400_v56 = vpop.f32.mrb[93].mxu1 }
 0x3e2   :  { %6639 = vst.msk [vmem:[%s13906_s3 + $0x1e0] sm:$0xff] %vm529_vm0, %v5400_v56 }
 0x3e7   :  { %v8266_v12 = vpop.f32.mrb[94].mxu0 }
 0x3e8   :  { %6634 = vst.msk [vmem:[%s13906_s3 + $0x1b8] sm:$0xff] %vm529_vm0, %v8266_v12  ;;  %v5281_v49 = vpop.f32.mrb[95].mxu0  ;;  %v8294_v10 = vpop.f32.mrb[94].mxu1 }
 0x3e9   :  { %6633 = vst.msk [vmem:[%s13906_s3 + $0x1b0] sm:$0xff] %vm529_vm0, %v5281_v49  ;;  %6642 = vst.msk [vmem:[%s13906_s3 + $0x1f8] sm:$0xff] %vm529_vm0, %v8294_v10  ;;  %v5410_v55 = vpop.f32.mrb[95].mxu1 }
 0x3ea   :  { %6641 = vst.msk [vmem:[%s13906_s3 + $0x1f0] sm:$0xff] %vm529_vm0, %v5410_v55 }
 0x3eb   :  { %9685 = shalt.err (!%p9682_p4)
}
 0x3ec   :  { %s9686_s26 = scalar_lea.hbm %s13907_s4, 16384 }
 0x3ed   :  { %p9687_p5 = scmp.ne.s32.totalorder %s13907_s4, %s9686_s26  ;;  %p9690_p6 = scmp.lt.u32.totalorder %s9686_s26, %s13907_s4 }
 0x3ef   :  { %p9692_p7 = pnand %p9690_p6, %p9687_p5 }
 0x3f1   :  { %9695 = shalt.err (!%p9692_p7)
}
 0x3f2   :  { %s9699_s30 = smov 128   ;;  %s9700_s1 = smov 8   ;;  %v8313_v62 = vpop.f32.mrb[96].mxu0  ;;  %v8341_v11 = vpop.f32.mrb[96].mxu1 }
 0x3f3   :  { %6720 = dma.vmem_to_hbm [thread:$0]  %s6715_s22, 16384, %s13907_s4, [#allocation3], %s9699_s30, %s9699_s30, %s9700_s1   ;;  %v5509_v5 = vpop.f32.mrb[97].mxu0  ;;  %v5638_v43 = vpop.f32.mrb[97].mxu1 }
 0x3f4   :  { %6644 = vst.msk [vmem:[%s13906_s3 + $0x208] sm:$0xff] %vm529_vm0, %v8313_v62  ;;  %6643 = vst.msk [vmem:[%s13906_s3 + $0x200] sm:$0xff] %vm529_vm0, %v5509_v5 }
 0x3f5   :  { %6652 = vst.msk [vmem:[%s13906_s3 + $0x248] sm:$0xff] %vm529_vm0, %v8341_v11  ;;  %6651 = vst.msk [vmem:[%s13906_s3 + $0x240] sm:$0xff] %vm529_vm0, %v5638_v43 }
 0x3f7   :  { %v8316_v54 = vpop.f32.mrb[98].mxu0 }
 0x3f8   :  { %6646 = vst.msk [vmem:[%s13906_s3 + $0x218] sm:$0xff] %vm529_vm0, %v8316_v54  ;;  %v5519_v38 = vpop.f32.mrb[99].mxu0  ;;  %v8344_v15 = vpop.f32.mrb[98].mxu1 }
 0x3f9   :  { %6645 = vst.msk [vmem:[%s13906_s3 + $0x210] sm:$0xff] %vm529_vm0, %v5519_v38  ;;  %6654 = vst.msk [vmem:[%s13906_s3 + $0x258] sm:$0xff] %vm529_vm0, %v8344_v15  ;;  %v5648_v17 = vpop.f32.mrb[99].mxu1 }
 0x3fa   :  { %6653 = vst.msk [vmem:[%s13906_s3 + $0x250] sm:$0xff] %vm529_vm0, %v5648_v17 }
 0x3ff   :  { %v8319_v47 = vpop.f32.mrb[100].mxu0 }
 0x400   :  { %6648 = vst.msk [vmem:[%s13906_s3 + $0x228] sm:$0xff] %vm529_vm0, %v8319_v47  ;;  %v5529_v20 = vpop.f32.mrb[101].mxu0  ;;  %v8347_v29 = vpop.f32.mrb[100].mxu1 }
 0x401   :  { %6647 = vst.msk [vmem:[%s13906_s3 + $0x220] sm:$0xff] %vm529_vm0, %v5529_v20  ;;  %6656 = vst.msk [vmem:[%s13906_s3 + $0x268] sm:$0xff] %vm529_vm0, %v8347_v29  ;;  %v5658_v57 = vpop.f32.mrb[101].mxu1 }
 0x402   :  { %6655 = vst.msk [vmem:[%s13906_s3 + $0x260] sm:$0xff] %vm529_vm0, %v5658_v57 }
 0x408   :  { %v8322_v14 = vpop.f32.mrb[102].mxu0 }
 0x409   :  { %6650 = vst.msk [vmem:[%s13906_s3 + $0x238] sm:$0xff] %vm529_vm0, %v8322_v14  ;;  %v5539_v52 = vpop.f32.mrb[103].mxu0  ;;  %v8350_v58 = vpop.f32.mrb[102].mxu1 }
 0x40a   :  { %6649 = vst.msk [vmem:[%s13906_s3 + $0x230] sm:$0xff] %vm529_vm0, %v5539_v52  ;;  %6658 = vst.msk [vmem:[%s13906_s3 + $0x278] sm:$0xff] %vm529_vm0, %v8350_v58  ;;  %v5668_v28 = vpop.f32.mrb[103].mxu1 }
 0x40b   :  { %6657 = vst.msk [vmem:[%s13906_s3 + $0x270] sm:$0xff] %vm529_vm0, %v5668_v28 }
 0x410   :  { %v8369_v59 = vpop.f32.mrb[104].mxu0 }
 0x411   :  { %6660 = vst.msk [vmem:[%s13906_s3 + $0x288] sm:$0xff] %vm529_vm0, %v8369_v59  ;;  %v5767_v46 = vpop.f32.mrb[105].mxu0  ;;  %v8397_v7 = vpop.f32.mrb[104].mxu1 }
 0x412   :  { %6659 = vst.msk [vmem:[%s13906_s3 + $0x280] sm:$0xff] %vm529_vm0, %v5767_v46  ;;  %6668 = vst.msk [vmem:[%s13906_s3 + $0x2c8] sm:$0xff] %vm529_vm0, %v8397_v7  ;;  %v5896_v63 = vpop.f32.mrb[105].mxu1 }
 0x413   :  { %6667 = vst.msk [vmem:[%s13906_s3 + $0x2c0] sm:$0xff] %vm529_vm0, %v5896_v63 }
 0x418   :  { %v8372_v60 = vpop.f32.mrb[106].mxu0 }
 0x419   :  { %6662 = vst.msk [vmem:[%s13906_s3 + $0x298] sm:$0xff] %vm529_vm0, %v8372_v60  ;;  %v5777_v51 = vpop.f32.mrb[107].mxu0  ;;  %v8400_v30 = vpop.f32.mrb[106].mxu1 }
 0x41a   :  { %6661 = vst.msk [vmem:[%s13906_s3 + $0x290] sm:$0xff] %vm529_vm0, %v5777_v51  ;;  %6670 = vst.msk [vmem:[%s13906_s3 + $0x2d8] sm:$0xff] %vm529_vm0, %v8400_v30  ;;  %v5906_v2 = vpop.f32.mrb[107].mxu1 }
 0x41b   :  { %6669 = vst.msk [vmem:[%s13906_s3 + $0x2d0] sm:$0xff] %vm529_vm0, %v5906_v2 }
 0x420   :  { %v8375_v44 = vpop.f32.mrb[108].mxu0 }
 0x421   :  { %6664 = vst.msk [vmem:[%s13906_s3 + $0x2a8] sm:$0xff] %vm529_vm0, %v8375_v44  ;;  %v5787_v61 = vpop.f32.mrb[109].mxu0  ;;  %v8403_v48 = vpop.f32.mrb[108].mxu1 }
 0x422   :  { %6663 = vst.msk [vmem:[%s13906_s3 + $0x2a0] sm:$0xff] %vm529_vm0, %v5787_v61  ;;  %6672 = vst.msk [vmem:[%s13906_s3 + $0x2e8] sm:$0xff] %vm529_vm0, %v8403_v48  ;;  %v5916_v18 = vpop.f32.mrb[109].mxu1 }
 0x423   :  { %6671 = vst.msk [vmem:[%s13906_s3 + $0x2e0] sm:$0xff] %vm529_vm0, %v5916_v18 }
 0x428   :  { %v8378_v21 = vpop.f32.mrb[110].mxu0 }
 0x429   :  { %6666 = vst.msk [vmem:[%s13906_s3 + $0x2b8] sm:$0xff] %vm529_vm0, %v8378_v21  ;;  %v5797_v39 = vpop.f32.mrb[111].mxu0  ;;  %v8406_v40 = vpop.f32.mrb[110].mxu1 }
 0x42a   :  { %6665 = vst.msk [vmem:[%s13906_s3 + $0x2b0] sm:$0xff] %vm529_vm0, %v5797_v39  ;;  %6674 = vst.msk [vmem:[%s13906_s3 + $0x2f8] sm:$0xff] %vm529_vm0, %v8406_v40  ;;  %v5926_v34 = vpop.f32.mrb[111].mxu1 }
 0x42b   :  { %6673 = vst.msk [vmem:[%s13906_s3 + $0x2f0] sm:$0xff] %vm529_vm0, %v5926_v34 }
 0x430   :  { %v8425_v31 = vpop.f32.mrb[112].mxu0 }
 0x431   :  { %6676 = vst.msk [vmem:[%s13906_s3 + $0x308] sm:$0xff] %vm529_vm0, %v8425_v31  ;;  %v6025_v42 = vpop.f32.mrb[113].mxu0  ;;  %v8453_v33 = vpop.f32.mrb[112].mxu1 }
 0x432   :  { %6675 = vst.msk [vmem:[%s13906_s3 + $0x300] sm:$0xff] %vm529_vm0, %v6025_v42  ;;  %6684 = vst.msk [vmem:[%s13906_s3 + $0x348] sm:$0xff] %vm529_vm0, %v8453_v33  ;;  %v6154_v32 = vpop.f32.mrb[113].mxu1 }
 0x433   :  { %6683 = vst.msk [vmem:[%s13906_s3 + $0x340] sm:$0xff] %vm529_vm0, %v6154_v32 }
 0x438   :  { %v8428_v16 = vpop.f32.mrb[114].mxu0 }
 0x439   :  { %6678 = vst.msk [vmem:[%s13906_s3 + $0x318] sm:$0xff] %vm529_vm0, %v8428_v16  ;;  %v6035_v3 = vpop.f32.mrb[115].mxu0  ;;  %v8456_v37 = vpop.f32.mrb[114].mxu1 }
 0x43a   :  { %6677 = vst.msk [vmem:[%s13906_s3 + $0x310] sm:$0xff] %vm529_vm0, %v6035_v3  ;;  %6686 = vst.msk [vmem:[%s13906_s3 + $0x358] sm:$0xff] %vm529_vm0, %v8456_v37  ;;  %v6164_v6 = vpop.f32.mrb[115].mxu1 }
 0x43b   :  { %6685 = vst.msk [vmem:[%s13906_s3 + $0x350] sm:$0xff] %vm529_vm0, %v6164_v6 }
 0x440   :  { %v8431_v27 = vpop.f32.mrb[116].mxu0 }
 0x441   :  { %6680 = vst.msk [vmem:[%s13906_s3 + $0x328] sm:$0xff] %vm529_vm0, %v8431_v27  ;;  %v6045_v50 = vpop.f32.mrb[117].mxu0  ;;  %v8459_v45 = vpop.f32.mrb[116].mxu1 }
 0x442   :  { %6679 = vst.msk [vmem:[%s13906_s3 + $0x320] sm:$0xff] %vm529_vm0, %v6045_v50  ;;  %6688 = vst.msk [vmem:[%s13906_s3 + $0x368] sm:$0xff] %vm529_vm0, %v8459_v45  ;;  %v6174_v0 = vpop.f32.mrb[117].mxu1 }
 0x443   :  { %6687 = vst.msk [vmem:[%s13906_s3 + $0x360] sm:$0xff] %vm529_vm0, %v6174_v0 }
 0x448   :  { %v8434_v9 = vpop.f32.mrb[118].mxu0 }
 0x449   :  { %6682 = vst.msk [vmem:[%s13906_s3 + $0x338] sm:$0xff] %vm529_vm0, %v8434_v9  ;;  %v6055_v8 = vpop.f32.mrb[119].mxu0  ;;  %v8462_v53 = vpop.f32.mrb[118].mxu1 }
 0x44a   :  { %6681 = vst.msk [vmem:[%s13906_s3 + $0x330] sm:$0xff] %vm529_vm0, %v6055_v8  ;;  %6690 = vst.msk [vmem:[%s13906_s3 + $0x378] sm:$0xff] %vm529_vm0, %v8462_v53  ;;  %v6184_v19 = vpop.f32.mrb[119].mxu1 }
 0x44b   :  { %6689 = vst.msk [vmem:[%s13906_s3 + $0x370] sm:$0xff] %vm529_vm0, %v6184_v19 }
 0x450   :  { %v8481_v41 = vpop.f32.mrb[120].mxu0 }
 0x451   :  { %6692 = vst.msk [vmem:[%s13906_s3 + $0x388] sm:$0xff] %vm529_vm0, %v8481_v41  ;;  %v6283_v13 = vpop.f32.mrb[121].mxu0  ;;  %v8509_v36 = vpop.f32.mrb[120].mxu1 }
 0x452   :  { %6691 = vst.msk [vmem:[%s13906_s3 + $0x380] sm:$0xff] %vm529_vm0, %v6283_v13  ;;  %6700 = vst.msk [vmem:[%s13906_s3 + $0x3c8] sm:$0xff] %vm529_vm0, %v8509_v36  ;;  %v6412_v4 = vpop.f32.mrb[121].mxu1 }
 0x453   :  { %6699 = vst.msk [vmem:[%s13906_s3 + $0x3c0] sm:$0xff] %vm529_vm0, %v6412_v4 }
 0x458   :  { %v8484_v22 = vpop.f32.mrb[122].mxu0 }
 0x459   :  { %6694 = vst.msk [vmem:[%s13906_s3 + $0x398] sm:$0xff] %vm529_vm0, %v8484_v22  ;;  %v6293_v35 = vpop.f32.mrb[123].mxu0  ;;  %v8512_v24 = vpop.f32.mrb[122].mxu1 }
 0x45a   :  { %6693 = vst.msk [vmem:[%s13906_s3 + $0x390] sm:$0xff] %vm529_vm0, %v6293_v35  ;;  %6702 = vst.msk [vmem:[%s13906_s3 + $0x3d8] sm:$0xff] %vm529_vm0, %v8512_v24  ;;  %v6422_v25 = vpop.f32.mrb[123].mxu1 }
 0x45b   :  { %6701 = vst.msk [vmem:[%s13906_s3 + $0x3d0] sm:$0xff] %vm529_vm0, %v6422_v25 }
 0x460   :  { %v8487_v23 = vpop.f32.mrb[124].mxu0 }
 0x461   :  { %6696 = vst.msk [vmem:[%s13906_s3 + $0x3a8] sm:$0xff] %vm529_vm0, %v8487_v23  ;;  %v6303_v26 = vpop.f32.mrb[125].mxu0  ;;  %v8515_v1 = vpop.f32.mrb[124].mxu1 }
 0x462   :  { %6695 = vst.msk [vmem:[%s13906_s3 + $0x3a0] sm:$0xff] %vm529_vm0, %v6303_v26  ;;  %6704 = vst.msk [vmem:[%s13906_s3 + $0x3e8] sm:$0xff] %vm529_vm0, %v8515_v1  ;;  %v6432_v56 = vpop.f32.mrb[125].mxu1 }
 0x463   :  { %6703 = vst.msk [vmem:[%s13906_s3 + $0x3e0] sm:$0xff] %vm529_vm0, %v6432_v56 }
 0x468   :  { %v8490_v12 = vpop.f32.mrb[126].mxu0 }
 0x469   :  { %6698 = vst.msk [vmem:[%s13906_s3 + $0x3b8] sm:$0xff] %vm529_vm0, %v8490_v12  ;;  %v6313_v49 = vpop.f32.mrb[127].mxu0  ;;  %v8518_v10 = vpop.f32.mrb[126].mxu1 }
 0x46a   :  { %6697 = vst.msk [vmem:[%s13906_s3 + $0x3b0] sm:$0xff] %vm529_vm0, %v6313_v49  ;;  %6706 = vst.msk [vmem:[%s13906_s3 + $0x3f8] sm:$0xff] %vm529_vm0, %v8518_v10  ;;  %v6442_v55 = vpop.f32.mrb[127].mxu1 }
 0x46b   :  { %6705 = vst.msk [vmem:[%s13906_s3 + $0x3f0] sm:$0xff] %vm529_vm0, %v6442_v55 }
 0x46c   :  { %9696 = dma.done.wait [#allocation3], 16384  }
 0x46d   :  { %9697 = vsyncadd [#allocation3], 4294950912 }
 0x46e   :  { %6726 = vsyncpa [#allocation3], 1 }

</bundles_post_ra>
